<compile_context>
chip_gen: v7x
topology: tpu7x:2x2x1
jax: 0.10.0
libtpu: 0.0.40
codegen_flags: <defaults>
</compile_context>

<pallas_src>
import functools

import jax
import jax.numpy as jnp
from jax.experimental import pallas as pl
from jax.experimental.pallas import tpu as pltpu

IN_DIMS = 784
IN_PAD = 896            # 7 * 128 — lane-dense padding of the 784 feature axis
ENCOD_DIMS = 64
NEG_SLOPE = 0.1
DIMS = [IN_DIMS, 512, 256, 128, ENCOD_DIMS, 128, 256, 512, IN_DIMS]
N_LAYERS = len(DIMS) - 1


def _round_up(x, m):
    return (x + m - 1) // m * m


def _leaky_relu(y, slope):
    return jnp.where(y >= 0, y, slope * y)


def ae_kernel(x_ref, *refs):
    # refs = (w1, b1, w2, b2, ..., w8, b8, out_ref)
    out_ref = refs[-1]
    param_refs = refs[:-1]

    # x arrives already bf16 (cast once in the wrapper — halves input DMA).
    h = x_ref[...]
    for layer in range(N_LAYERS):
        w_ref = param_refs[2 * layer]       # bf16 (in, out), lane-padded
        b_ref = param_refs[2 * layer + 1]   # f32  (1, out)
        # bf16 operands, f32 accumulation on the MXU; bias add in f32.
        y = jnp.dot(h, w_ref[...], preferred_element_type=jnp.float32) + b_ref[...]
        if layer < N_LAYERS - 1:
            a = _leaky_relu(y, NEG_SLOPE)           # f32 elementwise (VPU)
            h = a.astype(jnp.bfloat16)              # next matmul operand
        else:
            out_ref[...] = jax.nn.sigmoid(y)        # final Sigmoid, f32 output


def init_params(key):
    """Matches ae._init_weights: W ~ N(0, 0.01), b = 0.  Returns list of (W, b)
    with W shaped (in_features, out_features) so y = x @ W + b == PyTorch's
    x @ W_pt.T + b."""
    params = []
    for i in range(N_LAYERS):
        key, sub = jax.random.split(key)
        d_in, d_out = DIMS[i], DIMS[i + 1]
        w = 0.01 * jax.random.normal(sub, (d_in, d_out), dtype=jnp.float32)
        b = jnp.zeros((d_out,), dtype=jnp.float32)
        params.append((w, b))
    return params


def prepare_params(params):
    """One-time host-side prep: zero-pad the 784-wide axes to 896 lanes and cast
    weights to bf16 (casts stay OUTSIDE the kernel body)."""
    flat = []
    for w, b in params:
        d_in, d_out = w.shape
        pad_in = (IN_PAD - d_in) if d_in == IN_DIMS else 0
        pad_out = (IN_PAD - d_out) if d_out == IN_DIMS else 0
        w_p = jnp.pad(w, ((0, pad_in), (0, pad_out))).astype(jnp.bfloat16)
        b_p = jnp.pad(b, ((0, pad_out),)).reshape(1, -1).astype(jnp.float32)
        flat.append(w_p)
        flat.append(b_p)
    return flat


@functools.partial(jax.jit, static_argnames=("batch_tile",))
def ae_forward(x, flat_params, batch_tile=256):
    B, D = x.shape
    assert D == IN_DIMS

    # Effective batch tile: fill the MXU for large B, shrink (multiple of 8,
    # the sublane count) for small B.  Wrapper pads B up to a tile multiple.
    tile = min(batch_tile, _round_up(B, 8))
    B_pad = _round_up(B, tile)
    n_tiles = B_pad // tile

    # Lane-dense padding 784 -> 896 and batch padding; cast to bf16 once here.
    x_p = jnp.pad(x, ((0, B_pad - B), (0, IN_PAD - IN_DIMS))).astype(jnp.bfloat16)

    x_spec = pl.BlockSpec((tile, IN_PAD), lambda i: (i, 0))
    out_spec = pl.BlockSpec((tile, IN_PAD), lambda i: (i, 0))

    # Params: full arrays, constant block index -> VMEM-resident across the grid.
    # (rank bound via default arg so the lambdas don't share a loop variable)
    param_specs = [
        pl.BlockSpec(p.shape, lambda i, r=p.ndim: (0,) * r) for p in flat_params
    ]

    out = pl.pallas_call(
        ae_kernel,
        out_shape=jax.ShapeDtypeStruct((B_pad, IN_PAD), jnp.float32),
        grid_spec=pltpu.PrefetchScalarGridSpec(
            num_scalar_prefetch=0,
            grid=(n_tiles,),
            in_specs=[x_spec] + param_specs,
            out_specs=out_spec,
        ),
        compiler_params=pltpu.CompilerParams(
            dimension_semantics=("parallel",),   # batch axis shards across TCs
        ),
    )(x_p, *flat_params)

    return out[:B, :IN_DIMS]


def ae_reference(x, params):
    """Pure-JAX f32 reference for correctness check."""
    h = x
    for layer, (w, b) in enumerate(params):
        y = h @ w + b
        if layer < N_LAYERS - 1:
            h = jnp.where(y >= 0, y, NEG_SLOPE * y)
        else:
            h = jax.nn.sigmoid(y)
    return h


if __name__ == "__main__":
    key = jax.random.PRNGKey(0)
    key_x, key_p = jax.random.split(key)

    B = 8  # small smoke-test batch; wrapper handles any B (default tile 256)
    x = jax.random.uniform(key_x, (B, IN_DIMS), dtype=jnp.float32)  # MNIST-like
    params = init_params(key_p)
    flat_params = prepare_params(params)

    out = ae_forward(x, flat_params)
    out = jax.block_until_ready(out)

    ref = ae_reference(x, params)
    assert out.shape == (B, IN_DIMS)
    # bf16 matmul operands vs f32 reference -> looser tolerance.
    assert jnp.allclose(out, ref, atol=2e-2, rtol=2e-2), "mismatch vs reference"

    print("KERNEL_OK")
</pallas_src>

<mosaic_0001>
module attributes {stable_mosaic.version = 11 : i64} {
  func.func @ae_kernel(%arg0: i32, %arg1: memref<8x896xbf16, #tpu.memory_space<vmem>>, %arg2: memref<896x512xbf16, #tpu.memory_space<vmem>>, %arg3: memref<1x512xf32, #tpu.memory_space<vmem>>, %arg4: memref<512x256xbf16, #tpu.memory_space<vmem>>, %arg5: memref<1x256xf32, #tpu.memory_space<vmem>>, %arg6: memref<256x128xbf16, #tpu.memory_space<vmem>>, %arg7: memref<1x128xf32, #tpu.memory_space<vmem>>, %arg8: memref<128x64xbf16, #tpu.memory_space<vmem>>, %arg9: memref<1x64xf32, #tpu.memory_space<vmem>>, %arg10: memref<64x128xbf16, #tpu.memory_space<vmem>>, %arg11: memref<1x128xf32, #tpu.memory_space<vmem>>, %arg12: memref<128x256xbf16, #tpu.memory_space<vmem>>, %arg13: memref<1x256xf32, #tpu.memory_space<vmem>>, %arg14: memref<256x512xbf16, #tpu.memory_space<vmem>>, %arg15: memref<1x512xf32, #tpu.memory_space<vmem>>, %arg16: memref<512x896xbf16, #tpu.memory_space<vmem>>, %arg17: memref<1x896xf32, #tpu.memory_space<vmem>>, %arg18: memref<8x896xf32, #tpu.memory_space<vmem>>) attributes {dimension_semantics = [#tpu.dimension_semantics<parallel>], iteration_bounds = array<i64: 1>, scalar_prefetch = 0 : i64, scratch_operands = 0 : i64, tpu.core_type = #tpu.core_type<tc>, window_params = [{transform_indices = @transform_0, window_bounds = array<i64: 8, 896>}, {pipeline_mode = #tpu.pipeline_mode<synchronous>, transform_indices = @transform_1, window_bounds = array<i64: 896, 512>}, {pipeline_mode = #tpu.pipeline_mode<synchronous>, transform_indices = @transform_2, window_bounds = array<i64: 1, 512>}, {pipeline_mode = #tpu.pipeline_mode<synchronous>, transform_indices = @transform_3, window_bounds = array<i64: 512, 256>}, {pipeline_mode = #tpu.pipeline_mode<synchronous>, transform_indices = @transform_4, window_bounds = array<i64: 1, 256>}, {pipeline_mode = #tpu.pipeline_mode<synchronous>, transform_indices = @transform_5, window_bounds = array<i64: 256, 128>}, {pipeline_mode = #tpu.pipeline_mode<synchronous>, transform_indices = @transform_6, window_bounds = array<i64: 1, 128>}, {pipeline_mode = #tpu.pipeline_mode<synchronous>, transform_indices = @transform_7, window_bounds = array<i64: 128, 64>}, {pipeline_mode = #tpu.pipeline_mode<synchronous>, transform_indices = @transform_8, window_bounds = array<i64: 1, 64>}, {pipeline_mode = #tpu.pipeline_mode<synchronous>, transform_indices = @transform_9, window_bounds = array<i64: 64, 128>}, {pipeline_mode = #tpu.pipeline_mode<synchronous>, transform_indices = @transform_10, window_bounds = array<i64: 1, 128>}, {pipeline_mode = #tpu.pipeline_mode<synchronous>, transform_indices = @transform_11, window_bounds = array<i64: 128, 256>}, {pipeline_mode = #tpu.pipeline_mode<synchronous>, transform_indices = @transform_12, window_bounds = array<i64: 1, 256>}, {pipeline_mode = #tpu.pipeline_mode<synchronous>, transform_indices = @transform_13, window_bounds = array<i64: 256, 512>}, {pipeline_mode = #tpu.pipeline_mode<synchronous>, transform_indices = @transform_14, window_bounds = array<i64: 1, 512>}, {pipeline_mode = #tpu.pipeline_mode<synchronous>, transform_indices = @transform_15, window_bounds = array<i64: 512, 896>}, {pipeline_mode = #tpu.pipeline_mode<synchronous>, transform_indices = @transform_16, window_bounds = array<i64: 1, 896>}, {transform_indices = @transform_17, window_bounds = array<i64: 8, 896>}]} {
    %c0 = arith.constant 0 : index
    %c0_0 = arith.constant 0 : index
    %0 = vector.load %arg1[%c0, %c0_0] : memref<8x896xbf16, #tpu.memory_space<vmem>>, vector<8x896xbf16>
    %c0_1 = arith.constant 0 : index
    %c0_2 = arith.constant 0 : index
    %1 = vector.load %arg2[%c0_1, %c0_2] : memref<896x512xbf16, #tpu.memory_space<vmem>>, vector<896x512xbf16>
    %cst = arith.constant dense<0.000000e+00> : vector<8x512xf32>
    %2 = tpu.matmul %0, %1, %cst {dimension_numbers = #tpu.dot_dimension_numbers<[1], [0], [0], [1], [0, 0, 1, 1], [], []>} : vector<8x896xbf16>, vector<896x512xbf16>, vector<8x512xf32> -> vector<8x512xf32>
    %c0_3 = arith.constant 0 : index
    %c0_4 = arith.constant 0 : index
    %3 = vector.load %arg3[%c0_3, %c0_4] : memref<1x512xf32, #tpu.memory_space<vmem>>, vector<1x512xf32>
    %4 = vector.broadcast %3 : vector<1x512xf32> to vector<8x512xf32>
    %5 = arith.addf %2, %4 : vector<8x512xf32>
    %cst_5 = arith.constant 0.000000e+00 : f32
    %6 = vector.broadcast %cst_5 : f32 to vector<8x512xf32>
    %7 = arith.cmpf oge, %5, %6 : vector<8x512xf32>
    %cst_6 = arith.constant 1.000000e-01 : f32
    %8 = vector.broadcast %cst_6 : f32 to vector<8x512xf32>
    %9 = arith.mulf %8, %5 : vector<8x512xf32>
    %10 = arith.select %7, %5, %9 : vector<8x512xi1>, vector<8x512xf32>
    %11 = arith.truncf %10 : vector<8x512xf32> to vector<8x512xbf16>
    %c0_7 = arith.constant 0 : index
    %c0_8 = arith.constant 0 : index
    %12 = vector.load %arg4[%c0_7, %c0_8] : memref<512x256xbf16, #tpu.memory_space<vmem>>, vector<512x256xbf16>
    %cst_9 = arith.constant dense<0.000000e+00> : vector<8x256xf32>
    %13 = tpu.matmul %11, %12, %cst_9 {dimension_numbers = #tpu.dot_dimension_numbers<[1], [0], [0], [1], [0, 0, 1, 1], [], []>} : vector<8x512xbf16>, vector<512x256xbf16>, vector<8x256xf32> -> vector<8x256xf32>
    %c0_10 = arith.constant 0 : index
    %c0_11 = arith.constant 0 : index
    %14 = vector.load %arg5[%c0_10, %c0_11] : memref<1x256xf32, #tpu.memory_space<vmem>>, vector<1x256xf32>
    %15 = vector.broadcast %14 : vector<1x256xf32> to vector<8x256xf32>
    %16 = arith.addf %13, %15 : vector<8x256xf32>
    %cst_12 = arith.constant 0.000000e+00 : f32
    %17 = vector.broadcast %cst_12 : f32 to vector<8x256xf32>
    %18 = arith.cmpf oge, %16, %17 : vector<8x256xf32>
    %cst_13 = arith.constant 1.000000e-01 : f32
    %19 = vector.broadcast %cst_13 : f32 to vector<8x256xf32>
    %20 = arith.mulf %19, %16 : vector<8x256xf32>
    %21 = arith.select %18, %16, %20 : vector<8x256xi1>, vector<8x256xf32>
    %22 = arith.truncf %21 : vector<8x256xf32> to vector<8x256xbf16>
    %c0_14 = arith.constant 0 : index
    %c0_15 = arith.constant 0 : index
    %23 = vector.load %arg6[%c0_14, %c0_15] : memref<256x128xbf16, #tpu.memory_space<vmem>>, vector<256x128xbf16>
    %cst_16 = arith.constant dense<0.000000e+00> : vector<8x128xf32>
    %24 = tpu.matmul %22, %23, %cst_16 {dimension_numbers = #tpu.dot_dimension_numbers<[1], [0], [0], [1], [0, 0, 1, 1], [], []>} : vector<8x256xbf16>, vector<256x128xbf16>, vector<8x128xf32> -> vector<8x128xf32>
    %c0_17 = arith.constant 0 : index
    %c0_18 = arith.constant 0 : index
    %25 = vector.load %arg7[%c0_17, %c0_18] : memref<1x128xf32, #tpu.memory_space<vmem>>, vector<1x128xf32>
    %26 = vector.broadcast %25 : vector<1x128xf32> to vector<8x128xf32>
    %27 = arith.addf %24, %26 : vector<8x128xf32>
    %cst_19 = arith.constant 0.000000e+00 : f32
    %28 = vector.broadcast %cst_19 : f32 to vector<8x128xf32>
    %29 = arith.cmpf oge, %27, %28 : vector<8x128xf32>
    %cst_20 = arith.constant 1.000000e-01 : f32
    %30 = vector.broadcast %cst_20 : f32 to vector<8x128xf32>
    %31 = arith.mulf %30, %27 : vector<8x128xf32>
    %32 = arith.select %29, %27, %31 : vector<8x128xi1>, vector<8x128xf32>
    %33 = arith.truncf %32 : vector<8x128xf32> to vector<8x128xbf16>
    %c0_21 = arith.constant 0 : index
    %c0_22 = arith.constant 0 : index
    %34 = vector.load %arg8[%c0_21, %c0_22] : memref<128x64xbf16, #tpu.memory_space<vmem>>, vector<128x64xbf16>
    %cst_23 = arith.constant dense<0.000000e+00> : vector<8x64xf32>
    %35 = tpu.matmul %33, %34, %cst_23 {dimension_numbers = #tpu.dot_dimension_numbers<[1], [0], [0], [1], [0, 0, 1, 1], [], []>} : vector<8x128xbf16>, vector<128x64xbf16>, vector<8x64xf32> -> vector<8x64xf32>
    %c0_24 = arith.constant 0 : index
    %c0_25 = arith.constant 0 : index
    %36 = vector.load %arg9[%c0_24, %c0_25] : memref<1x64xf32, #tpu.memory_space<vmem>>, vector<1x64xf32>
    %37 = vector.broadcast %36 : vector<1x64xf32> to vector<8x64xf32>
    %38 = arith.addf %35, %37 : vector<8x64xf32>
    %cst_26 = arith.constant 0.000000e+00 : f32
    %39 = vector.broadcast %cst_26 : f32 to vector<8x64xf32>
    %40 = arith.cmpf oge, %38, %39 : vector<8x64xf32>
    %cst_27 = arith.constant 1.000000e-01 : f32
    %41 = vector.broadcast %cst_27 : f32 to vector<8x64xf32>
    %42 = arith.mulf %41, %38 : vector<8x64xf32>
    %43 = arith.select %40, %38, %42 : vector<8x64xi1>, vector<8x64xf32>
    %44 = arith.truncf %43 : vector<8x64xf32> to vector<8x64xbf16>
    %c0_28 = arith.constant 0 : index
    %c0_29 = arith.constant 0 : index
    %45 = vector.load %arg10[%c0_28, %c0_29] : memref<64x128xbf16, #tpu.memory_space<vmem>>, vector<64x128xbf16>
    %cst_30 = arith.constant dense<0.000000e+00> : vector<8x128xf32>
    %46 = tpu.matmul %44, %45, %cst_30 {dimension_numbers = #tpu.dot_dimension_numbers<[1], [0], [0], [1], [0, 0, 1, 1], [], []>} : vector<8x64xbf16>, vector<64x128xbf16>, vector<8x128xf32> -> vector<8x128xf32>
    %c0_31 = arith.constant 0 : index
    %c0_32 = arith.constant 0 : index
    %47 = vector.load %arg11[%c0_31, %c0_32] : memref<1x128xf32, #tpu.memory_space<vmem>>, vector<1x128xf32>
    %48 = vector.broadcast %47 : vector<1x128xf32> to vector<8x128xf32>
    %49 = arith.addf %46, %48 : vector<8x128xf32>
    %cst_33 = arith.constant 0.000000e+00 : f32
    %50 = vector.broadcast %cst_33 : f32 to vector<8x128xf32>
    %51 = arith.cmpf oge, %49, %50 : vector<8x128xf32>
    %cst_34 = arith.constant 1.000000e-01 : f32
    %52 = vector.broadcast %cst_34 : f32 to vector<8x128xf32>
    %53 = arith.mulf %52, %49 : vector<8x128xf32>
    %54 = arith.select %51, %49, %53 : vector<8x128xi1>, vector<8x128xf32>
    %55 = arith.truncf %54 : vector<8x128xf32> to vector<8x128xbf16>
    %c0_35 = arith.constant 0 : index
    %c0_36 = arith.constant 0 : index
    %56 = vector.load %arg12[%c0_35, %c0_36] : memref<128x256xbf16, #tpu.memory_space<vmem>>, vector<128x256xbf16>
    %cst_37 = arith.constant dense<0.000000e+00> : vector<8x256xf32>
    %57 = tpu.matmul %55, %56, %cst_37 {dimension_numbers = #tpu.dot_dimension_numbers<[1], [0], [0], [1], [0, 0, 1, 1], [], []>} : vector<8x128xbf16>, vector<128x256xbf16>, vector<8x256xf32> -> vector<8x256xf32>
    %c0_38 = arith.constant 0 : index
    %c0_39 = arith.constant 0 : index
    %58 = vector.load %arg13[%c0_38, %c0_39] : memref<1x256xf32, #tpu.memory_space<vmem>>, vector<1x256xf32>
    %59 = vector.broadcast %58 : vector<1x256xf32> to vector<8x256xf32>
    %60 = arith.addf %57, %59 : vector<8x256xf32>
    %cst_40 = arith.constant 0.000000e+00 : f32
    %61 = vector.broadcast %cst_40 : f32 to vector<8x256xf32>
    %62 = arith.cmpf oge, %60, %61 : vector<8x256xf32>
    %cst_41 = arith.constant 1.000000e-01 : f32
    %63 = vector.broadcast %cst_41 : f32 to vector<8x256xf32>
    %64 = arith.mulf %63, %60 : vector<8x256xf32>
    %65 = arith.select %62, %60, %64 : vector<8x256xi1>, vector<8x256xf32>
    %66 = arith.truncf %65 : vector<8x256xf32> to vector<8x256xbf16>
    %c0_42 = arith.constant 0 : index
    %c0_43 = arith.constant 0 : index
    %67 = vector.load %arg14[%c0_42, %c0_43] : memref<256x512xbf16, #tpu.memory_space<vmem>>, vector<256x512xbf16>
    %cst_44 = arith.constant dense<0.000000e+00> : vector<8x512xf32>
    %68 = tpu.matmul %66, %67, %cst_44 {dimension_numbers = #tpu.dot_dimension_numbers<[1], [0], [0], [1], [0, 0, 1, 1], [], []>} : vector<8x256xbf16>, vector<256x512xbf16>, vector<8x512xf32> -> vector<8x512xf32>
    %c0_45 = arith.constant 0 : index
    %c0_46 = arith.constant 0 : index
    %69 = vector.load %arg15[%c0_45, %c0_46] : memref<1x512xf32, #tpu.memory_space<vmem>>, vector<1x512xf32>
    %70 = vector.broadcast %69 : vector<1x512xf32> to vector<8x512xf32>
    %71 = arith.addf %68, %70 : vector<8x512xf32>
    %cst_47 = arith.constant 0.000000e+00 : f32
    %72 = vector.broadcast %cst_47 : f32 to vector<8x512xf32>
    %73 = arith.cmpf oge, %71, %72 : vector<8x512xf32>
    %cst_48 = arith.constant 1.000000e-01 : f32
    %74 = vector.broadcast %cst_48 : f32 to vector<8x512xf32>
    %75 = arith.mulf %74, %71 : vector<8x512xf32>
    %76 = arith.select %73, %71, %75 : vector<8x512xi1>, vector<8x512xf32>
    %77 = arith.truncf %76 : vector<8x512xf32> to vector<8x512xbf16>
    %c0_49 = arith.constant 0 : index
    %c0_50 = arith.constant 0 : index
    %78 = vector.load %arg16[%c0_49, %c0_50] : memref<512x896xbf16, #tpu.memory_space<vmem>>, vector<512x896xbf16>
    %cst_51 = arith.constant dense<0.000000e+00> : vector<8x896xf32>
    %79 = tpu.matmul %77, %78, %cst_51 {dimension_numbers = #tpu.dot_dimension_numbers<[1], [0], [0], [1], [0, 0, 1, 1], [], []>} : vector<8x512xbf16>, vector<512x896xbf16>, vector<8x896xf32> -> vector<8x896xf32>
    %c0_52 = arith.constant 0 : index
    %c0_53 = arith.constant 0 : index
    %80 = vector.load %arg17[%c0_52, %c0_53] : memref<1x896xf32, #tpu.memory_space<vmem>>, vector<1x896xf32>
    %81 = vector.broadcast %80 : vector<1x896xf32> to vector<8x896xf32>
    %82 = arith.addf %79, %81 : vector<8x896xf32>
    %83 = arith.negf %82 : vector<8x896xf32>
    %84 = math.exp %83 : vector<8x896xf32>
    %cst_54 = arith.constant 1.000000e+00 : f32
    %85 = vector.broadcast %cst_54 : f32 to vector<8x896xf32>
    %86 = arith.addf %85, %84 : vector<8x896xf32>
    %87 = arith.divf %85, %86 : vector<8x896xf32>
    %c0_55 = arith.constant 0 : index
    %c0_56 = arith.constant 0 : index
    %88 = vector.load %arg18[%c0_55, %c0_56] : memref<8x896xf32, #tpu.memory_space<vmem>>, vector<8x896xf32>
    tpu.vector_store %arg18[%c0_55, %c0_56], %87 {strides = array<i32>} : memref<8x896xf32, #tpu.memory_space<vmem>>, vector<8x896xf32>,
    return
  }
  func.func @transform_0(%arg0: i32) -> (i32, i32) {
    %c0_i32 = arith.constant 0 : i32
    %c0_i32_0 = arith.constant 0 : i32
    return %arg0, %c0_i32 : i32, i32
  }
  func.func @transform_1(%arg0: i32) -> (i32, i32) {
    %c0_i32 = arith.constant 0 : i32
    %c0_i32_0 = arith.constant 0 : i32
    %c0_i32_1 = arith.constant 0 : i32
    return %c0_i32, %c0_i32_0 : i32, i32
  }
  func.func @transform_2(%arg0: i32) -> (i32, i32) {
    %c0_i32 = arith.constant 0 : i32
    %c0_i32_0 = arith.constant 0 : i32
    %c0_i32_1 = arith.constant 0 : i32
    return %c0_i32, %c0_i32_0 : i32, i32
  }
  func.func @transform_3(%arg0: i32) -> (i32, i32) {
    %c0_i32 = arith.constant 0 : i32
    %c0_i32_0 = arith.constant 0 : i32
    %c0_i32_1 = arith.constant 0 : i32
    return %c0_i32, %c0_i32_0 : i32, i32
  }
  func.func @transform_4(%arg0: i32) -> (i32, i32) {
    %c0_i32 = arith.constant 0 : i32
    %c0_i32_0 = arith.constant 0 : i32
    %c0_i32_1 = arith.constant 0 : i32
    return %c0_i32, %c0_i32_0 : i32, i32
  }
  func.func @transform_5(%arg0: i32) -> (i32, i32) {
    %c0_i32 = arith.constant 0 : i32
    %c0_i32_0 = arith.constant 0 : i32
    %c0_i32_1 = arith.constant 0 : i32
    return %c0_i32, %c0_i32_0 : i32, i32
  }
  func.func @transform_6(%arg0: i32) -> (i32, i32) {
    %c0_i32 = arith.constant 0 : i32
    %c0_i32_0 = arith.constant 0 : i32
    %c0_i32_1 = arith.constant 0 : i32
    return %c0_i32, %c0_i32_0 : i32, i32
  }
  func.func @transform_7(%arg0: i32) -> (i32, i32) {
    %c0_i32 = arith.constant 0 : i32
    %c0_i32_0 = arith.constant 0 : i32
    %c0_i32_1 = arith.constant 0 : i32
    return %c0_i32, %c0_i32_0 : i32, i32
  }
  func.func @transform_8(%arg0: i32) -> (i32, i32) {
    %c0_i32 = arith.constant 0 : i32
    %c0_i32_0 = arith.constant 0 : i32
    %c0_i32_1 = arith.constant 0 : i32
    return %c0_i32, %c0_i32_0 : i32, i32
  }
  func.func @transform_9(%arg0: i32) -> (i32, i32) {
    %c0_i32 = arith.constant 0 : i32
    %c0_i32_0 = arith.constant 0 : i32
    %c0_i32_1 = arith.constant 0 : i32
    return %c0_i32, %c0_i32_0 : i32, i32
  }
  func.func @transform_10(%arg0: i32) -> (i32, i32) {
    %c0_i32 = arith.constant 0 : i32
    %c0_i32_0 = arith.constant 0 : i32
    %c0_i32_1 = arith.constant 0 : i32
    return %c0_i32, %c0_i32_0 : i32, i32
  }
  func.func @transform_11(%arg0: i32) -> (i32, i32) {
    %c0_i32 = arith.constant 0 : i32
    %c0_i32_0 = arith.constant 0 : i32
    %c0_i32_1 = arith.constant 0 : i32
    return %c0_i32, %c0_i32_0 : i32, i32
  }
  func.func @transform_12(%arg0: i32) -> (i32, i32) {
    %c0_i32 = arith.constant 0 : i32
    %c0_i32_0 = arith.constant 0 : i32
    %c0_i32_1 = arith.constant 0 : i32
    return %c0_i32, %c0_i32_0 : i32, i32
  }
  func.func @transform_13(%arg0: i32) -> (i32, i32) {
    %c0_i32 = arith.constant 0 : i32
    %c0_i32_0 = arith.constant 0 : i32
    %c0_i32_1 = arith.constant 0 : i32
    return %c0_i32, %c0_i32_0 : i32, i32
  }
  func.func @transform_14(%arg0: i32) -> (i32, i32) {
    %c0_i32 = arith.constant 0 : i32
    %c0_i32_0 = arith.constant 0 : i32
    %c0_i32_1 = arith.constant 0 : i32
    return %c0_i32, %c0_i32_0 : i32, i32
  }
  func.func @transform_15(%arg0: i32) -> (i32, i32) {
    %c0_i32 = arith.constant 0 : i32
    %c0_i32_0 = arith.constant 0 : i32
    %c0_i32_1 = arith.constant 0 : i32
    return %c0_i32, %c0_i32_0 : i32, i32
  }
  func.func @transform_16(%arg0: i32) -> (i32, i32) {
    %c0_i32 = arith.constant 0 : i32
    %c0_i32_0 = arith.constant 0 : i32
    %c0_i32_1 = arith.constant 0 : i32
    return %c0_i32, %c0_i32_0 : i32, i32
  }
  func.func @transform_17(%arg0: i32) -> (i32, i32) {
    %c0_i32 = arith.constant 0 : i32
    %c0_i32_0 = arith.constant 0 : i32
    return %arg0, %c0_i32 : i32, i32
  }
}

</mosaic_0001>

<bundles_post_ra>
// kernel: ae_forward.1
= control target key start
LH: loop header
LB: loop body
LE: loop exit
PB: predicated region body
PF: predicated region fallthrough
CT: control target
= control target key end

     0   :  { %s7754_s0 = inlined_call_operand.vmem [shape: bf16[8,896], index: 0, kind: input, shape index: {}]   ;;  %s7755_s1 = inlined_call_operand.hbm [shape: bf16[896,512], index: 1, kind: input, shape index: {}]   ;;  %s7756_s2 = inlined_call_operand.hbm [shape: f32[1,512], index: 2, kind: input, shape index: {}]   ;;  %s7757_s3 = inlined_call_operand.hbm [shape: bf16[512,256], index: 3, kind: input, shape index: {}]   ;;  %s7758_s4 = inlined_call_operand.hbm [shape: f32[1,256], index: 4, kind: input, shape index: {}]   ;;  %s7759_s5 = inlined_call_operand.vmem [shape: bf16[256,128], index: 5, kind: input, shape index: {}]   ;;  %s7760_s6 = inlined_call_operand.hbm [shape: f32[1,128], index: 6, kind: input, shape index: {}]   ;;  %s7761_s7 = inlined_call_operand.vmem [shape: bf16[128,64], index: 7, kind: input, shape index: {}]   ;;  %s7762_s8 = inlined_call_operand.hbm [shape: f32[1,64], index: 8, kind: input, shape index: {}]   ;;  %s7763_s9 = inlined_call_operand.hbm [shape: bf16[64,128], index: 9, kind: input, shape index: {}]   ;;  %s7764_s10 = inlined_call_operand.vmem [shape: f32[1,128], index: 10, kind: input, shape index: {}]   ;;  %s7765_s11 = inlined_call_operand.vmem [shape: bf16[128,256], index: 11, kind: input, shape index: {}]   ;;  %s7766_s12 = inlined_call_operand.vmem [shape: f32[1,256], index: 12, kind: input, shape index: {}]   ;;  %s7767_s13 = inlined_call_operand.hbm [shape: bf16[256,512], index: 13, kind: input, shape index: {}]   ;;  %s7768_s14 = inlined_call_operand.vmem [shape: f32[1,512], index: 14, kind: input, shape index: {}]   ;;  %s7769_s15 = inlined_call_operand.hbm [shape: bf16[512,896], index: 15, kind: input, shape index: {}]   ;;  %s7770_s16 = inlined_call_operand.vmem [shape: f32[1,896], index: 16, kind: input, shape index: {}]   ;;  %s7771_s17 = inlined_call_operand.hbm [shape: f32[8,896], index: 17, kind: output, shape index: {}]  }
   0x1   :  { %7774 = sst [smem:[#allocation24_spill]] %s7754_s0 }
   0x2   :  { %7775 = sst [smem:[#allocation25_spill]] %s7755_s1 }
   0x3   :  { %22 = vsyncpa [#allocation3], 0 }
   0x4   :  { %23 = vsyncpa [#allocation6], 0 }
   0x5   :  { %24 = vsyncpa [#allocation9], 0 }
   0x6   :  { %25 = vsyncpa [#allocation12], 0 }
   0x7   :  { %26 = vsyncpa [#allocation15], 0 }
   0x8   :  { %27 = vsyncpa [#allocation4], 0  ;;  %s7266_s24 = smov [#allocation5]   ;;  %s7267_s26 = smov [#allocation8]  }
   0x9   :  { %s48_s25 = sshll.u32 %s7266_s24, 4  ;;  %s70_s27 = sshll.u32 %s7267_s26, 4  ;;  %s49_s25 = int_to_ptr.vmem [resolvable:$true] %s48_s25  ;;  %s71_s27 = int_to_ptr.vmem [resolvable:$true] %s70_s27 }
   0xa   :  { %s7034_s0 = scalar_lea.hbm %s7756_s2, 64 }
   0xb   :  { %p7035_p0 = scmp.ne.s32.totalorder %s7756_s2, %s7034_s0  ;;  %p7038_p1 = scmp.lt.u32.totalorder %s7034_s0, %s7756_s2 }
   0xd   :  { %p7040_p2 = pnand %p7038_p1, %p7035_p0 }
   0xf   :  { %7043 = shalt.err (!%p7040_p2)
}
  0x10   :  { %s7044_s20 = scalar_lea.vmem %s49_s25, 64  ;;  %p7049_p4 = scmp.lt.s32.totalorder %s49_s25, %s49_s25 }
  0x11   :  { %p7045_p3 = scmp.ne.s32.totalorder %s49_s25, %s7044_s20  ;;  %p7050_p5 = scmp.lt.s32.totalorder %s7044_s20, %s7044_s20 }
  0x13   :  { %p7051_p6 = por %p7050_p5, %p7049_p4 }
  0x15   :  { %p7052_p7 = pnand %p7051_p6, %p7045_p3 }
  0x17   :  { %7055 = shalt.err (!%p7052_p7)
}
  0x18   :  { %51 = dma.hbm_to_vmem [thread:$0]  %s7756_s2, 64, %s49_s25, [#allocation6]  }
  0x19   :  { %s7056_s26 = scalar_lea.hbm %s7758_s4, 32 }
  0x1a   :  { %p7057_p8 = scmp.ne.s32.totalorder %s7758_s4, %s7056_s26  ;;  %p7060_p9 = scmp.lt.u32.totalorder %s7056_s26, %s7758_s4 }
  0x1c   :  { %p7062_p10 = pnand %p7060_p9, %p7057_p8 }
  0x1e   :  { %7065 = shalt.err (!%p7062_p10)
}
  0x1f   :  { %s7066_s18 = scalar_lea.vmem %s71_s27, 32  ;;  %p7071_p12 = scmp.lt.s32.totalorder %s71_s27, %s71_s27 }
  0x20   :  { %p7067_p11 = scmp.ne.s32.totalorder %s71_s27, %s7066_s18  ;;  %p7072_p13 = scmp.lt.s32.totalorder %s7066_s18, %s7066_s18 }
  0x22   :  { %p7073_p0 = por %p7072_p13, %p7071_p12 }
  0x24   :  { %p7074_p1 = pnand %p7073_p0, %p7067_p11 }
  0x26   :  { %7077 = shalt.err (!%p7074_p1)
}
  0x27   :  { %73 = dma.hbm_to_vmem [thread:$0]  %s7758_s4, 32, %s71_s27, [#allocation9]  }
  0x28   :  { %s7268_s19 = smov [#allocation11]   ;;  %s7078_s22 = scalar_lea.hbm %s7762_s8, 16 }
  0x29   :  { %s94_s1 = sshll.u32 %s7268_s19, 4  ;;  %p7079_p2 = scmp.ne.s32.totalorder %s7762_s8, %s7078_s22  ;;  %s95_s1 = int_to_ptr.vmem [resolvable:$true] %s94_s1 }
  0x2a   :  { %p7082_p3 = scmp.lt.u32.totalorder %s7078_s22, %s7762_s8 }
  0x2c   :  { %p7084_p4 = pnand %p7082_p3, %p7079_p2 }
  0x2e   :  { %7087 = shalt.err (!%p7084_p4)
}
  0x2f   :  { %s7088_s29 = scalar_lea.vmem %s95_s1, 16  ;;  %s7092_s4 = scalar_lea.vmem %s95_s1, 32 }
  0x30   :  { %p7089_p5 = scmp.ne.s32.totalorder %s95_s1, %s7088_s29  ;;  %p7093_p6 = scmp.lt.s32.totalorder %s95_s1, %s95_s1 }
  0x31   :  { %p7094_p7 = scmp.lt.s32.totalorder %s7092_s4, %s7088_s29 }
  0x33   :  { %p7095_p8 = por %p7094_p7, %p7093_p6 }
  0x35   :  { %p7096_p9 = pnand %p7095_p8, %p7089_p5 }
  0x37   :  { %7099 = shalt.err (!%p7096_p9)
}
  0x38   :  { %97 = dma.hbm_to_vmem [thread:$0]  %s7762_s8, 16, %s95_s1, [#allocation12]  }
  0x39   :  { %s7269_s30 = smov [#allocation14]   ;;  %s7270_s2 = smov [#allocation2]  }
  0x3a   :  { %s121_s18 = sshll.u32 %s7269_s30, 4  ;;  %s35_s25 = sshll.u32 %s7270_s2, 4  ;;  %s122_s18 = int_to_ptr.vmem [resolvable:$true] %s121_s18  ;;  %s36_s25 = int_to_ptr.vmem [resolvable:$true] %s35_s25 }
  0x3b   :  { %s7100_s21 = scalar_lea.hbm %s7767_s13, 8192 }
  0x3c   :  { %p7101_p10 = scmp.ne.s32.totalorder %s7767_s13, %s7100_s21  ;;  %p7104_p11 = scmp.lt.u32.totalorder %s7100_s21, %s7767_s13 }
  0x3e   :  { %p7106_p12 = pnand %p7104_p11, %p7101_p10 }
  0x40   :  { %7109 = shalt.err (!%p7106_p12)
}
  0x41   :  { %s7110_s8 = scalar_lea.vmem %s122_s18, 8192  ;;  %p7115_p0 = scmp.lt.s32.totalorder %s122_s18, %s122_s18 }
  0x42   :  { %p7111_p13 = scmp.ne.s32.totalorder %s122_s18, %s7110_s8  ;;  %p7116_p1 = scmp.lt.s32.totalorder %s7110_s8, %s7110_s8 }
  0x44   :  { %p7117_p2 = por %p7116_p1, %p7115_p0 }
  0x46   :  { %p7118_p3 = pnand %p7117_p2, %p7111_p13 }
  0x48   :  { %7121 = shalt.err (!%p7118_p3)
}
  0x49   :  { %s7271_s1 = smov 256   ;;  %s7272_s28 = smov 16  }
  0x4a   :  { %127 = dma.hbm_to_vmem [thread:$0]  %s7767_s13, 8192, %s122_s18, [#allocation15], %s7271_s1, %s7271_s1, %s7272_s28  }
  0x4b   :  { %s7776_s30 = sld [smem:[#allocation25_spill]] }
  0x51   :  { %s7122_s2 = scalar_lea.hbm %s7776_s30, 28672 }
  0x52   :  { %p7123_p4 = scmp.ne.s32.totalorder %s7776_s30, %s7122_s2  ;;  %p7126_p5 = scmp.lt.u32.totalorder %s7122_s2, %s7776_s30 }
  0x54   :  { %p7128_p6 = pnand %p7126_p5, %p7123_p4 }
  0x56   :  { %7131 = shalt.err (!%p7128_p6)
}
  0x57   :  { %s7132_s23 = scalar_lea.vmem %s36_s25, 28672  ;;  %p7137_p8 = scmp.lt.s32.totalorder %s36_s25, %s36_s25 }
  0x58   :  { %p7133_p7 = scmp.ne.s32.totalorder %s36_s25, %s7132_s23  ;;  %p7138_p9 = scmp.lt.s32.totalorder %s7132_s23, %s7132_s23 }
  0x5a   :  { %p7139_p10 = por %p7138_p9, %p7137_p8 }
  0x5c   :  { %p7140_p11 = pnand %p7139_p10, %p7133_p7 }
  0x5e   :  { %7143 = shalt.err (!%p7140_p11)
}
  0x5f   :  { %41 = dma.hbm_to_vmem [thread:$0]  %s7776_s30, 28672, %s36_s25, [#allocation3], %s7271_s1, %s7271_s1, %s7272_s28  }
  0x60   :  { %s7273_s24 = smov [#allocation7]   ;;  %s7144_s4 = scalar_lea.hbm %s7757_s3, 8192 }
  0x61   :  { %s57_s26 = sshll.u32 %s7273_s24, 4  ;;  %p7145_p12 = scmp.ne.s32.totalorder %s7757_s3, %s7144_s4  ;;  %s58_s26 = int_to_ptr.vmem [resolvable:$true] %s57_s26 }
  0x62   :  { %p7148_p13 = scmp.lt.u32.totalorder %s7144_s4, %s7757_s3 }
  0x64   :  { %p7150_p0 = pnand %p7148_p13, %p7145_p12 }
  0x66   :  { %7153 = shalt.err (!%p7150_p0)
}
  0x67   :  { %s7154_s20 = scalar_lea.vmem %s58_s26, 8192  ;;  %p7159_p2 = scmp.lt.s32.totalorder %s58_s26, %s58_s26 }
  0x68   :  { %p7155_p1 = scmp.ne.s32.totalorder %s58_s26, %s7154_s20  ;;  %p7160_p3 = scmp.lt.s32.totalorder %s7154_s20, %s7154_s20 }
  0x6a   :  { %p7161_p4 = por %p7160_p3, %p7159_p2 }
  0x6c   :  { %p7162_p5 = pnand %p7161_p4, %p7155_p1 }
  0x6e   :  { %7165 = shalt.err (!%p7162_p5)
}
  0x6f   :  { %s7274_s25 = smov 128   ;;  %s7275_s1 = smov 8  }
  0x70   :  { %63 = dma.hbm_to_vmem [thread:$0]  %s7757_s3, 8192, %s58_s26, [#allocation6], %s7274_s25, %s7274_s25, %s7275_s1  }
  0x71   :  { %s7276_s21 = smov [#allocation10]   ;;  %s7277_s23 = smov [#allocation13]  }
  0x72   :  { %s82_s22 = sshll.u32 %s7276_s21, 4  ;;  %s103_s13 = sshll.u32 %s7277_s23, 4  ;;  %s83_s22 = int_to_ptr.vmem [resolvable:$true] %s82_s22  ;;  %s7449_s13 = int_to_ptr.vmem [resolvable:$true] %s103_s13 }
  0x73   :  { %s7166_s8 = scalar_lea.hbm %s7760_s6, 16 }
  0x74   :  { %p7167_p6 = scmp.ne.s32.totalorder %s7760_s6, %s7166_s8  ;;  %p7170_p7 = scmp.lt.u32.totalorder %s7166_s8, %s7760_s6 }
  0x76   :  { %p7172_p8 = pnand %p7170_p7, %p7167_p6 }
  0x78   :  { %7175 = shalt.err (!%p7172_p8)
}
  0x79   :  { %s7176_s3 = scalar_lea.vmem %s83_s22, 16  ;;  %s7180_s26 = scalar_lea.vmem %s83_s22, 32 }
  0x7a   :  { %p7177_p9 = scmp.ne.s32.totalorder %s83_s22, %s7176_s3  ;;  %p7181_p10 = scmp.lt.s32.totalorder %s83_s22, %s83_s22 }
  0x7b   :  { %p7182_p11 = scmp.lt.s32.totalorder %s7180_s26, %s7176_s3 }
  0x7d   :  { %p7183_p12 = por %p7182_p11, %p7181_p10 }
  0x7f   :  { %p7184_p13 = pnand %p7183_p12, %p7177_p9 }
  0x81   :  { %7187 = shalt.err (!%p7184_p13)
}
  0x82   :  { %85 = dma.hbm_to_vmem [thread:$0]  %s7760_s6, 16, %s83_s22, [#allocation9]  }
  0x83   :  { %s7188_s1 = scalar_lea.hbm %s7763_s9, 512 }
  0x84   :  { %p7189_p0 = scmp.ne.s32.totalorder %s7763_s9, %s7188_s1  ;;  %p7192_p1 = scmp.lt.u32.totalorder %s7188_s1, %s7763_s9 }
  0x86   :  { %p7194_p2 = pnand %p7192_p1, %p7189_p0 }
  0x88   :  { %7197 = shalt.err (!%p7194_p2)
}
  0x89   :  { %s7198_s18 = scalar_lea.vmem %s7449_s13, 512  ;;  %p7203_p4 = scmp.lt.s32.totalorder %s7449_s13, %s7449_s13 }
  0x8a   :  { %p7199_p3 = scmp.ne.s32.totalorder %s7449_s13, %s7198_s18  ;;  %p7204_p5 = scmp.lt.s32.totalorder %s7198_s18, %s7198_s18 }
  0x8c   :  { %p7205_p6 = por %p7204_p5, %p7203_p4 }
  0x8e   :  { %p7206_p7 = pnand %p7205_p6, %p7199_p3 }
  0x90   :  { %7209 = shalt.err (!%p7206_p7)
}
  0x91   :  { %s7278_s6 = smov 64   ;;  %s7279_s22 = smov 4  }
  0x92   :  { %109 = dma.hbm_to_vmem [thread:$0]  %s7763_s9, 512, %s7449_s13, [#allocation12], %s7278_s6, %s7278_s6, %s7279_s22  }
  0x93   :  { %s7280_s29 = smov [#allocation16]   ;;  %s7210_s3 = scalar_lea.hbm %s7769_s15, 28672 }
  0x94   :  { %s135_s4 = sshll.u32 %s7280_s29, 4  ;;  %p7211_p8 = scmp.ne.s32.totalorder %s7769_s15, %s7210_s3  ;;  %s136_s4 = int_to_ptr.vmem [resolvable:$true] %s135_s4 }
  0x95   :  { %p7214_p9 = scmp.lt.u32.totalorder %s7210_s3, %s7769_s15 }
  0x97   :  { %p7216_p10 = pnand %p7214_p9, %p7211_p8 }
  0x99   :  { %7219 = shalt.err (!%p7216_p10)
}
  0x9a   :  { %s7220_s25 = scalar_lea.vmem %s136_s4, 28672  ;;  %p7225_p12 = scmp.lt.s32.totalorder %s136_s4, %s136_s4 }
  0x9b   :  { %p7221_p11 = scmp.ne.s32.totalorder %s136_s4, %s7220_s25  ;;  %p7226_p13 = scmp.lt.s32.totalorder %s7220_s25, %s7220_s25 }
  0x9d   :  { %p7227_p0 = por %p7226_p13, %p7225_p12 }
  0x9f   :  { %p7228_p1 = pnand %p7227_p0, %p7221_p11 }
  0xa1   :  { %7231 = shalt.err (!%p7228_p1)
}
  0xa2   :  { %s7281_s9 = smov 448   ;;  %s7282_s13 = smov 28  }
  0xa3   :  { %141 = dma.hbm_to_vmem [thread:$0]  %s7769_s15, 28672, %s136_s4, [#allocation15], %s7281_s9, %s7281_s9, %s7282_s13  }
  0xa4   :  { %7254 = dma.done.wait [#allocation3], 28672  }
  0xa5   :  { %7255 = vsyncadd [#allocation3], 4294938624 }
  0xa6   :  { %7256 = dma.done.wait [#allocation6], 8256  }
  0xa7   :  { %7257 = vsyncadd [#allocation6], 4294959040 }
  0xa8   :  { %7258 = dma.done.wait [#allocation9], 48  }
  0xa9   :  { %7259 = vsyncadd [#allocation9], 4294967248 }
  0xaa   :  { %7260 = dma.done.wait [#allocation12], 528  }
  0xab   :  { %7261 = vsyncadd [#allocation12], 4294966768 }
  0xac   :  { %7262 = dma.done.wait [#allocation15], 36864  }
  0xad   :  { %7263 = vsyncadd [#allocation15], 4294930432  ;;  %v6099_v0 = vld [vmem:[#allocation2 + $0x4] ss:$16 sps:$4 sm:$0xff]   ;;  %v6101_v1 = vld [vmem:[#allocation2 + $0xc] ss:$16 sps:$4 sm:$0xff]  }
  0xae   :  { %1567 = vmatprep.subr.bf16.mxu0 %v6099_v0  ;;  %v6103_v2 = vld [vmem:[#allocation2] ss:$16 sps:$4 sm:$0xff]   ;;  %v6104_v3 = vld [vmem:[#allocation2 + $0x8] ss:$16 sps:$4 sm:$0xff]   ;;  %1731 = vmatprep.subr.bf16.mxu1 %v6101_v1  ;;  %v6105_v4 = vld [vmem:[#allocation2 + $0x24] ss:$16 sps:$4 sm:$0xff]  }
  0xaf   :  { %1568 = vmatpush1.bf16.msra.mxu0 %v6103_v2  ;;  %1732 = vmatpush1.bf16.msra.mxu1 %v6104_v3  ;;  %v6107_v5 = vld [vmem:[#allocation2 + $0x2c] ss:$16 sps:$4 sm:$0xff]   ;;  %v6109_v6 = vld [vmem:[#allocation2 + $0x20] ss:$16 sps:$4 sm:$0xff]   ;;  %v6110_v7 = vld [vmem:[#allocation2 + $0x28] ss:$16 sps:$4 sm:$0xff]  }
  0xb0   :  { %1569 = vmatprep.subr.bf16.mxu0 %v6105_v4  ;;  %1733 = vmatprep.subr.bf16.mxu1 %v6107_v5  ;;  %v6111_v8 = vld [vmem:[#allocation2 + $0x44] ss:$16 sps:$4 sm:$0xff]   ;;  %v6113_v9 = vld [vmem:[#allocation2 + $0x4c] ss:$16 sps:$4 sm:$0xff]   ;;  %v6115_v10 = vld [vmem:[#allocation2 + $0x40] ss:$16 sps:$4 sm:$0xff]  }
  0xb1   :  { %v6116_v11 = vld [vmem:[#allocation2 + $0x48] ss:$16 sps:$4 sm:$0xff]   ;;  %v6117_v12 = vld [vmem:[#allocation2 + $0x64] ss:$16 sps:$4 sm:$0xff]   ;;  %v6119_v13 = vld [vmem:[#allocation2 + $0x6c] ss:$16 sps:$4 sm:$0xff]  }
  0xb2   :  { %v6121_v14 = vld [vmem:[#allocation2 + $0x60] ss:$16 sps:$4 sm:$0xff]   ;;  %v6122_v15 = vld [vmem:[#allocation2 + $0x68] ss:$16 sps:$4 sm:$0xff]   ;;  %v6123_v16 = vld [vmem:[#allocation2 + $0x84] ss:$16 sps:$4 sm:$0xff]  }
  0xb3   :  { %1570 = vmatpush1.bf16.msra.mxu0 %v6109_v6  ;;  %1734 = vmatpush1.bf16.msra.mxu1 %v6110_v7  ;;  %v6125_v17 = vld [vmem:[#allocation2 + $0x8c] ss:$16 sps:$4 sm:$0xff]   ;;  %v6127_v18 = vld [vmem:[#allocation2 + $0x80] ss:$16 sps:$4 sm:$0xff]   ;;  %v6128_v19 = vld [vmem:[#allocation2 + $0x88] ss:$16 sps:$4 sm:$0xff]  }
  0xb4   :  { %1571 = vmatprep.subr.bf16.mxu0 %v6111_v8  ;;  %1735 = vmatprep.subr.bf16.mxu1 %v6113_v9  ;;  %v6129_v20 = vld [vmem:[#allocation2 + $0xa4] ss:$16 sps:$4 sm:$0xff]   ;;  %v6131_v21 = vld [vmem:[#allocation2 + $0xac] ss:$16 sps:$4 sm:$0xff]   ;;  %v6133_v22 = vld [vmem:[#allocation2 + $0xa0] ss:$16 sps:$4 sm:$0xff]  }
  0xb5   :  { %v6134_v23 = vld [vmem:[#allocation2 + $0xa8] ss:$16 sps:$4 sm:$0xff]   ;;  %v6135_v24 = vld [vmem:[#allocation2 + $0xc4] ss:$16 sps:$4 sm:$0xff]   ;;  %v6137_v25 = vld [vmem:[#allocation2 + $0xcc] ss:$16 sps:$4 sm:$0xff]  }
  0xb6   :  { %v6139_v26 = vld [vmem:[#allocation2 + $0xc0] ss:$16 sps:$4 sm:$0xff]   ;;  %v6140_v27 = vld [vmem:[#allocation2 + $0xc8] ss:$16 sps:$4 sm:$0xff]   ;;  %v6141_v28 = vld [vmem:[#allocation2 + $0xe4] ss:$16 sps:$4 sm:$0xff]  }
  0xb7   :  { %1572 = vmatpush1.bf16.msra.mxu0 %v6115_v10  ;;  %1736 = vmatpush1.bf16.msra.mxu1 %v6116_v11  ;;  %v6143_v29 = vld [vmem:[#allocation2 + $0xec] ss:$16 sps:$4 sm:$0xff]   ;;  %v6145_v30 = vld [vmem:[#allocation2 + $0xe0] ss:$16 sps:$4 sm:$0xff]   ;;  %v6146_v31 = vld [vmem:[#allocation2 + $0xe8] ss:$16 sps:$4 sm:$0xff]  }
  0xb8   :  { %1573 = vmatprep.subr.bf16.mxu0 %v6117_v12  ;;  %1737 = vmatprep.subr.bf16.mxu1 %v6119_v13  ;;  %v6147_v32 = vld [vmem:[#allocation2 + $0x104] ss:$16 sps:$4 sm:$0xff]   ;;  %v6149_v33 = vld [vmem:[#allocation2 + $0x10c] ss:$16 sps:$4 sm:$0xff]   ;;  %v6151_v34 = vld [vmem:[#allocation2 + $0x100] ss:$16 sps:$4 sm:$0xff]  }
  0xb9   :  { %v6152_v35 = vld [vmem:[#allocation2 + $0x108] ss:$16 sps:$4 sm:$0xff]   ;;  %v6153_v36 = vld [vmem:[#allocation2 + $0x124] ss:$16 sps:$4 sm:$0xff]   ;;  %v6155_v37 = vld [vmem:[#allocation2 + $0x12c] ss:$16 sps:$4 sm:$0xff]  }
  0xba   :  { %v6157_v38 = vld [vmem:[#allocation2 + $0x120] ss:$16 sps:$4 sm:$0xff]   ;;  %v6158_v39 = vld [vmem:[#allocation2 + $0x128] ss:$16 sps:$4 sm:$0xff]   ;;  %v6159_v40 = vld [vmem:[#allocation2 + $0x144] ss:$16 sps:$4 sm:$0xff]  }
  0xbb   :  { %1574 = vmatpush1.bf16.msra.mxu0 %v6121_v14  ;;  %1738 = vmatpush1.bf16.msra.mxu1 %v6122_v15  ;;  %v6161_v41 = vld [vmem:[#allocation2 + $0x14c] ss:$16 sps:$4 sm:$0xff]   ;;  %v6163_v42 = vld [vmem:[#allocation2 + $0x140] ss:$16 sps:$4 sm:$0xff]   ;;  %v6164_v43 = vld [vmem:[#allocation2 + $0x148] ss:$16 sps:$4 sm:$0xff]  }
  0xbc   :  { %1575 = vmatprep.subr.bf16.mxu0 %v6123_v16  ;;  %1739 = vmatprep.subr.bf16.mxu1 %v6125_v17  ;;  %v6165_v44 = vld [vmem:[#allocation2 + $0x164] ss:$16 sps:$4 sm:$0xff]   ;;  %v6167_v45 = vld [vmem:[#allocation2 + $0x16c] ss:$16 sps:$4 sm:$0xff]   ;;  %s7777_s21 = sld [smem:[#allocation24_spill]]  ;;  %vm7285_vm6 = vmmov 0  }
  0xbd   :  { %v6169_v47 = vld [vmem:[#allocation2 + $0x160] ss:$16 sps:$4 sm:$0xff]   ;;  %v6170_v49 = vld [vmem:[#allocation2 + $0x168] ss:$16 sps:$4 sm:$0xff]   ;;  %v6171_v50 = vld [vmem:[#allocation2 + $0x184] ss:$16 sps:$4 sm:$0xff]  }
  0xbe   :  { %v6173_v51 = vld [vmem:[#allocation2 + $0x18c] ss:$16 sps:$4 sm:$0xff]   ;;  %v6175_v52 = vld [vmem:[#allocation2 + $0x180] ss:$16 sps:$4 sm:$0xff]   ;;  %v6176_v53 = vld [vmem:[#allocation2 + $0x188] ss:$16 sps:$4 sm:$0xff]  }
  0xbf   :  { %1576 = vmatpush1.bf16.msra.mxu0 %v6127_v18  ;;  %1740 = vmatpush1.bf16.msra.mxu1 %v6128_v19  ;;  %v6177_v54 = vld [vmem:[#allocation2 + $0x1a4] ss:$16 sps:$4 sm:$0xff]   ;;  %v6179_v55 = vld [vmem:[#allocation2 + $0x1ac] ss:$16 sps:$4 sm:$0xff]   ;;  %v6181_v56 = vld [vmem:[#allocation2 + $0x1a0] ss:$16 sps:$4 sm:$0xff]  }
  0xc0   :  { %1577 = vmatprep.subr.bf16.mxu0 %v6129_v20  ;;  %1741 = vmatprep.subr.bf16.mxu1 %v6131_v21  ;;  %v6182_v57 = vld [vmem:[#allocation2 + $0x1a8] ss:$16 sps:$4 sm:$0xff]   ;;  %v6183_v58 = vld [vmem:[#allocation2 + $0x1c4] ss:$16 sps:$4 sm:$0xff]   ;;  %v6185_v59 = vld [vmem:[#allocation2 + $0x1cc] ss:$16 sps:$4 sm:$0xff]  }
  0xc1   :  { %v6187_v60 = vld [vmem:[#allocation2 + $0x1c0] ss:$16 sps:$4 sm:$0xff]   ;;  %v6188_v61 = vld [vmem:[#allocation2 + $0x1c8] ss:$16 sps:$4 sm:$0xff]   ;;  %v6189_v62 = vld [vmem:[#allocation2 + $0x1e4] ss:$16 sps:$4 sm:$0xff]  }
  0xc2   :  { %v172_v46 = vld [vmem:[%s7777_s21] sm:$0xff]  ;;  %v6191_v63 = vld [vmem:[#allocation2 + $0x1ec] ss:$16 sps:$4 sm:$0xff]   ;;  %v6194_v1 = vld [vmem:[#allocation2 + $0x1e8] ss:$16 sps:$4 sm:$0xff]   ;;  %vm2730_vm9 = vcmask 523264  }
  0xc3   :  { %1578 = vmatpush1.bf16.msra.mxu0 %v6133_v22  ;;  %1742 = vmatpush1.bf16.msra.mxu1 %v6134_v23  ;;  %v5279_v48 = vcombine.high %v172_v46, %v172_v46  ;;  %v6193_v0 = vld [vmem:[#allocation2 + $0x1e0] ss:$16 sps:$4 sm:$0xff]   ;;  %v6199_v2 = vld [vmem:[#allocation2 + $0x204] ss:$16 sps:$4 sm:$0xff]   ;;  %v6202_v3 = vld [vmem:[#allocation2 + $0x20c] ss:$16 sps:$4 sm:$0xff]   ;;  %v5278_v4 = vcombine.low %v172_v46, %v172_v46 }
  0xc4   :  { %1579 = vmatprep.subr.bf16.mxu0 %v6135_v24  ;;  %1743 = vmatprep.subr.bf16.mxu1 %v6137_v25  ;;  %v6197_v5 = vld [vmem:[#allocation2 + $0x200] ss:$16 sps:$4 sm:$0xff]   ;;  %v6200_v6 = vld [vmem:[#allocation2 + $0x208] ss:$16 sps:$4 sm:$0xff]   ;;  %v6205_v7 = vld [vmem:[#allocation2 + $0x224] ss:$16 sps:$4 sm:$0xff]  }
  0xc5   :  { %1599 = vmatprep.mubr.bf16.mxu0 %v5279_v48  ;;  %1763 = vmatprep.mubr.bf16.mxu1 %v5279_v48  ;;  %v6208_v8 = vld [vmem:[#allocation2 + $0x22c] ss:$16 sps:$4 sm:$0xff]   ;;  %v6203_v9 = vld [vmem:[#allocation2 + $0x220] ss:$16 sps:$4 sm:$0xff]   ;;  %v6206_v10 = vld [vmem:[#allocation2 + $0x228] ss:$16 sps:$4 sm:$0xff]  }
  0xc6   :  { %v6211_v11 = vld [vmem:[#allocation2 + $0x244] ss:$16 sps:$4 sm:$0xff]   ;;  %v6214_v12 = vld [vmem:[#allocation2 + $0x24c] ss:$16 sps:$4 sm:$0xff]   ;;  %v6209_v13 = vld [vmem:[#allocation2 + $0x240] ss:$16 sps:$4 sm:$0xff]  }
  0xc7   :  { %1580 = vmatpush1.bf16.msra.mxu0 %v6139_v26  ;;  %1744 = vmatpush1.bf16.msra.mxu1 %v6140_v27  ;;  %v6212_v14 = vld [vmem:[#allocation2 + $0x248] ss:$16 sps:$4 sm:$0xff]   ;;  %v6217_v15 = vld [vmem:[#allocation2 + $0x264] ss:$16 sps:$4 sm:$0xff]   ;;  %v6220_v16 = vld [vmem:[#allocation2 + $0x26c] ss:$16 sps:$4 sm:$0xff]  }
  0xc8   :  { %1581 = vmatprep.subr.bf16.mxu0 %v6141_v28  ;;  %1745 = vmatprep.subr.bf16.mxu1 %v6143_v29  ;;  %v6215_v17 = vld [vmem:[#allocation2 + $0x260] ss:$16 sps:$4 sm:$0xff]   ;;  %v6218_v18 = vld [vmem:[#allocation2 + $0x268] ss:$16 sps:$4 sm:$0xff]   ;;  %v6223_v19 = vld [vmem:[#allocation2 + $0x284] ss:$16 sps:$4 sm:$0xff]  }
  0xc9   :  { %v6226_v20 = vld [vmem:[#allocation2 + $0x28c] ss:$16 sps:$4 sm:$0xff]   ;;  %v6221_v21 = vld [vmem:[#allocation2 + $0x280] ss:$16 sps:$4 sm:$0xff]   ;;  %v6224_v22 = vld [vmem:[#allocation2 + $0x288] ss:$16 sps:$4 sm:$0xff]  }
  0xca   :  { %v6229_v23 = vld [vmem:[#allocation2 + $0x2a4] ss:$16 sps:$4 sm:$0xff]   ;;  %v6232_v24 = vld [vmem:[#allocation2 + $0x2ac] ss:$16 sps:$4 sm:$0xff]   ;;  %v6227_v25 = vld [vmem:[#allocation2 + $0x2a0] ss:$16 sps:$4 sm:$0xff]  }
  0xcb   :  { %1582 = vmatpush1.bf16.msra.mxu0 %v6145_v30  ;;  %1746 = vmatpush1.bf16.msra.mxu1 %v6146_v31  ;;  %v6230_v26 = vld [vmem:[#allocation2 + $0x2a8] ss:$16 sps:$4 sm:$0xff]   ;;  %v6235_v27 = vld [vmem:[#allocation2 + $0x2c4] ss:$16 sps:$4 sm:$0xff]   ;;  %v6238_v28 = vld [vmem:[#allocation2 + $0x2cc] ss:$16 sps:$4 sm:$0xff]  }
  0xcc   :  { %1583 = vmatprep.subr.bf16.mxu0 %v6147_v32  ;;  %1747 = vmatprep.subr.bf16.mxu1 %v6149_v33  ;;  %v7498_v29 = vld [vmem:[%s7777_s21 + $0x8] sm:$0xff]  ;;  %v6233_v31 = vld [vmem:[#allocation2 + $0x2c0] ss:$16 sps:$4 sm:$0xff]   ;;  %v6241_v33 = vld [vmem:[#allocation2 + $0x2e4] ss:$16 sps:$4 sm:$0xff]  }
  0xcd   :  { %v5281_v30 = vcombine.high %v7498_v29, %v7498_v29  ;;  %v6236_v32 = vld [vmem:[#allocation2 + $0x2c8] ss:$16 sps:$4 sm:$0xff]   ;;  %v6262_v46 = vld [vmem:[#allocation2 + $0x34c] ss:$16 sps:$4 sm:$0xff]  }
  0xce   :  { %v6260_v48 = vld [vmem:[#allocation2 + $0x348] ss:$16 sps:$4 sm:$0xff]  }
  0xcf   :  { %1584 = vmatpush1.bf16.msra.mxu0 %v6151_v34  ;;  %1748 = vmatpush1.bf16.msra.mxu1 %v6152_v35  ;;  %v6244_v34 = vld [vmem:[#allocation2 + $0x2ec] ss:$16 sps:$4 sm:$0xff]   ;;  %v6239_v35 = vld [vmem:[#allocation2 + $0x2e0] ss:$16 sps:$4 sm:$0xff]  }
  0xd0   :  { %1585 = vmatprep.subr.bf16.mxu0 %v6153_v36  ;;  %1749 = vmatprep.subr.bf16.mxu1 %v6155_v37  ;;  %v6242_v36 = vld [vmem:[#allocation2 + $0x2e8] ss:$16 sps:$4 sm:$0xff]   ;;  %v6247_v37 = vld [vmem:[#allocation2 + $0x304] ss:$16 sps:$4 sm:$0xff]  }
  0xd3   :  { %1586 = vmatpush1.bf16.msra.mxu0 %v6157_v38  ;;  %1750 = vmatpush1.bf16.msra.mxu1 %v6158_v39  ;;  %v6250_v38 = vld [vmem:[#allocation2 + $0x30c] ss:$16 sps:$4 sm:$0xff]   ;;  %v6245_v39 = vld [vmem:[#allocation2 + $0x300] ss:$16 sps:$4 sm:$0xff]  }
  0xd4   :  { %1587 = vmatprep.subr.bf16.mxu0 %v6159_v40  ;;  %1751 = vmatprep.subr.bf16.mxu1 %v6161_v41  ;;  %v6248_v40 = vld [vmem:[#allocation2 + $0x308] ss:$16 sps:$4 sm:$0xff]   ;;  %v6253_v41 = vld [vmem:[#allocation2 + $0x324] ss:$16 sps:$4 sm:$0xff]  }
  0xd7   :  { %1588 = vmatpush1.bf16.msra.mxu0 %v6163_v42  ;;  %1752 = vmatpush1.bf16.msra.mxu1 %v6164_v43  ;;  %v6256_v42 = vld [vmem:[#allocation2 + $0x32c] ss:$16 sps:$4 sm:$0xff]   ;;  %v6251_v43 = vld [vmem:[#allocation2 + $0x320] ss:$16 sps:$4 sm:$0xff]  }
  0xd8   :  { %1589 = vmatprep.subr.bf16.mxu0 %v6165_v44  ;;  %1753 = vmatprep.subr.bf16.mxu1 %v6167_v45  ;;  %v6254_v44 = vld [vmem:[#allocation2 + $0x328] ss:$16 sps:$4 sm:$0xff]   ;;  %v6259_v45 = vld [vmem:[#allocation2 + $0x344] ss:$16 sps:$4 sm:$0xff]  }
  0xdb   :  { %1590 = vmatpush1.bf16.msra.mxu0 %v6169_v47  ;;  %1754 = vmatpush1.bf16.msra.mxu1 %v6170_v49  ;;  %v6257_v47 = vld [vmem:[#allocation2 + $0x340] ss:$16 sps:$4 sm:$0xff]   ;;  %v6265_v49 = vld [vmem:[#allocation2 + $0x364] ss:$16 sps:$4 sm:$0xff]  }
  0xdc   :  { %1591 = vmatprep.subr.bf16.mxu0 %v6171_v50  ;;  %1755 = vmatprep.subr.bf16.mxu1 %v6173_v51  ;;  %v6268_v50 = vld [vmem:[#allocation2 + $0x36c] ss:$16 sps:$4 sm:$0xff]   ;;  %v6263_v51 = vld [vmem:[#allocation2 + $0x360] ss:$16 sps:$4 sm:$0xff]  }
  0xdf   :  { %1592 = vmatpush1.bf16.msra.mxu0 %v6175_v52  ;;  %1756 = vmatpush1.bf16.msra.mxu1 %v6176_v53  ;;  %v6266_v52 = vld [vmem:[#allocation2 + $0x368] ss:$16 sps:$4 sm:$0xff]   ;;  %v6271_v53 = vld [vmem:[#allocation2 + $0x384] ss:$16 sps:$4 sm:$0xff]  }
  0xe0   :  { %1593 = vmatprep.subr.bf16.mxu0 %v6177_v54  ;;  %1757 = vmatprep.subr.bf16.mxu1 %v6179_v55  ;;  %v6274_v54 = vld [vmem:[#allocation2 + $0x38c] ss:$16 sps:$4 sm:$0xff]   ;;  %v6269_v55 = vld [vmem:[#allocation2 + $0x380] ss:$16 sps:$4 sm:$0xff]  }
  0xe3   :  { %1594 = vmatpush1.bf16.msra.mxu0 %v6181_v56  ;;  %1758 = vmatpush1.bf16.msra.mxu1 %v6182_v57  ;;  %v6272_v56 = vld [vmem:[#allocation2 + $0x388] ss:$16 sps:$4 sm:$0xff]   ;;  %v6277_v57 = vld [vmem:[#allocation2 + $0x3a4] ss:$16 sps:$4 sm:$0xff]  }
  0xe4   :  { %1595 = vmatprep.subr.bf16.mxu0 %v6183_v58  ;;  %1759 = vmatprep.subr.bf16.mxu1 %v6185_v59  ;;  %v6280_v58 = vld [vmem:[#allocation2 + $0x3ac] ss:$16 sps:$4 sm:$0xff]   ;;  %v6275_v59 = vld [vmem:[#allocation2 + $0x3a0] ss:$16 sps:$4 sm:$0xff]  }
  0xe7   :  { %1596 = vmatpush1.bf16.msra.mxu0 %v6187_v60  ;;  %1760 = vmatpush1.bf16.msra.mxu1 %v6188_v61  ;;  %v6278_v60 = vld [vmem:[#allocation2 + $0x3a8] ss:$16 sps:$4 sm:$0xff]   ;;  %v6283_v61 = vld [vmem:[#allocation2 + $0x3c4] ss:$16 sps:$4 sm:$0xff]  }
  0xe8   :  { %1597 = vmatprep.subr.bf16.mxu0 %v6189_v62  ;;  %1761 = vmatprep.subr.bf16.mxu1 %v6191_v63  ;;  %v6286_v62 = vld [vmem:[#allocation2 + $0x3cc] ss:$16 sps:$4 sm:$0xff]   ;;  %v6281_v63 = vld [vmem:[#allocation2 + $0x3c0] ss:$16 sps:$4 sm:$0xff]  }
  0xeb   :  { %1598 = vmatpush1.bf16.msra.mxu0 %v6193_v0  ;;  %1762 = vmatpush1.bf16.msra.mxu1 %v6194_v1  ;;  %v6284_v0 = vld [vmem:[#allocation2 + $0x3c8] ss:$16 sps:$4 sm:$0xff]   ;;  %v6289_v1 = vld [vmem:[#allocation2 + $0x3e4] ss:$16 sps:$4 sm:$0xff]  }
  0xec   :  { %1608 = vmatprep.subr.bf16.mxu0 %v6199_v2  ;;  %1772 = vmatprep.subr.bf16.mxu1 %v6202_v3  ;;  %v6292_v2 = vld [vmem:[#allocation2 + $0x3ec] ss:$16 sps:$4 sm:$0xff]   ;;  %v6287_v3 = vld [vmem:[#allocation2 + $0x3e0] ss:$16 sps:$4 sm:$0xff]  }
  0xee   :  { %1600 = vmatmul.mubr.bf16.vlgmr.msra.gmra.mrb[0].mxu0 %v5278_v4  ;;  %1764 = vmatmul.mubr.bf16.vlgmr.msra.gmra.mrb[0].mxu1 %v5278_v4  ;;  %v6290_v4 = vld [vmem:[#allocation2 + $0x3e8] ss:$16 sps:$4 sm:$0xff]  }
  0xef   :  { %1609 = vmatpush1.bf16.msra.mxu0 %v6197_v5  ;;  %1773 = vmatpush1.bf16.msra.mxu1 %v6200_v6  ;;  %v6297_v5 = vld [vmem:[#allocation2 + $0x404] ss:$16 sps:$4 sm:$0xff]   ;;  %v6300_v6 = vld [vmem:[#allocation2 + $0x40c] ss:$16 sps:$4 sm:$0xff]  }
  0xf0   :  { %1610 = vmatprep.subr.bf16.mxu0 %v6205_v7  ;;  %1774 = vmatprep.subr.bf16.mxu1 %v6208_v8  ;;  %v5280_v7 = vcombine.low %v7498_v29, %v7498_v29  ;;  %v6295_v8 = vld [vmem:[#allocation2 + $0x400] ss:$16 sps:$4 sm:$0xff]   ;;  %v6330_v29 = vld [vmem:[#allocation2 + $0x4ac] ss:$16 sps:$4 sm:$0xff]  }
  0xf1   :  { %1640 = vmatprep.mubr.bf16.mxu0 %v5281_v30  ;;  %1804 = vmatprep.mubr.bf16.mxu1 %v5281_v30  ;;  %v6325_v30 = vld [vmem:[#allocation2 + $0x4a0] ss:$16 sps:$4 sm:$0xff]  }
  0xf3   :  { %1611 = vmatpush1.bf16.msra.mxu0 %v6203_v9  ;;  %1775 = vmatpush1.bf16.msra.mxu1 %v6206_v10  ;;  %v6298_v9 = vld [vmem:[#allocation2 + $0x408] ss:$16 sps:$4 sm:$0xff]   ;;  %v6303_v10 = vld [vmem:[#allocation2 + $0x424] ss:$16 sps:$4 sm:$0xff]  }
  0xf4   :  { %1612 = vmatprep.subr.bf16.mxu0 %v6211_v11  ;;  %1776 = vmatprep.subr.bf16.mxu1 %v6214_v12  ;;  %v7507_v11 = vld [vmem:[%s7777_s21 + $0x10] sm:$0xff]  ;;  %v6306_v12 = vld [vmem:[#allocation2 + $0x42c] ss:$16 sps:$4 sm:$0xff]  }
  0xf7   :  { %1613 = vmatpush1.bf16.msra.mxu0 %v6209_v13  ;;  %1777 = vmatpush1.bf16.msra.mxu1 %v6212_v14  ;;  %v5283_v13 = vcombine.high %v7507_v11, %v7507_v11  ;;  %v6301_v14 = vld [vmem:[#allocation2 + $0x420] ss:$16 sps:$4 sm:$0xff]  }
  0xf8   :  { %1614 = vmatprep.subr.bf16.mxu0 %v6217_v15  ;;  %1778 = vmatprep.subr.bf16.mxu1 %v6220_v16  ;;  %v6304_v15 = vld [vmem:[#allocation2 + $0x428] ss:$16 sps:$4 sm:$0xff]   ;;  %v6309_v16 = vld [vmem:[#allocation2 + $0x444] ss:$16 sps:$4 sm:$0xff]  }
  0xfb   :  { %1615 = vmatpush1.bf16.msra.mxu0 %v6215_v17  ;;  %1779 = vmatpush1.bf16.msra.mxu1 %v6218_v18  ;;  %v6312_v17 = vld [vmem:[#allocation2 + $0x44c] ss:$16 sps:$4 sm:$0xff]   ;;  %v6307_v18 = vld [vmem:[#allocation2 + $0x440] ss:$16 sps:$4 sm:$0xff]  }
  0xfc   :  { %1616 = vmatprep.subr.bf16.mxu0 %v6223_v19  ;;  %1780 = vmatprep.subr.bf16.mxu1 %v6226_v20  ;;  %v6310_v19 = vld [vmem:[#allocation2 + $0x448] ss:$16 sps:$4 sm:$0xff]   ;;  %v6315_v20 = vld [vmem:[#allocation2 + $0x464] ss:$16 sps:$4 sm:$0xff]  }
  0xff   :  { %1617 = vmatpush1.bf16.msra.mxu0 %v6221_v21  ;;  %1781 = vmatpush1.bf16.msra.mxu1 %v6224_v22  ;;  %v6318_v21 = vld [vmem:[#allocation2 + $0x46c] ss:$16 sps:$4 sm:$0xff]   ;;  %v6313_v22 = vld [vmem:[#allocation2 + $0x460] ss:$16 sps:$4 sm:$0xff]  }
 0x100   :  { %1618 = vmatprep.subr.bf16.mxu0 %v6229_v23  ;;  %1782 = vmatprep.subr.bf16.mxu1 %v6232_v24  ;;  %v6316_v23 = vld [vmem:[#allocation2 + $0x468] ss:$16 sps:$4 sm:$0xff]   ;;  %v6321_v24 = vld [vmem:[#allocation2 + $0x484] ss:$16 sps:$4 sm:$0xff]  }
 0x103   :  { %1619 = vmatpush1.bf16.msra.mxu0 %v6227_v25  ;;  %1783 = vmatpush1.bf16.msra.mxu1 %v6230_v26  ;;  %v6324_v25 = vld [vmem:[#allocation2 + $0x48c] ss:$16 sps:$4 sm:$0xff]   ;;  %v6319_v26 = vld [vmem:[#allocation2 + $0x480] ss:$16 sps:$4 sm:$0xff]  }
 0x104   :  { %1620 = vmatprep.subr.bf16.mxu0 %v6235_v27  ;;  %1784 = vmatprep.subr.bf16.mxu1 %v6238_v28  ;;  %v6322_v27 = vld [vmem:[#allocation2 + $0x488] ss:$16 sps:$4 sm:$0xff]   ;;  %v6327_v28 = vld [vmem:[#allocation2 + $0x4a4] ss:$16 sps:$4 sm:$0xff]  }
 0x107   :  { %1621 = vmatpush1.bf16.msra.mxu0 %v6233_v31  ;;  %1785 = vmatpush1.bf16.msra.mxu1 %v6236_v32  ;;  %v6328_v31 = vld [vmem:[#allocation2 + $0x4a8] ss:$16 sps:$4 sm:$0xff]   ;;  %v6333_v32 = vld [vmem:[#allocation2 + $0x4c4] ss:$16 sps:$4 sm:$0xff]  }
 0x108   :  { %1622 = vmatprep.subr.bf16.mxu0 %v6241_v33  ;;  %1786 = vmatprep.subr.bf16.mxu1 %v6244_v34  ;;  %v6336_v33 = vld [vmem:[#allocation2 + $0x4cc] ss:$16 sps:$4 sm:$0xff]   ;;  %v6331_v34 = vld [vmem:[#allocation2 + $0x4c0] ss:$16 sps:$4 sm:$0xff]  }
 0x10b   :  { %1623 = vmatpush1.bf16.msra.mxu0 %v6239_v35  ;;  %1787 = vmatpush1.bf16.msra.mxu1 %v6242_v36  ;;  %v6334_v35 = vld [vmem:[#allocation2 + $0x4c8] ss:$16 sps:$4 sm:$0xff]   ;;  %v6339_v36 = vld [vmem:[#allocation2 + $0x4e4] ss:$16 sps:$4 sm:$0xff]  }
 0x10c   :  { %1624 = vmatprep.subr.bf16.mxu0 %v6247_v37  ;;  %1788 = vmatprep.subr.bf16.mxu1 %v6250_v38  ;;  %v6342_v37 = vld [vmem:[#allocation2 + $0x4ec] ss:$16 sps:$4 sm:$0xff]   ;;  %v6337_v38 = vld [vmem:[#allocation2 + $0x4e0] ss:$16 sps:$4 sm:$0xff]  }
 0x10f   :  { %1625 = vmatpush1.bf16.msra.mxu0 %v6245_v39  ;;  %1789 = vmatpush1.bf16.msra.mxu1 %v6248_v40  ;;  %v6340_v39 = vld [vmem:[#allocation2 + $0x4e8] ss:$16 sps:$4 sm:$0xff]   ;;  %v6345_v40 = vld [vmem:[#allocation2 + $0x504] ss:$16 sps:$4 sm:$0xff]  }
 0x110   :  { %1626 = vmatprep.subr.bf16.mxu0 %v6253_v41  ;;  %1790 = vmatprep.subr.bf16.mxu1 %v6256_v42  ;;  %v6348_v41 = vld [vmem:[#allocation2 + $0x50c] ss:$16 sps:$4 sm:$0xff]   ;;  %v6343_v42 = vld [vmem:[#allocation2 + $0x500] ss:$16 sps:$4 sm:$0xff]  }
 0x113   :  { %1627 = vmatpush1.bf16.msra.mxu0 %v6251_v43  ;;  %1791 = vmatpush1.bf16.msra.mxu1 %v6254_v44  ;;  %v6346_v43 = vld [vmem:[#allocation2 + $0x508] ss:$16 sps:$4 sm:$0xff]   ;;  %v6351_v44 = vld [vmem:[#allocation2 + $0x524] ss:$16 sps:$4 sm:$0xff]  }
 0x114   :  { %1628 = vmatprep.subr.bf16.mxu0 %v6259_v45  ;;  %1792 = vmatprep.subr.bf16.mxu1 %v6262_v46  ;;  %v6354_v45 = vld [vmem:[#allocation2 + $0x52c] ss:$16 sps:$4 sm:$0xff]   ;;  %v6349_v46 = vld [vmem:[#allocation2 + $0x520] ss:$16 sps:$4 sm:$0xff]  }
 0x117   :  { %1629 = vmatpush1.bf16.msra.mxu0 %v6257_v47  ;;  %1793 = vmatpush1.bf16.msra.mxu1 %v6260_v48  ;;  %v6352_v47 = vld [vmem:[#allocation2 + $0x528] ss:$16 sps:$4 sm:$0xff]   ;;  %v6357_v48 = vld [vmem:[#allocation2 + $0x544] ss:$16 sps:$4 sm:$0xff]  }
 0x118   :  { %1630 = vmatprep.subr.bf16.mxu0 %v6265_v49  ;;  %1794 = vmatprep.subr.bf16.mxu1 %v6268_v50  ;;  %v6360_v49 = vld [vmem:[#allocation2 + $0x54c] ss:$16 sps:$4 sm:$0xff]   ;;  %v6355_v50 = vld [vmem:[#allocation2 + $0x540] ss:$16 sps:$4 sm:$0xff]  }
 0x11b   :  { %1631 = vmatpush1.bf16.msra.mxu0 %v6263_v51  ;;  %1795 = vmatpush1.bf16.msra.mxu1 %v6266_v52  ;;  %v6358_v51 = vld [vmem:[#allocation2 + $0x548] ss:$16 sps:$4 sm:$0xff]   ;;  %v6363_v52 = vld [vmem:[#allocation2 + $0x564] ss:$16 sps:$4 sm:$0xff]  }
 0x11c   :  { %1632 = vmatprep.subr.bf16.mxu0 %v6271_v53  ;;  %1796 = vmatprep.subr.bf16.mxu1 %v6274_v54  ;;  %v6366_v53 = vld [vmem:[#allocation2 + $0x56c] ss:$16 sps:$4 sm:$0xff]   ;;  %v6361_v54 = vld [vmem:[#allocation2 + $0x560] ss:$16 sps:$4 sm:$0xff]  }
 0x11f   :  { %1633 = vmatpush1.bf16.msra.mxu0 %v6269_v55  ;;  %1797 = vmatpush1.bf16.msra.mxu1 %v6272_v56  ;;  %v6364_v55 = vld [vmem:[#allocation2 + $0x568] ss:$16 sps:$4 sm:$0xff]   ;;  %v6369_v56 = vld [vmem:[#allocation2 + $0x584] ss:$16 sps:$4 sm:$0xff]  }
 0x120   :  { %1634 = vmatprep.subr.bf16.mxu0 %v6277_v57  ;;  %1798 = vmatprep.subr.bf16.mxu1 %v6280_v58  ;;  %v6372_v57 = vld [vmem:[#allocation2 + $0x58c] ss:$16 sps:$4 sm:$0xff]   ;;  %v6367_v58 = vld [vmem:[#allocation2 + $0x580] ss:$16 sps:$4 sm:$0xff]  }
 0x123   :  { %1635 = vmatpush1.bf16.msra.mxu0 %v6275_v59  ;;  %1799 = vmatpush1.bf16.msra.mxu1 %v6278_v60  ;;  %v6370_v59 = vld [vmem:[#allocation2 + $0x588] ss:$16 sps:$4 sm:$0xff]   ;;  %v6375_v60 = vld [vmem:[#allocation2 + $0x5a4] ss:$16 sps:$4 sm:$0xff]  }
 0x124   :  { %1636 = vmatprep.subr.bf16.mxu0 %v6283_v61  ;;  %1800 = vmatprep.subr.bf16.mxu1 %v6286_v62  ;;  %v6378_v61 = vld [vmem:[#allocation2 + $0x5ac] ss:$16 sps:$4 sm:$0xff]   ;;  %v6373_v62 = vld [vmem:[#allocation2 + $0x5a0] ss:$16 sps:$4 sm:$0xff]  }
 0x127   :  { %1637 = vmatpush1.bf16.msra.mxu0 %v6281_v63  ;;  %1801 = vmatpush1.bf16.msra.mxu1 %v6284_v0  ;;  %v6376_v63 = vld [vmem:[#allocation2 + $0x5a8] ss:$16 sps:$4 sm:$0xff]   ;;  %v6381_v0 = vld [vmem:[#allocation2 + $0x5c4] ss:$16 sps:$4 sm:$0xff]  }
 0x128   :  { %1638 = vmatprep.subr.bf16.mxu0 %v6289_v1  ;;  %1802 = vmatprep.subr.bf16.mxu1 %v6292_v2  ;;  %v6384_v1 = vld [vmem:[#allocation2 + $0x5cc] ss:$16 sps:$4 sm:$0xff]   ;;  %v6379_v2 = vld [vmem:[#allocation2 + $0x5c0] ss:$16 sps:$4 sm:$0xff]  }
 0x12b   :  { %1639 = vmatpush1.bf16.msra.mxu0 %v6287_v3  ;;  %1803 = vmatpush1.bf16.msra.mxu1 %v6290_v4  ;;  %v6382_v3 = vld [vmem:[#allocation2 + $0x5c8] ss:$16 sps:$4 sm:$0xff]   ;;  %v6387_v4 = vld [vmem:[#allocation2 + $0x5e4] ss:$16 sps:$4 sm:$0xff]  }
 0x12c   :  { %1649 = vmatprep.subr.bf16.mxu0 %v6297_v5  ;;  %1813 = vmatprep.subr.bf16.mxu1 %v6300_v6  ;;  %v6390_v5 = vld [vmem:[#allocation2 + $0x5ec] ss:$16 sps:$4 sm:$0xff]   ;;  %v6385_v6 = vld [vmem:[#allocation2 + $0x5e0] ss:$16 sps:$4 sm:$0xff]  }
 0x12e   :  { %1641 = vmatmul.mubr.bf16.vlgmr.msra.gmra.mrb[0].mxu0 %v5280_v7  ;;  %1805 = vmatmul.mubr.bf16.vlgmr.msra.gmra.mrb[0].mxu1 %v5280_v7  ;;  %v6388_v7 = vld [vmem:[#allocation2 + $0x5e8] ss:$16 sps:$4 sm:$0xff]  }
 0x12f   :  { %1650 = vmatpush1.bf16.msra.mxu0 %v6295_v8  ;;  %1814 = vmatpush1.bf16.msra.mxu1 %v6298_v9  ;;  %v6395_v8 = vld [vmem:[#allocation2 + $0x604] ss:$16 sps:$4 sm:$0xff]   ;;  %v6393_v9 = vld [vmem:[#allocation2 + $0x600] ss:$16 sps:$4 sm:$0xff]  }
 0x130   :  { %1651 = vmatprep.subr.bf16.mxu0 %v6303_v10  ;;  %1815 = vmatprep.subr.bf16.mxu1 %v6306_v12  ;;  %v5282_v10 = vcombine.low %v7507_v11, %v7507_v11  ;;  %v6398_v12 = vld [vmem:[#allocation2 + $0x624] ss:$16 sps:$4 sm:$0xff]   ;;  %v6405_v11 = vld [vmem:[#allocation2 + $0x680] ss:$16 sps:$4 sm:$0xff]  }
 0x131   :  { %1845 = vmatprep.mubr.bf16.mxu1 %v5283_v13  ;;  %1681 = vmatprep.mubr.bf16.mxu0 %v5283_v13  ;;  %v6396_v13 = vld [vmem:[#allocation2 + $0x620] ss:$16 sps:$4 sm:$0xff]  }
 0x133   :  { %1652 = vmatpush1.bf16.msra.mxu0 %v6301_v14  ;;  %1816 = vmatpush1.bf16.msra.mxu1 %v6304_v15  ;;  %v6401_v14 = vld [vmem:[#allocation2 + $0x644] ss:$16 sps:$4 sm:$0xff]   ;;  %v7283_v15 = vmov 0  }
 0x134   :  { %1653 = vmatprep.subr.bf16.mxu0 %v6309_v16  ;;  %1817 = vmatprep.subr.bf16.mxu1 %v6312_v17  ;;  %v6399_v16 = vld [vmem:[#allocation2 + $0x640] ss:$16 sps:$4 sm:$0xff]   ;;  %v6404_v17 = vld [vmem:[#allocation2 + $0x664] ss:$16 sps:$4 sm:$0xff]  }
 0x137   :  { %1654 = vmatpush1.bf16.msra.mxu0 %v6307_v18  ;;  %1818 = vmatpush1.bf16.msra.mxu1 %v6310_v19  ;;  %v6402_v18 = vld [vmem:[#allocation2 + $0x660] ss:$16 sps:$4 sm:$0xff]   ;;  %v6407_v19 = vld [vmem:[#allocation2 + $0x684] ss:$16 sps:$4 sm:$0xff]  }
 0x138   :  { %1655 = vmatprep.subr.bf16.mxu0 %v6315_v20  ;;  %1819 = vmatprep.subr.bf16.mxu1 %v6318_v21  ;;  %v6410_v20 = vld [vmem:[#allocation2 + $0x6a4] ss:$16 sps:$4 sm:$0xff]   ;;  %v6408_v21 = vld [vmem:[#allocation2 + $0x6a0] ss:$16 sps:$4 sm:$0xff]  }
 0x13b   :  { %1656 = vmatpush1.bf16.msra.mxu0 %v6313_v22  ;;  %1820 = vmatpush1.bf16.msra.mxu1 %v6316_v23  ;;  %v6413_v22 = vld [vmem:[#allocation2 + $0x6c4] ss:$16 sps:$4 sm:$0xff]   ;;  %v6411_v23 = vld [vmem:[#allocation2 + $0x6c0] ss:$16 sps:$4 sm:$0xff]  }
 0x13c   :  { %1657 = vmatprep.subr.bf16.mxu0 %v6321_v24  ;;  %1821 = vmatprep.subr.bf16.mxu1 %v6324_v25  ;;  %v6416_v24 = vld [vmem:[#allocation2 + $0x6e4] ss:$16 sps:$4 sm:$0xff]   ;;  %v6414_v25 = vld [vmem:[#allocation2 + $0x6e0] ss:$16 sps:$4 sm:$0xff]  }
 0x13f   :  { %1658 = vmatpush1.bf16.msra.mxu0 %v6319_v26  ;;  %1822 = vmatpush1.bf16.msra.mxu1 %v6322_v27  ;;  %v6420_v26 = vld [vmem:[#allocation2 + $0x60c] ss:$16 sps:$4 sm:$0xff]   ;;  %v6417_v27 = vld [vmem:[%s7777_s21 + $0x18] ss:$0 sps:$4 sm:$0xff]  }
 0x140   :  { %1659 = vmatprep.subr.bf16.mxu0 %v6327_v28  ;;  %1823 = vmatprep.subr.bf16.mxu1 %v6330_v29  ;;  %v6418_v28 = vld [vmem:[#allocation2 + $0x608] ss:$16 sps:$4 sm:$0xff]   ;;  %v6423_v29 = vld [vmem:[#allocation2 + $0x62c] ss:$16 sps:$4 sm:$0xff]  }
 0x143   :  { %1660 = vmatpush1.bf16.msra.mxu0 %v6325_v30  ;;  %1824 = vmatpush1.bf16.msra.mxu1 %v6328_v31  ;;  %v6421_v30 = vld [vmem:[#allocation2 + $0x628] ss:$16 sps:$4 sm:$0xff]   ;;  %v6426_v31 = vld [vmem:[#allocation2 + $0x64c] ss:$16 sps:$4 sm:$0xff]  }
 0x144   :  { %1661 = vmatprep.subr.bf16.mxu0 %v6333_v32  ;;  %1825 = vmatprep.subr.bf16.mxu1 %v6336_v33  ;;  %v6424_v32 = vld [vmem:[#allocation2 + $0x648] ss:$16 sps:$4 sm:$0xff]   ;;  %v6429_v33 = vld [vmem:[#allocation2 + $0x66c] ss:$16 sps:$4 sm:$0xff]  }
 0x147   :  { %1662 = vmatpush1.bf16.msra.mxu0 %v6331_v34  ;;  %1826 = vmatpush1.bf16.msra.mxu1 %v6334_v35  ;;  %v6427_v34 = vld [vmem:[#allocation2 + $0x668] ss:$16 sps:$4 sm:$0xff]   ;;  %v6432_v35 = vld [vmem:[#allocation2 + $0x68c] ss:$16 sps:$4 sm:$0xff]  }
 0x148   :  { %1663 = vmatprep.subr.bf16.mxu0 %v6339_v36  ;;  %1827 = vmatprep.subr.bf16.mxu1 %v6342_v37  ;;  %v6430_v36 = vld [vmem:[#allocation2 + $0x688] ss:$16 sps:$4 sm:$0xff]   ;;  %v6435_v37 = vld [vmem:[#allocation2 + $0x6ac] ss:$16 sps:$4 sm:$0xff]  }
 0x14b   :  { %1664 = vmatpush1.bf16.msra.mxu0 %v6337_v38  ;;  %1828 = vmatpush1.bf16.msra.mxu1 %v6340_v39  ;;  %v6433_v38 = vld [vmem:[#allocation2 + $0x6a8] ss:$16 sps:$4 sm:$0xff]   ;;  %v6438_v39 = vld [vmem:[#allocation2 + $0x6cc] ss:$16 sps:$4 sm:$0xff]  }
 0x14c   :  { %1665 = vmatprep.subr.bf16.mxu0 %v6345_v40  ;;  %1829 = vmatprep.subr.bf16.mxu1 %v6348_v41  ;;  %v6436_v40 = vld [vmem:[#allocation2 + $0x6c8] ss:$16 sps:$4 sm:$0xff]   ;;  %v6441_v41 = vld [vmem:[#allocation2 + $0x6ec] ss:$16 sps:$4 sm:$0xff]  }
 0x14f   :  { %1666 = vmatpush1.bf16.msra.mxu0 %v6343_v42  ;;  %1830 = vmatpush1.bf16.msra.mxu1 %v6346_v43  ;;  %v6439_v42 = vld [vmem:[#allocation2 + $0x6e8] ss:$16 sps:$4 sm:$0xff]  }
 0x150   :  { %1667 = vmatprep.subr.bf16.mxu0 %v6351_v44  ;;  %1831 = vmatprep.subr.bf16.mxu1 %v6354_v45  ;;  %v6444_v43 = vld [vmem:[#allocation7 + $0x4] ss:$8 sps:$4 sm:$0xff]   ;;  %v6442_v44 = vld [vmem:[#allocation7] ss:$8 sps:$4 sm:$0xff]   ;;  %v6447_v45 = vld [vmem:[#allocation7 + $0x14] ss:$8 sps:$4 sm:$0xff]  }
 0x153   :  { %1668 = vmatpush1.bf16.msra.mxu0 %v6349_v46  ;;  %1832 = vmatpush1.bf16.msra.mxu1 %v6352_v47  ;;  %v6445_v46 = vld [vmem:[#allocation7 + $0x10] ss:$8 sps:$4 sm:$0xff]   ;;  %v6450_v47 = vld [vmem:[#allocation7 + $0x24] ss:$8 sps:$4 sm:$0xff]  }
 0x154   :  { %1669 = vmatprep.subr.bf16.mxu0 %v6357_v48  ;;  %1833 = vmatprep.subr.bf16.mxu1 %v6360_v49  ;;  %v6448_v48 = vld [vmem:[#allocation7 + $0x20] ss:$8 sps:$4 sm:$0xff]   ;;  %v6453_v49 = vld [vmem:[#allocation7 + $0x34] ss:$8 sps:$4 sm:$0xff]  }
 0x157   :  { %1670 = vmatpush1.bf16.msra.mxu0 %v6355_v50  ;;  %1834 = vmatpush1.bf16.msra.mxu1 %v6358_v51  ;;  %v6451_v50 = vld [vmem:[#allocation7 + $0x30] ss:$8 sps:$4 sm:$0xff]   ;;  %v6456_v51 = vld [vmem:[#allocation7 + $0x44] ss:$8 sps:$4 sm:$0xff]  }
 0x158   :  { %1671 = vmatprep.subr.bf16.mxu0 %v6363_v52  ;;  %1835 = vmatprep.subr.bf16.mxu1 %v6366_v53  ;;  %v6454_v52 = vld [vmem:[#allocation7 + $0x40] ss:$8 sps:$4 sm:$0xff]   ;;  %v6459_v53 = vld [vmem:[#allocation7 + $0x54] ss:$8 sps:$4 sm:$0xff]  }
 0x15b   :  { %1672 = vmatpush1.bf16.msra.mxu0 %v6361_v54  ;;  %1836 = vmatpush1.bf16.msra.mxu1 %v6364_v55  ;;  %v6457_v54 = vld [vmem:[#allocation7 + $0x50] ss:$8 sps:$4 sm:$0xff]   ;;  %v6462_v55 = vld [vmem:[#allocation7 + $0x64] ss:$8 sps:$4 sm:$0xff]  }
 0x15c   :  { %1673 = vmatprep.subr.bf16.mxu0 %v6369_v56  ;;  %1837 = vmatprep.subr.bf16.mxu1 %v6372_v57  ;;  %v6460_v56 = vld [vmem:[#allocation7 + $0x60] ss:$8 sps:$4 sm:$0xff]   ;;  %v6465_v57 = vld [vmem:[#allocation7 + $0x74] ss:$8 sps:$4 sm:$0xff]  }
 0x15f   :  { %1674 = vmatpush1.bf16.msra.mxu0 %v6367_v58  ;;  %1838 = vmatpush1.bf16.msra.mxu1 %v6370_v59  ;;  %v6463_v58 = vld [vmem:[#allocation7 + $0x70] ss:$8 sps:$4 sm:$0xff]   ;;  %v6468_v59 = vld [vmem:[#allocation7 + $0x84] ss:$8 sps:$4 sm:$0xff]  }
 0x160   :  { %1675 = vmatprep.subr.bf16.mxu0 %v6375_v60  ;;  %1839 = vmatprep.subr.bf16.mxu1 %v6378_v61  ;;  %v6466_v60 = vld [vmem:[#allocation7 + $0x80] ss:$8 sps:$4 sm:$0xff]   ;;  %v6471_v61 = vld [vmem:[#allocation7 + $0x94] ss:$8 sps:$4 sm:$0xff]  }
 0x163   :  { %1676 = vmatpush1.bf16.msra.mxu0 %v6373_v62  ;;  %1840 = vmatpush1.bf16.msra.mxu1 %v6376_v63  ;;  %v6469_v62 = vld [vmem:[#allocation7 + $0x90] ss:$8 sps:$4 sm:$0xff]   ;;  %v6474_v63 = vld [vmem:[#allocation7 + $0xa4] ss:$8 sps:$4 sm:$0xff]  }
 0x164   :  { %1677 = vmatprep.subr.bf16.mxu0 %v6381_v0  ;;  %1841 = vmatprep.subr.bf16.mxu1 %v6384_v1  ;;  %v6472_v0 = vld [vmem:[#allocation7 + $0xa0] ss:$8 sps:$4 sm:$0xff]   ;;  %v6477_v1 = vld [vmem:[#allocation7 + $0xb4] ss:$8 sps:$4 sm:$0xff]  }
 0x167   :  { %1678 = vmatpush1.bf16.msra.mxu0 %v6379_v2  ;;  %1842 = vmatpush1.bf16.msra.mxu1 %v6382_v3  ;;  %v6475_v2 = vld [vmem:[#allocation7 + $0xb0] ss:$8 sps:$4 sm:$0xff]   ;;  %v6480_v3 = vld [vmem:[#allocation7 + $0xc4] ss:$8 sps:$4 sm:$0xff]  }
 0x168   :  { %1679 = vmatprep.subr.bf16.mxu0 %v6387_v4  ;;  %1843 = vmatprep.subr.bf16.mxu1 %v6390_v5  ;;  %v6478_v4 = vld [vmem:[#allocation7 + $0xc0] ss:$8 sps:$4 sm:$0xff]   ;;  %v6483_v5 = vld [vmem:[#allocation7 + $0xd4] ss:$8 sps:$4 sm:$0xff]  }
 0x16b   :  { %1680 = vmatpush1.bf16.msra.mxu0 %v6385_v6  ;;  %1844 = vmatpush1.bf16.msra.mxu1 %v6388_v7  ;;  %v6481_v6 = vld [vmem:[#allocation7 + $0xd0] ss:$8 sps:$4 sm:$0xff]   ;;  %v6486_v7 = vld [vmem:[#allocation7 + $0xe4] ss:$8 sps:$4 sm:$0xff]  }
 0x16c   :  { %1690 = vmatprep.subr.bf16.mxu0 %v6395_v8  ;;  %v6484_v8 = vld [vmem:[#allocation7 + $0xe0] ss:$8 sps:$4 sm:$0xff]  }
 0x16e   :  { %1846 = vmatmul.mubr.bf16.vlgmr.msra.gmra.mrb[0].mxu1 %v5282_v10  ;;  %1682 = vmatmul.mubr.bf16.vlgmr.msra.gmra.mrb[0].mxu0 %v5282_v10  ;;  %v6487_v10 = vld [vmem:[#allocation7 + $0xf0] ss:$8 sps:$4 sm:$0xff]  }
 0x16f   :  { %1691 = vmatpush1.bf16.msra.mxu0 %v6393_v9  ;;  %1722 = vmatprep.mubr.bf16.mxu0 %v7283_v15  ;;  %v6489_v9 = vld [vmem:[#allocation7 + $0xf4] ss:$8 sps:$4 sm:$0xff]  }
 0x170   :  { %1692 = vmatprep.subr.bf16.mxu0 %v6398_v12  ;;  %v6492_v12 = vld [vmem:[#allocation7 + $0x104] ss:$8 sps:$4 sm:$0xff]  }
 0x173   :  { %1693 = vmatpush1.bf16.msra.mxu0 %v6396_v13  ;;  %v6538_v13 = vld [vmem:[%s7759_s5 + $0x40] sm:$0xff]  }
 0x174   :  { %1694 = vmatprep.subr.bf16.mxu0 %v6401_v14  ;;  %v6539_v14 = vld [vmem:[%s7759_s5] sm:$0xff]   ;;  %5916 = vmatprep.subr.bf16.mxu1 %v6538_v13  ;;  %v6516_v13 = vld [vmem:[#allocation7 + $0x184] ss:$8 sps:$4 sm:$0xff]  }
 0x175   :  { %5917 = vmatpush3.bf16.msra.mxu1 %v6539_v14 }
 0x177   :  { %1695 = vmatpush1.bf16.msra.mxu0 %v6399_v16  ;;  %v6540_v16 = vld [vmem:[%s7759_s5 + $0x48] sm:$0xff]  }
 0x178   :  { %1696 = vmatprep.subr.bf16.mxu0 %v6404_v17  ;;  %v6541_v17 = vld [vmem:[%s7759_s5 + $0x8] sm:$0xff]   ;;  %5918 = vmatprep.subr.bf16.mxu1 %v6540_v16 }
 0x179   :  { %5919 = vmatpush3.bf16.msra.mxu1 %v6541_v17  ;;  %v6514_v16 = vld [vmem:[#allocation7 + $0x180] ss:$8 sps:$4 sm:$0xff]  }
 0x17b   :  { %1697 = vmatpush1.bf16.msra.mxu0 %v6402_v18  ;;  %v6542_v18 = vld [vmem:[%s7759_s5 + $0x50] sm:$0xff]  }
 0x17c   :  { %1698 = vmatprep.subr.bf16.mxu0 %v6407_v19  ;;  %v6543_v19 = vld [vmem:[%s7759_s5 + $0x10] sm:$0xff]   ;;  %5920 = vmatprep.subr.bf16.mxu1 %v6542_v18  ;;  %v6519_v18 = vld [vmem:[#allocation7 + $0x194] ss:$8 sps:$4 sm:$0xff]  }
 0x17d   :  { %5921 = vmatpush3.bf16.msra.mxu1 %v6543_v19  ;;  %v6517_v19 = vld [vmem:[#allocation7 + $0x190] ss:$8 sps:$4 sm:$0xff]  }
 0x17f   :  { %1699 = vmatpush1.bf16.msra.mxu0 %v6405_v11  ;;  %v6544_v11 = vld [vmem:[%s7759_s5 + $0x58] sm:$0xff]  }
 0x180   :  { %1700 = vmatprep.subr.bf16.mxu0 %v6410_v20  ;;  %v6545_v20 = vld [vmem:[%s7759_s5 + $0x18] sm:$0xff]   ;;  %5922 = vmatprep.subr.bf16.mxu1 %v6544_v11  ;;  %v6522_v11 = vld [vmem:[#allocation7 + $0x1a4] ss:$8 sps:$4 sm:$0xff]  }
 0x181   :  { %5923 = vmatpush3.bf16.msra.mxu1 %v6545_v20  ;;  %v6520_v20 = vld [vmem:[#allocation7 + $0x1a0] ss:$8 sps:$4 sm:$0xff]  }
 0x183   :  { %1701 = vmatpush1.bf16.msra.mxu0 %v6408_v21  ;;  %v6546_v21 = vld [vmem:[%s7759_s5 + $0x60] sm:$0xff]  }
 0x184   :  { %1702 = vmatprep.subr.bf16.mxu0 %v6413_v22  ;;  %v6547_v22 = vld [vmem:[%s7759_s5 + $0x20] sm:$0xff]   ;;  %5924 = vmatprep.subr.bf16.mxu1 %v6546_v21 }
 0x185   :  { %5925 = vmatpush3.bf16.msra.mxu1 %v6547_v22  ;;  %v6525_v21 = vld [vmem:[#allocation7 + $0x1b4] ss:$8 sps:$4 sm:$0xff]   ;;  %v6523_v22 = vld [vmem:[#allocation7 + $0x1b0] ss:$8 sps:$4 sm:$0xff]  }
 0x187   :  { %1703 = vmatpush1.bf16.msra.mxu0 %v6411_v23  ;;  %v6548_v23 = vld [vmem:[%s7759_s5 + $0x68] sm:$0xff]  }
 0x188   :  { %1704 = vmatprep.subr.bf16.mxu0 %v6416_v24  ;;  %v6549_v24 = vld [vmem:[%s7759_s5 + $0x28] sm:$0xff]   ;;  %5926 = vmatprep.subr.bf16.mxu1 %v6548_v23 }
 0x189   :  { %5927 = vmatpush3.bf16.msra.mxu1 %v6549_v24  ;;  %v6528_v23 = vld [vmem:[#allocation7 + $0x1c4] ss:$8 sps:$4 sm:$0xff]   ;;  %v6526_v24 = vld [vmem:[#allocation7 + $0x1c0] ss:$8 sps:$4 sm:$0xff]  }
 0x18b   :  { %1705 = vmatpush1.bf16.msra.mxu0 %v6414_v25 }
 0x18c   :  { %1854 = vmatprep.subr.bf16.mxu0 %v6420_v26 }
 0x18e   :  { %1723 = vmatmul.mubr.bf16.vlgmr.msra.gmra.mrb[0].mxu0 %v6417_v27 }
 0x18f   :  { %1855 = vmatpush1.bf16.msra.mxu0 %v6418_v28  ;;  %1886 = vmatprep.mubr.bf16.mxu0 %v7283_v15 }
 0x190   :  { %1856 = vmatprep.subr.bf16.mxu0 %v6423_v29  ;;  %v402_v29 = vlaneseq }
 0x193   :  { %1857 = vmatpush1.bf16.msra.mxu0 %v6421_v30  ;;  %v7554_v30 = vshrl.u32 %v402_v29, 7  ;;  %v6537_v29 = vld [vmem:[#allocation7 + $0x1f4] ss:$8 sps:$4 sm:$0xff]  }
 0x194   :  { %1858 = vmatprep.subr.bf16.mxu0 %v6426_v31 }
 0x195   :  { %v7557_v31 = vsub.s32 0, %v7554_v30 }
 0x197   :  { %1859 = vmatpush1.bf16.msra.mxu0 %v6424_v32  ;;  %v7560_v32 = vsub.s32 1, %v7554_v30 }
 0x198   :  { %1860 = vmatprep.subr.bf16.mxu0 %v6429_v33  ;;  %v400_v33 = vld [vmem:[#allocation5] sm:$0xf] }
 0x19b   :  { %1861 = vmatpush1.bf16.msra.mxu0 %v6427_v34  ;;  %v405_v34 = vrot.slane %v400_v33, %v7557_v31 }
 0x19c   :  { %1862 = vmatprep.subr.bf16.mxu0 %v6432_v35  ;;  %v409_v35 = vrot.slane %v400_v33, %v7560_v32 }
 0x19f   :  { %1863 = vmatpush1.bf16.msra.mxu0 %v6430_v36 }
 0x1a0   :  { %1864 = vmatprep.subr.bf16.mxu0 %v6435_v37 }
 0x1a3   :  { %1865 = vmatpush1.bf16.msra.mxu0 %v6433_v38 }
 0x1a4   :  { %1866 = vmatprep.subr.bf16.mxu0 %v6438_v39 }
 0x1a7   :  { %1867 = vmatpush1.bf16.msra.mxu0 %v6436_v40 }
 0x1a8   :  { %1868 = vmatprep.subr.bf16.mxu0 %v6441_v41 }
 0x1ab   :  { %1869 = vmatpush1.bf16.msra.mxu0 %v6439_v42 }
 0x1ac   :  { %2307 = vmatprep.subr.bf16.mxu0 %v6444_v43 }
 0x1ae   :  { %1887 = vmatmul.mubr.bf16.vlgmr.msra.gmra.mrb[4].mxu0 %v6417_v27 }
 0x1af   :  { %2308 = vmatpush1.bf16.msra.mxu0 %v6442_v44 }
 0x1b0   :  { %2309 = vmatprep.subr.bf16.mxu0 %v6447_v45 }
 0x1b3   :  { %2310 = vmatpush1.bf16.msra.mxu0 %v6445_v46 }
 0x1b4   :  { %2311 = vmatprep.subr.bf16.mxu0 %v6450_v47  ;;  %v6490_v47 = vld [vmem:[#allocation7 + $0x100] ss:$8 sps:$4 sm:$0xff]  }
 0x1b7   :  { %2312 = vmatpush1.bf16.msra.mxu0 %v6448_v48 }
 0x1b8   :  { %2313 = vmatprep.subr.bf16.mxu0 %v6453_v49  ;;  %v6495_v49 = vld [vmem:[#allocation7 + $0x114] ss:$8 sps:$4 sm:$0xff]  }
 0x1bb   :  { %2314 = vmatpush1.bf16.msra.mxu0 %v6451_v50  ;;  %v6493_v50 = vld [vmem:[#allocation7 + $0x110] ss:$8 sps:$4 sm:$0xff]  }
 0x1bc   :  { %2315 = vmatprep.subr.bf16.mxu0 %v6456_v51  ;;  %v6498_v51 = vld [vmem:[#allocation7 + $0x124] ss:$8 sps:$4 sm:$0xff]  }
 0x1bf   :  { %2316 = vmatpush1.bf16.msra.mxu0 %v6454_v52  ;;  %v6496_v52 = vld [vmem:[#allocation7 + $0x120] ss:$8 sps:$4 sm:$0xff]  }
 0x1c0   :  { %2317 = vmatprep.subr.bf16.mxu0 %v6459_v53  ;;  %v6501_v53 = vld [vmem:[#allocation7 + $0x134] ss:$8 sps:$4 sm:$0xff]  }
 0x1c3   :  { %2318 = vmatpush1.bf16.msra.mxu0 %v6457_v54  ;;  %v6499_v54 = vld [vmem:[#allocation7 + $0x130] ss:$8 sps:$4 sm:$0xff]  }
 0x1c4   :  { %2319 = vmatprep.subr.bf16.mxu0 %v6462_v55  ;;  %v6504_v55 = vld [vmem:[#allocation7 + $0x144] ss:$8 sps:$4 sm:$0xff]  }
 0x1c7   :  { %2320 = vmatpush1.bf16.msra.mxu0 %v6460_v56  ;;  %v7565_v56 = vsub.s32 2, %v7554_v30 }
 0x1c8   :  { %2321 = vmatprep.subr.bf16.mxu0 %v6465_v57  ;;  %v6502_v57 = vld [vmem:[#allocation7 + $0x140] ss:$8 sps:$4 sm:$0xff]  }
 0x1cb   :  { %2322 = vmatpush1.bf16.msra.mxu0 %v6463_v58  ;;  %v7568_v58 = vsub.s32 3, %v7554_v30 }
 0x1cc   :  { %2323 = vmatprep.subr.bf16.mxu0 %v6468_v59  ;;  %v6507_v59 = vld [vmem:[#allocation7 + $0x154] ss:$8 sps:$4 sm:$0xff]  }
 0x1cf   :  { %2324 = vmatpush1.bf16.msra.mxu0 %v6466_v60  ;;  %v413_v60 = vrot.slane %v400_v33, %v7565_v56 }
 0x1d0   :  { %2325 = vmatprep.subr.bf16.mxu0 %v6471_v61  ;;  %v6505_v61 = vld [vmem:[#allocation7 + $0x150] ss:$8 sps:$4 sm:$0xff]  }
 0x1d3   :  { %2326 = vmatpush1.bf16.msra.mxu0 %v6469_v62  ;;  %v417_v62 = vrot.slane %v400_v33, %v7568_v58 }
 0x1d4   :  { %2327 = vmatprep.subr.bf16.mxu0 %v6474_v63  ;;  %v6510_v63 = vld [vmem:[#allocation7 + $0x164] ss:$8 sps:$4 sm:$0xff]  }
 0x1d7   :  { %2328 = vmatpush1.bf16.msra.mxu0 %v6472_v0 }
 0x1d8   :  { %2329 = vmatprep.subr.bf16.mxu0 %v6477_v1  ;;  %v6508_v1 = vld [vmem:[#allocation7 + $0x160] ss:$8 sps:$4 sm:$0xff]  }
 0x1db   :  { %2330 = vmatpush1.bf16.msra.mxu0 %v6475_v2 }
 0x1dc   :  { %2331 = vmatprep.subr.bf16.mxu0 %v6480_v3 }
 0x1df   :  { %2332 = vmatpush1.bf16.msra.mxu0 %v6478_v4  ;;  %v6513_v4 = vld [vmem:[#allocation7 + $0x174] ss:$8 sps:$4 sm:$0xff]  }
 0x1e0   :  { %2333 = vmatprep.subr.bf16.mxu0 %v6483_v5 }
 0x1e3   :  { %2334 = vmatpush1.bf16.msra.mxu0 %v6481_v6 }
 0x1e4   :  { %2335 = vmatprep.subr.bf16.mxu0 %v6486_v7 }
 0x1e7   :  { %2336 = vmatpush1.bf16.msra.mxu0 %v6484_v8 }
 0x1e8   :  { %2337 = vmatprep.subr.bf16.mxu0 %v6489_v9  ;;  %v6511_v9 = vld [vmem:[#allocation7 + $0x170] ss:$8 sps:$4 sm:$0xff]  }
 0x1eb   :  { %2338 = vmatpush1.bf16.msra.mxu0 %v6487_v10 }
 0x1ec   :  { %2348 = vmatprep.subr.bf16.mxu0 %v6492_v12 }
 0x241   :  { %v1847_v25 = vpop.f32.mrb[0].mxu1 }
 0x242   :  { %v1849_v26 = vpop.f32.mrb[1].mxu1  ;;  %v6030_v0 = vadd.f32 %v1847_v25, %v413_v60  ;;  %v6531_v25 = vld [vmem:[#allocation7 + $0x1d4] ss:$8 sps:$4 sm:$0xff]   ;;  %v6555_v60 = vld [vmem:[%s7761_s7 + $0x8] sm:$0xff]  }
 0x243   :  { %v1851_v27 = vpop.f32.mrb[2].mxu1  ;;  %v6032_v2 = vadd.f32 %v1849_v26, %v417_v62  ;;  %v6529_v26 = vld [vmem:[#allocation7 + $0x1d0] ss:$8 sps:$4 sm:$0xff]  }
 0x244   :  { %v1852_v28 = vpop.f32.mrb[3].mxu1  ;;  %v6534_v27 = vld [vmem:[#allocation7 + $0x1e4] ss:$8 sps:$4 sm:$0xff]   ;;  %v6557_v62 = vld [vmem:[%s7761_s7 + $0x18] sm:$0xff]  }
 0x245   :  { %v6532_v28 = vld [vmem:[#allocation7 + $0x1e0] ss:$8 sps:$4 sm:$0xff]  }
 0x261   :  { %v1724_v36 = vpop.f32.mrb[0].mxu0 }
 0x262   :  { %v6028_v37 = vadd.f32 %v1724_v36, %v405_v34  ;;  %v1726_v38 = vpop.f32.mrb[1].mxu0  ;;  %v6535_v34 = vld [vmem:[#allocation7 + $0x1f0] ss:$8 sps:$4 sm:$0xff]  }
 0x263   :  { %v6029_v39 = vadd.f32 %v1726_v38, %v409_v35  ;;  %v1728_v40 = vpop.f32.mrb[2].mxu0  ;;  %v6551_v38 = vld [vmem:[%s7759_s5 + $0x30] sm:$0xff]  }
 0x264   :  { %vm1895_vm0 = vcmp.ge.f32.partialorder %v6028_v37, 0.0  ;;  %v1899_v41 = vmul.f32 0.1, %v6028_v37  ;;  %v1729_v42 = vpop.f32.mrb[3].mxu0  ;;  %v6553_v40 = vld [vmem:[%s7759_s5 + $0x38] sm:$0xff]  }
 0x265   :  { %vm1896_vm1 = vcmp.ge.f32.partialorder %v6029_v39, 0.0  ;;  %v1900_v43 = vmul.f32 0.1, %v6029_v39  ;;  %v1975_v42 = vld [vmem:[#allocation8] sm:$0x3] }
 0x266   :  { %v1903_v44 = vsel %vm1895_vm0, %v6028_v37, %v1899_v41  ;;  %v6550_v37 = vld [vmem:[%s7759_s5 + $0x70] sm:$0xff]   ;;  %v7284_v41 = vmov 0.0  }
 0x267   :  { %v1904_v45 = vsel %vm1896_vm1, %v6029_v39, %v1900_v43  ;;  %v1907_v48 = vpack.c.bf16 %v1903_v44, %v1903_v44  ;;  %5928 = vmatprep.subr.bf16.mxu1 %v6550_v37  ;;  %v6552_v39 = vld [vmem:[%s7759_s5 + $0x78] sm:$0xff]   ;;  %v1980_v43 = vrot.slane %v1975_v42, %v7557_v31  ;;  %v1984_v44 = vrot.slane %v1975_v42, %v7560_v32  ;;  %v6580_v37 = vld [vmem:[%s7765_s11 + $0x44] ss:$8 sps:$4 sm:$0xff]   ;;  %v6584_v42 = vld [vmem:[%s7765_s11 + $0x60] ss:$8 sps:$4 sm:$0xff]  }
 0x268   :  { %v1908_v46 = vpack.c.bf16 %v1904_v45, %v1904_v45  ;;  %5929 = vmatpush3.bf16.msra.mxu1 %v6551_v38  ;;  %v6578_v38 = vld [vmem:[%s7765_s11 + $0x40] ss:$8 sps:$4 sm:$0xff]  }
 0x269   :  { %5930 = vmatprep.subr.bf16.mxu1 %v6552_v39  ;;  %v6583_v39 = vld [vmem:[%s7765_s11 + $0x54] ss:$8 sps:$4 sm:$0xff]  }
 0x26a   :  { %2339 = vmatprep.mubr.bf16.mxu0 %v1908_v46 }
 0x26b   :  { %2340 = vmatmul.mubr.bf16.vlgmr.msra.gmra.mrb[8].mxu0 %v1907_v48 }
 0x26c   :  { %2349 = vmatpush1.bf16.msra.mxu0 %v6490_v47  ;;  %5931 = vmatpush3.bf16.msra.mxu1 %v6553_v40  ;;  %v6581_v40 = vld [vmem:[%s7765_s11 + $0x50] ss:$8 sps:$4 sm:$0xff]  }
 0x26d   :  { %2350 = vmatprep.subr.bf16.mxu0 %v6495_v49  ;;  %5996 = vmatprep.subr.bf16.mxu1 %v7284_v41 }
 0x270   :  { %2351 = vmatpush1.bf16.msra.mxu0 %v6493_v50 }
 0x271   :  { %2352 = vmatprep.subr.bf16.mxu0 %v6498_v51 }
 0x274   :  { %2353 = vmatpush1.bf16.msra.mxu0 %v6496_v52 }
 0x275   :  { %2354 = vmatprep.subr.bf16.mxu0 %v6501_v53 }
 0x278   :  { %2355 = vmatpush1.bf16.msra.mxu0 %v6499_v54 }
 0x279   :  { %2356 = vmatprep.subr.bf16.mxu0 %v6504_v55 }
 0x27c   :  { %2357 = vmatpush1.bf16.msra.mxu0 %v6502_v57  ;;  %v6554_v57 = vld [vmem:[%s7761_s7] sm:$0xff]  }
 0x27d   :  { %2358 = vmatprep.subr.bf16.mxu0 %v6507_v59 }
 0x280   :  { %2359 = vmatpush1.bf16.msra.mxu0 %v6505_v61  ;;  %v6556_v61 = vld [vmem:[%s7761_s7 + $0x10] sm:$0xff]  }
 0x281   :  { %v1888_v3 = vpop.f32.mrb[4].mxu0  ;;  %2360 = vmatprep.subr.bf16.mxu0 %v6510_v63  ;;  %v6558_v63 = vld [vmem:[%s7761_s7 + $0x20] sm:$0xff]  }
 0x282   :  { %v6031_v5 = vadd.f32 %v6030_v0, %v1888_v3  ;;  %v1890_v6 = vpop.f32.mrb[5].mxu0  ;;  %v6559_v0 = vld [vmem:[%s7761_s7 + $0x28] sm:$0xff]  }
 0x283   :  { %v6033_v7 = vadd.f32 %v6032_v2, %v1890_v6  ;;  %v1892_v8 = vpop.f32.mrb[6].mxu0  ;;  %v6561_v2 = vld [vmem:[%s7761_s7 + $0x38] sm:$0xff]  }
 0x284   :  { %2361 = vmatpush1.bf16.msra.mxu0 %v6508_v1  ;;  %v1893_v10 = vpop.f32.mrb[7].mxu0  ;;  %v1901_v33 = vmul.f32 0.1, %v6031_v5  ;;  %vm1897_vm3 = vcmp.ge.f32.partialorder %v6031_v5, 0.0  ;;  %v6560_v1 = vld [vmem:[%s7761_s7 + $0x30] sm:$0xff]  }
 0x285   :  { %vm1898_vm2 = vcmp.ge.f32.partialorder %v6033_v7, 0.0  ;;  %v1902_v12 = vmul.f32 0.1, %v6033_v7  ;;  %2362 = vmatprep.subr.bf16.mxu0 %v6513_v4  ;;  %v5573_v4 = vld [vmem:[#allocation10] ss:$0 sm:$0xff] }
 0x286   :  { %v1905_v35 = vsel %vm1897_vm3, %v6031_v5, %v1901_v33  ;;  %v6569_v33 = vld [vmem:[%s7765_s11 + $0x10] ss:$8 sps:$4 sm:$0xff]  }
 0x287   :  { %v1906_v14 = vsel %vm1898_vm2, %v6033_v7, %v1902_v12  ;;  %v1909_v36 = vpack.c.bf16 %v1905_v35, %v1905_v35  ;;  %v6572_v35 = vld [vmem:[%s7765_s11 + $0x20] ss:$8 sps:$4 sm:$0xff]  }
 0x288   :  { %2363 = vmatpush1.bf16.msra.mxu0 %v6511_v9  ;;  %v1910_v17 = vpack.c.bf16 %v1906_v14, %v1906_v14 }
 0x289   :  { %2364 = vmatprep.subr.bf16.mxu0 %v6516_v13  ;;  %v6562_v13 = vld [vmem:[#allocation13] sm:$0xff]  }
 0x28a   :  { %2380 = vmatprep.mubr.bf16.mxu0 %v1910_v17  ;;  %v6564_v17 = vld [vmem:[#allocation13 + $0x10] sm:$0xff]  }
 0x28c   :  { %2365 = vmatpush1.bf16.msra.mxu0 %v6514_v16  ;;  %v6563_v16 = vld [vmem:[#allocation13 + $0x8] sm:$0xff]  }
 0x28d   :  { %2366 = vmatprep.subr.bf16.mxu0 %v6519_v18  ;;  %v6565_v18 = vld [vmem:[#allocation13 + $0x18] sm:$0xff]  }
 0x290   :  { %2367 = vmatpush1.bf16.msra.mxu0 %v6517_v19  ;;  %v6568_v19 = vld [vmem:[%s7765_s11 + $0x4] ss:$8 sps:$4 sm:$0xff]  }
 0x291   :  { %2368 = vmatprep.subr.bf16.mxu0 %v6522_v11  ;;  %v5590_v11 = vld [vmem:[#allocation11] ss:$0 sm:$0xff] }
 0x294   :  { %2369 = vmatpush1.bf16.msra.mxu0 %v6520_v20 }
 0x295   :  { %2370 = vmatprep.subr.bf16.mxu0 %v6525_v21 }
 0x298   :  { %2371 = vmatpush1.bf16.msra.mxu0 %v6523_v22 }
 0x299   :  { %2372 = vmatprep.subr.bf16.mxu0 %v6528_v23 }
 0x29c   :  { %2373 = vmatpush1.bf16.msra.mxu0 %v6526_v24 }
 0x29d   :  { %2374 = vmatprep.subr.bf16.mxu0 %v6531_v25 }
 0x2a0   :  { %2375 = vmatpush1.bf16.msra.mxu0 %v6529_v26 }
 0x2a1   :  { %2376 = vmatprep.subr.bf16.mxu0 %v6534_v27  ;;  %v6566_v27 = vld [vmem:[%s7765_s11] ss:$8 sps:$4 sm:$0xff]  }
 0x2a4   :  { %2377 = vmatpush1.bf16.msra.mxu0 %v6532_v28 }
 0x2a5   :  { %2378 = vmatprep.subr.bf16.mxu0 %v6537_v29  ;;  %v6571_v29 = vld [vmem:[%s7765_s11 + $0x14] ss:$8 sps:$4 sm:$0xff]  }
 0x2a8   :  { %2379 = vmatpush1.bf16.msra.mxu0 %v6535_v34  ;;  %v6574_v34 = vld [vmem:[%s7765_s11 + $0x24] ss:$8 sps:$4 sm:$0xff]  }
 0x2ab   :  { %2381 = vmatmul.mubr.bf16.vlgmr.msra.gmra.mrb[8].mxu0 %v1909_v36  ;;  %v6577_v36 = vld [vmem:[%s7765_s11 + $0x34] ss:$8 sps:$4 sm:$0xff]  }
 0x37e   :  { %v2382_v45 = vpop.f32.mrb[8].mxu0 }
 0x37f   :  { %v6034_v46 = vadd.f32 %v2382_v45, %v1980_v43  ;;  %v2384_v47 = vpop.f32.mrb[9].mxu0  ;;  %v6589_v43 = vld [vmem:[%s7765_s11 + $0x74] ss:$8 sps:$4 sm:$0xff]  }
 0x380   :  { %v6035_v48 = vadd.f32 %v2384_v47, %v1984_v44  ;;  %v2386_v49 = vpop.f32.mrb[10].mxu0  ;;  %v6587_v44 = vld [vmem:[%s7765_s11 + $0x70] ss:$8 sps:$4 sm:$0xff]  }
 0x381   :  { %vm2389_vm4 = vcmp.ge.f32.partialorder %v6034_v46, 0.0  ;;  %v2391_v50 = vmul.f32 0.1, %v6034_v46  ;;  %v2387_v51 = vpop.f32.mrb[11].mxu0  ;;  %v6592_v45 = vld [vmem:[#allocation14 + $0x4] ss:$16 sps:$4 sm:$0xff]  }
 0x382   :  { %vm2390_vm5 = vcmp.ge.f32.partialorder %v6035_v48, 0.0  ;;  %v2392_v52 = vmul.f32 0.1, %v6035_v48  ;;  %v6595_v47 = vld [vmem:[#allocation14 + $0xc] ss:$16 sps:$4 sm:$0xff]  }
 0x383   :  { %v2393_v53 = vsel %vm2389_vm4, %v6034_v46, %v2391_v50  ;;  %v6593_v46 = vld [vmem:[#allocation14 + $0x8] ss:$16 sps:$4 sm:$0xff]   ;;  %3382 = vmatprep.subr.bf16.mxu0 %v6595_v47  ;;  %v6607_v50 = vld [vmem:[#allocation14 + $0x4c] ss:$16 sps:$4 sm:$0xff]   ;;  %v6664_v47 = vld [vmem:[#allocation14 + $0x184] ss:$16 sps:$4 sm:$0xff]  }
 0x384   :  { %v2394_v54 = vsel %vm2390_vm5, %v6035_v48, %v2392_v52  ;;  %v2395_v59 = vpack.c.bf16 %v2393_v53, %v2393_v53  ;;  %v6601_v48 = vld [vmem:[#allocation14 + $0x2c] ss:$16 sps:$4 sm:$0xff]   ;;  %3383 = vmatpush1.bf16.msra.mxu0 %v6593_v46  ;;  %v6599_v49 = vld [vmem:[#allocation14 + $0x28] ss:$16 sps:$4 sm:$0xff]   ;;  %v6656_v46 = vld [vmem:[#allocation14 + $0x160] ss:$16 sps:$4 sm:$0xff]  }
 0x385   :  { %v2396_v55 = vpack.c.bf16 %v2394_v54, %v2394_v54  ;;  %3384 = vmatprep.subr.bf16.mxu0 %v6601_v48  ;;  %v6605_v51 = vld [vmem:[#allocation14 + $0x48] ss:$16 sps:$4 sm:$0xff]   ;;  %v6613_v52 = vld [vmem:[#allocation14 + $0x6c] ss:$16 sps:$4 sm:$0xff]   ;;  %v6662_v48 = vld [vmem:[#allocation14 + $0x180] ss:$16 sps:$4 sm:$0xff]  }
 0x386   :  { %v6611_v53 = vld [vmem:[#allocation14 + $0x68] ss:$16 sps:$4 sm:$0xff]   ;;  %v6619_v54 = vld [vmem:[#allocation14 + $0x8c] ss:$16 sps:$4 sm:$0xff]  }
 0x387   :  { %2564 = vmatprep.mubr.bf16.mxu1 %v2396_v55  ;;  %v6617_v55 = vld [vmem:[#allocation14 + $0x88] ss:$16 sps:$4 sm:$0xff]  }
 0x388   :  { %2565 = vmatmul.mubr.bf16.vlgmr.msra.gmra.mrb[4].mxu1 %v2395_v59  ;;  %3385 = vmatpush1.bf16.msra.mxu0 %v6599_v49  ;;  %v6623_v59 = vld [vmem:[#allocation14 + $0xa8] ss:$16 sps:$4 sm:$0xff]   ;;  %v6670_v49 = vld [vmem:[#allocation14 + $0x1a4] ss:$16 sps:$4 sm:$0xff]  }
 0x389   :  { %5997 = vmatpush3.bf16.msra.mxu1 %v6554_v57  ;;  %6012 = vmatprep.mubr.msk.bf16.mxu1 %vm7285_vm6, %v7284_v41  ;;  %v6625_v57 = vld [vmem:[#allocation14 + $0xac] ss:$16 sps:$4 sm:$0xff]  }
 0x38a   :  { %5998 = vmatprep.subr.bf16.mxu1 %v7284_v41  ;;  %3386 = vmatprep.subr.bf16.mxu0 %v6607_v50  ;;  %v6668_v50 = vld [vmem:[#allocation14 + $0x1a0] ss:$16 sps:$4 sm:$0xff]  }
 0x38c   :  { %3387 = vmatpush1.bf16.msra.mxu0 %v6605_v51  ;;  %v6676_v51 = vld [vmem:[#allocation14 + $0x1c4] ss:$16 sps:$4 sm:$0xff]  }
 0x38d   :  { %5999 = vmatpush3.bf16.msra.mxu1 %v6555_v60  ;;  %3388 = vmatprep.subr.bf16.mxu0 %v6613_v52  ;;  %v6631_v60 = vld [vmem:[#allocation14 + $0xcc] ss:$16 sps:$4 sm:$0xff]  }
 0x38e   :  { %6000 = vmatprep.subr.bf16.mxu1 %v7284_v41  ;;  %v6679_v52 = vld [vmem:[#allocation14 + $0x1cc] ss:$16 sps:$4 sm:$0xff]  }
 0x390   :  { %3389 = vmatpush1.bf16.msra.mxu0 %v6611_v53  ;;  %v6674_v53 = vld [vmem:[#allocation14 + $0x1c0] ss:$16 sps:$4 sm:$0xff]  }
 0x391   :  { %6001 = vmatpush3.bf16.msra.mxu1 %v6556_v61  ;;  %3390 = vmatprep.subr.bf16.mxu0 %v6619_v54  ;;  %v6629_v61 = vld [vmem:[#allocation14 + $0xc8] ss:$16 sps:$4 sm:$0xff]  }
 0x392   :  { %6002 = vmatprep.subr.bf16.mxu1 %v7284_v41  ;;  %v6677_v54 = vld [vmem:[#allocation14 + $0x1c8] ss:$16 sps:$4 sm:$0xff]  }
 0x394   :  { %3391 = vmatpush1.bf16.msra.mxu0 %v6617_v55  ;;  %v6682_v55 = vld [vmem:[#allocation14 + $0x1e4] ss:$16 sps:$4 sm:$0xff]  }
 0x395   :  { %6003 = vmatpush3.bf16.msra.mxu1 %v6557_v62  ;;  %3392 = vmatprep.subr.bf16.mxu0 %v6625_v57  ;;  %v6637_v62 = vld [vmem:[#allocation14 + $0xec] ss:$16 sps:$4 sm:$0xff]  }
 0x396   :  { %6004 = vmatprep.subr.bf16.mxu1 %v7284_v41  ;;  %v6685_v57 = vld [vmem:[#allocation14 + $0x1ec] ss:$16 sps:$4 sm:$0xff]  }
 0x398   :  { %3393 = vmatpush1.bf16.msra.mxu0 %v6623_v59  ;;  %v6680_v59 = vld [vmem:[#allocation14 + $0x1e0] ss:$16 sps:$4 sm:$0xff]  }
 0x399   :  { %6005 = vmatpush3.bf16.msra.mxu1 %v6558_v63  ;;  %3394 = vmatprep.subr.bf16.mxu0 %v6631_v60  ;;  %v6635_v63 = vld [vmem:[#allocation14 + $0xe8] ss:$16 sps:$4 sm:$0xff]  }
 0x39a   :  { %6006 = vmatprep.subr.bf16.mxu1 %v7284_v41  ;;  %v6683_v60 = vld [vmem:[#allocation14 + $0x1e8] ss:$16 sps:$4 sm:$0xff]  }
 0x39c   :  { %3395 = vmatpush1.bf16.msra.mxu0 %v6629_v61  ;;  %v6688_v61 = vld [vmem:[#allocation16 + $0x4] ss:$28 sps:$4 sm:$0xff]  }
 0x39d   :  { %6007 = vmatpush3.bf16.msra.mxu1 %v6559_v0  ;;  %3396 = vmatprep.subr.bf16.mxu0 %v6637_v62  ;;  %v6643_v0 = vld [vmem:[#allocation14 + $0x10c] ss:$16 sps:$4 sm:$0xff]  }
 0x39e   :  { %6008 = vmatprep.subr.bf16.mxu1 %v7284_v41  ;;  %v6691_v62 = vld [vmem:[#allocation16 + $0xc] ss:$28 sps:$4 sm:$0xff]  }
 0x3a0   :  { %3397 = vmatpush1.bf16.msra.mxu0 %v6635_v63  ;;  %v2794_v63 = vld [vmem:[%s7766_s12] sm:$0x3] }
 0x3a1   :  { %6009 = vmatpush3.bf16.msra.mxu1 %v6560_v1  ;;  %v6641_v1 = vld [vmem:[#allocation14 + $0x108] ss:$16 sps:$4 sm:$0xff]   ;;  %3398 = vmatprep.subr.bf16.mxu0 %v6643_v0  ;;  %v2799_v0 = vrot.slane %v2794_v63, %v7557_v31 }
 0x3a2   :  { %6010 = vmatprep.subr.bf16.mxu1 %v7284_v41 }
 0x3a4   :  { %3399 = vmatpush1.bf16.msra.mxu0 %v6641_v1  ;;  %v2803_v1 = vrot.slane %v2794_v63, %v7560_v32  ;;  %v6752_v63 = vld [vmem:[#allocation16 + $0x268] ss:$28 sps:$4 sm:$0xff]  }
 0x3a5   :  { %6011 = vmatpush3.bf16.msra.mxu1 %v6561_v2  ;;  %v6649_v2 = vld [vmem:[#allocation14 + $0x12c] ss:$16 sps:$4 sm:$0xff]  }
 0x3a6   :  { %6016 = vmatprep.subr.bf16.mxu1 %v7284_v41  ;;  %3400 = vmatprep.subr.bf16.mxu0 %v6649_v2 }
 0x45b   :  { %v5932_v3 = vpop.f32.mrb[4].mxu1 }
 0x45c   :  { %v5933_v5 = vpop.f32.mrb[5].mxu1 }
 0x45d   :  { %v5934_v6 = vadd.f32 %v5933_v5, %v5932_v3  ;;  %v5935_v7 = vpop.f32.mrb[6].mxu1  ;;  %v6647_v3 = vld [vmem:[#allocation14 + $0x128] ss:$16 sps:$4 sm:$0xff]  }
 0x45e   :  { %v5936_v8 = vpop.f32.mrb[7].mxu1  ;;  %3401 = vmatpush1.bf16.msra.mxu0 %v6647_v3  ;;  %v6653_v5 = vld [vmem:[#allocation14 + $0x148] ss:$16 sps:$4 sm:$0xff]  }
 0x45f   :  { %v2567_v9 = vadd.f32 %v5934_v6, %v5573_v4  ;;  %v6655_v4 = vld [vmem:[#allocation14 + $0x14c] ss:$16 sps:$4 sm:$0xff]   ;;  %v6659_v7 = vld [vmem:[#allocation14 + $0x168] ss:$16 sps:$4 sm:$0xff]  }
 0x460   :  { %3402 = vmatprep.subr.bf16.mxu0 %v6655_v4  ;;  %v6661_v6 = vld [vmem:[#allocation14 + $0x16c] ss:$16 sps:$4 sm:$0xff]  }
 0x461   :  { %vm2572_vm7 = vcmp.ge.f32.partialorder %v2567_v9, 0.0  ;;  %v2573_v10 = vmul.f32 0.1, %v2567_v9  ;;  %v6667_v8 = vld [vmem:[#allocation14 + $0x18c] ss:$16 sps:$4 sm:$0xff]  }
 0x462   :  { %3403 = vmatpush1.bf16.msra.mxu0 %v6653_v5 }
 0x463   :  { %v2574_v12 = vsel %vm2572_vm7, %v2567_v9, %v2573_v10  ;;  %3404 = vmatprep.subr.bf16.mxu0 %v6661_v6  ;;  %v6665_v9 = vld [vmem:[#allocation14 + $0x188] ss:$16 sps:$4 sm:$0xff]   ;;  %v6673_v10 = vld [vmem:[#allocation14 + $0x1ac] ss:$16 sps:$4 sm:$0xff]  }
 0x464   :  { %v2575_v14 = vpack.c.bf16 %v2574_v12, %v2574_v12  ;;  %v6671_v12 = vld [vmem:[#allocation14 + $0x1a8] ss:$16 sps:$4 sm:$0xff]  }
 0x466   :  { %6013 = vmatmul.mubr.bf16.vlgmr.msra.gmra.mrb[8].mxu1 %v2575_v14  ;;  %3405 = vmatpush1.bf16.msra.mxu0 %v6659_v7 }
 0x467   :  { %6017 = vmatpush3.bf16.msra.mxu1 %v6562_v13  ;;  %6024 = vmatprep.mubr.msk.bf16.mxu1 %vm7285_vm6, %v7284_v41  ;;  %v5599_v13 = vld [vmem:[%s7764_s10] ss:$0 sm:$0xff] }
 0x468   :  { %6018 = vmatprep.subr.bf16.mxu1 %v7284_v41  ;;  %3406 = vmatprep.subr.bf16.mxu0 %v6667_v8 }
 0x46a   :  { %3407 = vmatpush1.bf16.msra.mxu0 %v6665_v9 }
 0x46b   :  { %6019 = vmatpush3.bf16.msra.mxu1 %v6563_v16  ;;  %3408 = vmatprep.subr.bf16.mxu0 %v6673_v10 }
 0x46c   :  { %6020 = vmatprep.subr.bf16.mxu1 %v7284_v41 }
 0x46e   :  { %3409 = vmatpush1.bf16.msra.mxu0 %v6671_v12 }
 0x46f   :  { %6021 = vmatpush3.bf16.msra.mxu1 %v6564_v17  ;;  %3410 = vmatprep.subr.bf16.mxu0 %v6679_v52  ;;  %v6745_v52 = vld [vmem:[#allocation16 + $0x204] ss:$28 sps:$4 sm:$0xff]  }
 0x470   :  { %6022 = vmatprep.subr.bf16.mxu1 %v7284_v41  ;;  %v6586_v41 = vld [vmem:[%s7765_s11 + $0x64] ss:$8 sps:$4 sm:$0xff]  }
 0x472   :  { %3411 = vmatpush1.bf16.msra.mxu0 %v6677_v54  ;;  %v6743_v54 = vld [vmem:[#allocation16 + $0x200] ss:$28 sps:$4 sm:$0xff]  }
 0x473   :  { %6023 = vmatpush3.bf16.msra.mxu1 %v6565_v18  ;;  %3412 = vmatprep.subr.bf16.mxu0 %v6685_v57  ;;  %v6751_v57 = vld [vmem:[#allocation16 + $0x23c] ss:$28 sps:$4 sm:$0xff]  }
 0x474   :  { %2886 = vmatprep.subr.bf16.mxu1 %v6568_v19 }
 0x476   :  { %3413 = vmatpush1.bf16.msra.mxu0 %v6683_v60  ;;  %v6749_v60 = vld [vmem:[#allocation16 + $0x238] ss:$28 sps:$4 sm:$0xff]  }
 0x477   :  { %4966 = vmatprep.subr.bf16.mxu0 %v6691_v62  ;;  %v6757_v62 = vld [vmem:[#allocation16 + $0x274] ss:$28 sps:$4 sm:$0xff]  }
 0x539   :  { %v2681_v20 = vpop.f32.mrb[8].mxu1 }
 0x53a   :  { %v2682_v21 = vadd.f32 %v5590_v11, %v2681_v20  ;;  %v6014_v22 = vpop.f32.mrb[9].mxu1 }
 0x53b   :  { %v2684_v23 = vpop.f32.mrb[10].mxu1 }
 0x53c   :  { %vm2687_vm8 = vcmp.ge.f32.partialorder %v2682_v21, 0.0  ;;  %v2688_v24 = vmul.f32 0.1, %v2682_v21  ;;  %v6015_v25 = vpop.f32.mrb[11].mxu1  ;;  %v6598_v23 = vld [vmem:[#allocation14 + $0x24] ss:$16 sps:$4 sm:$0xff]  }
 0x53d   :  { %v6604_v25 = vld [vmem:[#allocation14 + $0x44] ss:$16 sps:$4 sm:$0xff]  }
 0x53e   :  { %v2689_v26 = vsel %vm2687_vm8, %v2682_v21, %v2688_v24  ;;  %v6590_v21 = vld [vmem:[#allocation14] ss:$16 sps:$4 sm:$0xff]  }
 0x53f   :  { %v2690_v28 = vpack.c.bf16 %v2689_v26, %v2689_v26  ;;  %v6596_v24 = vld [vmem:[#allocation14 + $0x20] ss:$16 sps:$4 sm:$0xff]  }
 0x540   :  { %v6602_v26 = vld [vmem:[#allocation14 + $0x40] ss:$16 sps:$4 sm:$0xff]  }
 0x541   :  { %6025 = vmatmul.mubr.msk.bf16.vlgmr.msra.gmra.mrb[12].mxu1 %vm2730_vm9, %v2690_v28  ;;  %v6608_v28 = vld [vmem:[#allocation14 + $0x60] ss:$16 sps:$4 sm:$0xff]  }
 0x542   :  { %2887 = vmatpush1.bf16.msra.mxu1 %v6566_v27  ;;  %2918 = vmatprep.mubr.bf16.mxu1 %v7283_v15  ;;  %v6575_v15 = vld [vmem:[%s7765_s11 + $0x30] ss:$8 sps:$4 sm:$0xff]  }
 0x543   :  { %2888 = vmatprep.subr.bf16.mxu1 %v6571_v29  ;;  %v6610_v27 = vld [vmem:[#allocation14 + $0x64] ss:$16 sps:$4 sm:$0xff]  }
 0x544   :  { %v6616_v29 = vld [vmem:[#allocation14 + $0x84] ss:$16 sps:$4 sm:$0xff]  }
 0x546   :  { %2889 = vmatpush1.bf16.msra.mxu1 %v6569_v33  ;;  %v6614_v33 = vld [vmem:[#allocation14 + $0x80] ss:$16 sps:$4 sm:$0xff]  }
 0x547   :  { %2890 = vmatprep.subr.bf16.mxu1 %v6574_v34  ;;  %v6622_v34 = vld [vmem:[#allocation14 + $0xa4] ss:$16 sps:$4 sm:$0xff]  }
 0x54a   :  { %2891 = vmatpush1.bf16.msra.mxu1 %v6572_v35  ;;  %v6620_v35 = vld [vmem:[#allocation14 + $0xa0] ss:$16 sps:$4 sm:$0xff]  }
 0x54b   :  { %2892 = vmatprep.subr.bf16.mxu1 %v6577_v36  ;;  %v6628_v36 = vld [vmem:[#allocation14 + $0xc4] ss:$16 sps:$4 sm:$0xff]  }
 0x54e   :  { %2893 = vmatpush1.bf16.msra.mxu1 %v6575_v15  ;;  %v6626_v15 = vld [vmem:[#allocation14 + $0xc0] ss:$16 sps:$4 sm:$0xff]  }
 0x54f   :  { %2894 = vmatprep.subr.bf16.mxu1 %v6580_v37  ;;  %v6634_v37 = vld [vmem:[#allocation14 + $0xe4] ss:$16 sps:$4 sm:$0xff]  }
 0x552   :  { %2895 = vmatpush1.bf16.msra.mxu1 %v6578_v38  ;;  %v6632_v38 = vld [vmem:[#allocation14 + $0xe0] ss:$16 sps:$4 sm:$0xff]  }
 0x553   :  { %2896 = vmatprep.subr.bf16.mxu1 %v6583_v39  ;;  %v6640_v39 = vld [vmem:[#allocation14 + $0x104] ss:$16 sps:$4 sm:$0xff]  }
 0x556   :  { %2897 = vmatpush1.bf16.msra.mxu1 %v6581_v40  ;;  %v6638_v40 = vld [vmem:[#allocation14 + $0x100] ss:$16 sps:$4 sm:$0xff]  }
 0x557   :  { %2898 = vmatprep.subr.bf16.mxu1 %v6586_v41  ;;  %v6646_v41 = vld [vmem:[#allocation14 + $0x124] ss:$16 sps:$4 sm:$0xff]  }
 0x55a   :  { %2899 = vmatpush1.bf16.msra.mxu1 %v6584_v42  ;;  %v6644_v42 = vld [vmem:[#allocation14 + $0x120] ss:$16 sps:$4 sm:$0xff]  }
 0x55b   :  { %2900 = vmatprep.subr.bf16.mxu1 %v6589_v43  ;;  %v6652_v43 = vld [vmem:[#allocation14 + $0x144] ss:$16 sps:$4 sm:$0xff]  }
 0x55e   :  { %2901 = vmatpush1.bf16.msra.mxu1 %v6587_v44  ;;  %v6650_v44 = vld [vmem:[#allocation14 + $0x140] ss:$16 sps:$4 sm:$0xff]  }
 0x55f   :  { %3341 = vmatprep.subr.bf16.mxu1 %v6592_v45  ;;  %v6658_v45 = vld [vmem:[#allocation14 + $0x164] ss:$16 sps:$4 sm:$0xff]  }
 0x614   :  { %v2768_v14 = vpop.f32.mrb[12].mxu1 }
 0x615   :  { %v2769_v16 = vadd.f32 %v5599_v13, %v2768_v14  ;;  %v6026_v17 = vpop.f32.mrb[13].mxu1  ;;  %v6686_v14 = vld [vmem:[#allocation16] ss:$28 sps:$4 sm:$0xff]  }
 0x616   :  { %v2771_v18 = vpop.f32.mrb[14].mxu1 }
 0x617   :  { %vm2774_vm10 = vcmp.ge.f32.partialorder %v2769_v16, 0.0  ;;  %v2775_v19 = vmul.f32 0.1, %v2769_v16  ;;  %v6027_v11 = vpop.f32.mrb[15].mxu1  ;;  %v6694_v18 = vld [vmem:[#allocation16 + $0x3c] ss:$28 sps:$4 sm:$0xff]  }
 0x618   :  { %v6692_v11 = vld [vmem:[#allocation16 + $0x38] ss:$28 sps:$4 sm:$0xff]  }
 0x619   :  { %v2776_v20 = vsel %vm2774_vm10, %v2769_v16, %v2775_v19  ;;  %v6689_v16 = vld [vmem:[#allocation16 + $0x8] ss:$28 sps:$4 sm:$0xff]  }
 0x61a   :  { %v2777_v22 = vpack.c.bf16 %v2776_v20, %v2776_v20  ;;  %v6697_v19 = vld [vmem:[#allocation16 + $0x44] ss:$28 sps:$4 sm:$0xff]  }
 0x61b   :  { %v6695_v20 = vld [vmem:[#allocation16 + $0x40] ss:$28 sps:$4 sm:$0xff]  }
 0x61c   :  { %2919 = vmatmul.mubr.bf16.vlgmr.msra.gmra.mrb[16].mxu1 %v2777_v22  ;;  %v6703_v22 = vld [vmem:[#allocation16 + $0x7c] ss:$28 sps:$4 sm:$0xff]  }
 0x61d   :  { %3342 = vmatpush1.bf16.msra.mxu1 %v6590_v21  ;;  %v6700_v21 = vld [vmem:[#allocation16 + $0x74] ss:$28 sps:$4 sm:$0xff]  }
 0x61e   :  { %3343 = vmatprep.subr.bf16.mxu1 %v6598_v23  ;;  %v6698_v23 = vld [vmem:[#allocation16 + $0x70] ss:$28 sps:$4 sm:$0xff]  }
 0x621   :  { %3344 = vmatpush1.bf16.msra.mxu1 %v6596_v24  ;;  %v6701_v24 = vld [vmem:[#allocation16 + $0x78] ss:$28 sps:$4 sm:$0xff]  }
 0x622   :  { %3345 = vmatprep.subr.bf16.mxu1 %v6604_v25  ;;  %v6706_v25 = vld [vmem:[#allocation16 + $0xac] ss:$28 sps:$4 sm:$0xff]  }
 0x625   :  { %3346 = vmatpush1.bf16.msra.mxu1 %v6602_v26  ;;  %v6709_v26 = vld [vmem:[#allocation16 + $0xb4] ss:$28 sps:$4 sm:$0xff]  }
 0x626   :  { %3347 = vmatprep.subr.bf16.mxu1 %v6610_v27  ;;  %v6704_v27 = vld [vmem:[#allocation16 + $0xa8] ss:$28 sps:$4 sm:$0xff]  }
 0x629   :  { %3348 = vmatpush1.bf16.msra.mxu1 %v6608_v28  ;;  %v6707_v28 = vld [vmem:[#allocation16 + $0xb0] ss:$28 sps:$4 sm:$0xff]  }
 0x62a   :  { %3349 = vmatprep.subr.bf16.mxu1 %v6616_v29  ;;  %v6712_v29 = vld [vmem:[#allocation16 + $0xe4] ss:$28 sps:$4 sm:$0xff]  }
 0x62d   :  { %3350 = vmatpush1.bf16.msra.mxu1 %v6614_v33  ;;  %v6715_v33 = vld [vmem:[#allocation16 + $0xec] ss:$28 sps:$4 sm:$0xff]  }
 0x62e   :  { %3351 = vmatprep.subr.bf16.mxu1 %v6622_v34  ;;  %v6710_v34 = vld [vmem:[#allocation16 + $0xe0] ss:$28 sps:$4 sm:$0xff]  }
 0x631   :  { %3352 = vmatpush1.bf16.msra.mxu1 %v6620_v35  ;;  %v6713_v35 = vld [vmem:[#allocation16 + $0xe8] ss:$28 sps:$4 sm:$0xff]  }
 0x632   :  { %3353 = vmatprep.subr.bf16.mxu1 %v6628_v36  ;;  %v6718_v36 = vld [vmem:[#allocation16 + $0x11c] ss:$28 sps:$4 sm:$0xff]  }
 0x635   :  { %3354 = vmatpush1.bf16.msra.mxu1 %v6626_v15  ;;  %v6721_v15 = vld [vmem:[#allocation16 + $0x124] ss:$28 sps:$4 sm:$0xff]  }
 0x636   :  { %3355 = vmatprep.subr.bf16.mxu1 %v6634_v37  ;;  %v6716_v37 = vld [vmem:[#allocation16 + $0x118] ss:$28 sps:$4 sm:$0xff]  }
 0x639   :  { %3356 = vmatpush1.bf16.msra.mxu1 %v6632_v38  ;;  %v6719_v38 = vld [vmem:[#allocation16 + $0x120] ss:$28 sps:$4 sm:$0xff]  }
 0x63a   :  { %3357 = vmatprep.subr.bf16.mxu1 %v6640_v39  ;;  %v6724_v39 = vld [vmem:[#allocation16 + $0x154] ss:$28 sps:$4 sm:$0xff]  }
 0x63d   :  { %3358 = vmatpush1.bf16.msra.mxu1 %v6638_v40  ;;  %v6727_v40 = vld [vmem:[#allocation16 + $0x15c] ss:$28 sps:$4 sm:$0xff]  }
 0x63e   :  { %3359 = vmatprep.subr.bf16.mxu1 %v6646_v41  ;;  %v6722_v41 = vld [vmem:[#allocation16 + $0x150] ss:$28 sps:$4 sm:$0xff]  }
 0x641   :  { %3360 = vmatpush1.bf16.msra.mxu1 %v6644_v42  ;;  %v6725_v42 = vld [vmem:[#allocation16 + $0x158] ss:$28 sps:$4 sm:$0xff]  }
 0x642   :  { %3361 = vmatprep.subr.bf16.mxu1 %v6652_v43  ;;  %v6730_v43 = vld [vmem:[#allocation16 + $0x18c] ss:$28 sps:$4 sm:$0xff]  }
 0x645   :  { %3362 = vmatpush1.bf16.msra.mxu1 %v6650_v44  ;;  %v6733_v44 = vld [vmem:[#allocation16 + $0x194] ss:$28 sps:$4 sm:$0xff]  }
 0x646   :  { %3363 = vmatprep.subr.bf16.mxu1 %v6658_v45  ;;  %v6728_v45 = vld [vmem:[#allocation16 + $0x188] ss:$28 sps:$4 sm:$0xff]  }
 0x649   :  { %3364 = vmatpush1.bf16.msra.mxu1 %v6656_v46  ;;  %v6731_v46 = vld [vmem:[#allocation16 + $0x190] ss:$28 sps:$4 sm:$0xff]  }
 0x64a   :  { %3365 = vmatprep.subr.bf16.mxu1 %v6664_v47  ;;  %v6736_v47 = vld [vmem:[#allocation16 + $0x1c4] ss:$28 sps:$4 sm:$0xff]  }
 0x64d   :  { %3366 = vmatpush1.bf16.msra.mxu1 %v6662_v48  ;;  %v6739_v48 = vld [vmem:[#allocation16 + $0x1cc] ss:$28 sps:$4 sm:$0xff]  }
 0x64e   :  { %3367 = vmatprep.subr.bf16.mxu1 %v6670_v49  ;;  %v6734_v49 = vld [vmem:[#allocation16 + $0x1c0] ss:$28 sps:$4 sm:$0xff]  }
 0x651   :  { %3368 = vmatpush1.bf16.msra.mxu1 %v6668_v50  ;;  %v6737_v50 = vld [vmem:[#allocation16 + $0x1c8] ss:$28 sps:$4 sm:$0xff]  }
 0x652   :  { %3369 = vmatprep.subr.bf16.mxu1 %v6676_v51  ;;  %v6742_v51 = vld [vmem:[#allocation16 + $0x1fc] ss:$28 sps:$4 sm:$0xff]  }
 0x655   :  { %3370 = vmatpush1.bf16.msra.mxu1 %v6674_v53  ;;  %v6740_v53 = vld [vmem:[#allocation16 + $0x1f8] ss:$28 sps:$4 sm:$0xff]  }
 0x656   :  { %3371 = vmatprep.subr.bf16.mxu1 %v6682_v55  ;;  %v6748_v55 = vld [vmem:[#allocation16 + $0x234] ss:$28 sps:$4 sm:$0xff]  }
 0x659   :  { %3372 = vmatpush1.bf16.msra.mxu1 %v6680_v59  ;;  %v6746_v59 = vld [vmem:[#allocation16 + $0x230] ss:$28 sps:$4 sm:$0xff]  }
 0x65a   :  { %4884 = vmatprep.subr.bf16.mxu1 %v6688_v61  ;;  %v6754_v61 = vld [vmem:[#allocation16 + $0x26c] ss:$28 sps:$4 sm:$0xff]  }
 0x6ef   :  { %v2920_v2 = vpop.f32.mrb[16].mxu1 }
 0x6f0   :  { %v2921_v3 = vadd.f32 %v2920_v2, %v2799_v0  ;;  %v2922_v4 = vpop.f32.mrb[17].mxu1  ;;  %v6755_v0 = vld [vmem:[#allocation16 + $0x270] ss:$28 sps:$4 sm:$0xff]  }
 0x6f1   :  { %v2923_v5 = vadd.f32 %v2922_v4, %v2803_v1  ;;  %v2924_v6 = vpop.f32.mrb[18].mxu1  ;;  %v6760_v1 = vld [vmem:[#allocation16 + $0x2a4] ss:$28 sps:$4 sm:$0xff]   ;;  %v6763_v2 = vld [vmem:[#allocation16 + $0x2ac] ss:$28 sps:$4 sm:$0xff]  }
 0x6f2   :  { %vm2927_vm11 = vcmp.ge.f32.partialorder %v2921_v3, 0.0  ;;  %v2929_v7 = vmul.f32 0.1, %v2921_v3  ;;  %v2925_v8 = vpop.f32.mrb[19].mxu1  ;;  %v6761_v4 = vld [vmem:[#allocation16 + $0x2a8] ss:$28 sps:$4 sm:$0xff]  }
 0x6f3   :  { %vm2928_vm12 = vcmp.ge.f32.partialorder %v2923_v5, 0.0  ;;  %v2930_v9 = vmul.f32 0.1, %v2923_v5  ;;  %v6769_v6 = vld [vmem:[#allocation16 + $0x2e4] ss:$28 sps:$4 sm:$0xff]  }
 0x6f4   :  { %v2931_v10 = vsel %vm2927_vm11, %v2921_v3, %v2929_v7  ;;  %v6758_v3 = vld [vmem:[#allocation16 + $0x2a0] ss:$28 sps:$4 sm:$0xff]   ;;  %v6764_v7 = vld [vmem:[#allocation16 + $0x2d8] ss:$28 sps:$4 sm:$0xff]  }
 0x6f5   :  { %v2932_v12 = vsel %vm2928_vm12, %v2923_v5, %v2930_v9  ;;  %v2933_v17 = vpack.c.bf16 %v2931_v10, %v2931_v10  ;;  %v6766_v5 = vld [vmem:[#allocation16 + $0x2dc] ss:$28 sps:$4 sm:$0xff]   ;;  %v6772_v9 = vld [vmem:[#allocation16 + $0x314] ss:$28 sps:$4 sm:$0xff]  }
 0x6f6   :  { %v2934_v13 = vpack.c.bf16 %v2932_v12, %v2932_v12  ;;  %v6767_v8 = vld [vmem:[#allocation16 + $0x2e0] ss:$28 sps:$4 sm:$0xff]   ;;  %v6770_v12 = vld [vmem:[#allocation16 + $0x310] ss:$28 sps:$4 sm:$0xff]  }
 0x6f7   :  { %v6775_v10 = vld [vmem:[#allocation16 + $0x31c] ss:$28 sps:$4 sm:$0xff]  }
 0x6f8   :  { %3373 = vmatprep.mubr.bf16.mxu1 %v2934_v13  ;;  %3414 = vmatprep.mubr.bf16.mxu0 %v2934_v13  ;;  %v6773_v13 = vld [vmem:[#allocation16 + $0x318] ss:$28 sps:$4 sm:$0xff]  }
 0x6f9   :  { %3374 = vmatmul.mubr.bf16.vlgmr.msra.gmra.mrb[20].mxu1 %v2933_v17  ;;  %3415 = vmatmul.mubr.bf16.vlgmr.msra.gmra.mrb[12].mxu0 %v2933_v17  ;;  %v6776_v17 = vld [vmem:[#allocation16 + $0x348] ss:$28 sps:$4 sm:$0xff]  }
 0x6fa   :  { %4885 = vmatpush1.bf16.msra.mxu1 %v6686_v14  ;;  %4967 = vmatpush1.bf16.msra.mxu0 %v6689_v16  ;;  %v6778_v14 = vld [vmem:[#allocation16 + $0x34c] ss:$28 sps:$4 sm:$0xff]   ;;  %v6781_v16 = vld [vmem:[#allocation16 + $0x354] ss:$28 sps:$4 sm:$0xff]  }
 0x6fb   :  { %4886 = vmatprep.subr.bf16.mxu1 %v6694_v18  ;;  %4968 = vmatprep.subr.bf16.mxu0 %v6697_v19  ;;  %v6779_v18 = vld [vmem:[#allocation16 + $0x350] ss:$28 sps:$4 sm:$0xff]   ;;  %v6784_v19 = vld [vmem:[#allocation16 + $0x384] ss:$28 sps:$4 sm:$0xff]  }
 0x6fe   :  { %4887 = vmatpush1.bf16.msra.mxu1 %v6692_v11  ;;  %4969 = vmatpush1.bf16.msra.mxu0 %v6695_v20  ;;  %v6787_v11 = vld [vmem:[#allocation16 + $0x38c] ss:$28 sps:$4 sm:$0xff]   ;;  %v7686_v20 = vld [vmem:[%s7768_s14] sm:$0xf] }
 0x6ff   :  { %4888 = vmatprep.subr.bf16.mxu1 %v6700_v21  ;;  %4970 = vmatprep.subr.bf16.mxu0 %v6703_v22  ;;  %v3004_v21 = vrot.slane %v7686_v20, %v7557_v31  ;;  %v3008_v22 = vrot.slane %v7686_v20, %v7560_v32 }
 0x702   :  { %4889 = vmatpush1.bf16.msra.mxu1 %v6698_v23  ;;  %4971 = vmatpush1.bf16.msra.mxu0 %v6701_v24  ;;  %v3016_v23 = vrot.slane %v7686_v20, %v7568_v58 }
 0x703   :  { %4890 = vmatprep.subr.bf16.mxu1 %v6706_v25  ;;  %4972 = vmatprep.subr.bf16.mxu0 %v6709_v26 }
 0x706   :  { %4891 = vmatpush1.bf16.msra.mxu1 %v6704_v27  ;;  %4973 = vmatpush1.bf16.msra.mxu0 %v6707_v28 }
 0x707   :  { %4892 = vmatprep.subr.bf16.mxu1 %v6712_v29  ;;  %4974 = vmatprep.subr.bf16.mxu0 %v6715_v33 }
 0x70a   :  { %4893 = vmatpush1.bf16.msra.mxu1 %v6710_v34  ;;  %4975 = vmatpush1.bf16.msra.mxu0 %v6713_v35 }
 0x70b   :  { %4894 = vmatprep.subr.bf16.mxu1 %v6718_v36  ;;  %4976 = vmatprep.subr.bf16.mxu0 %v6721_v15 }
 0x70e   :  { %4895 = vmatpush1.bf16.msra.mxu1 %v6716_v37  ;;  %4977 = vmatpush1.bf16.msra.mxu0 %v6719_v38 }
 0x70f   :  { %4896 = vmatprep.subr.bf16.mxu1 %v6724_v39  ;;  %4978 = vmatprep.subr.bf16.mxu0 %v6727_v40 }
 0x712   :  { %4897 = vmatpush1.bf16.msra.mxu1 %v6722_v41  ;;  %4979 = vmatpush1.bf16.msra.mxu0 %v6725_v42 }
 0x713   :  { %4898 = vmatprep.subr.bf16.mxu1 %v6730_v43  ;;  %4980 = vmatprep.subr.bf16.mxu0 %v6733_v44  ;;  %v6782_v44 = vld [vmem:[#allocation16 + $0x380] ss:$28 sps:$4 sm:$0xff]  }
 0x716   :  { %4899 = vmatpush1.bf16.msra.mxu1 %v6728_v45  ;;  %4981 = vmatpush1.bf16.msra.mxu0 %v6731_v46  ;;  %v6785_v45 = vld [vmem:[#allocation16 + $0x388] ss:$28 sps:$4 sm:$0xff]  }
 0x717   :  { %4900 = vmatprep.subr.bf16.mxu1 %v6736_v47  ;;  %4982 = vmatprep.subr.bf16.mxu0 %v6739_v48  ;;  %v6790_v47 = vld [vmem:[#allocation16 + $0x3bc] ss:$28 sps:$4 sm:$0xff]   ;;  %v6793_v48 = vld [vmem:[#allocation16 + $0x3c4] ss:$28 sps:$4 sm:$0xff]  }
 0x71a   :  { %4901 = vmatpush1.bf16.msra.mxu1 %v6734_v49  ;;  %4983 = vmatpush1.bf16.msra.mxu0 %v6737_v50  ;;  %v6788_v50 = vld [vmem:[#allocation16 + $0x3b8] ss:$28 sps:$4 sm:$0xff]  }
 0x71b   :  { %4902 = vmatprep.subr.bf16.mxu1 %v6742_v51  ;;  %4984 = vmatprep.subr.bf16.mxu0 %v6745_v52  ;;  %v6791_v51 = vld [vmem:[#allocation16 + $0x3c0] ss:$28 sps:$4 sm:$0xff]   ;;  %v6796_v52 = vld [vmem:[#allocation16 + $0x3f4] ss:$28 sps:$4 sm:$0xff]  }
 0x71e   :  { %4903 = vmatpush1.bf16.msra.mxu1 %v6740_v53  ;;  %4985 = vmatpush1.bf16.msra.mxu0 %v6743_v54  ;;  %v6799_v53 = vld [vmem:[#allocation16 + $0x3fc] ss:$28 sps:$4 sm:$0xff]   ;;  %v6794_v54 = vld [vmem:[#allocation16 + $0x3f0] ss:$28 sps:$4 sm:$0xff]  }
 0x71f   :  { %4904 = vmatprep.subr.bf16.mxu1 %v6748_v55  ;;  %4986 = vmatprep.subr.bf16.mxu0 %v6751_v57  ;;  %v6797_v55 = vld [vmem:[#allocation16 + $0x3f8] ss:$28 sps:$4 sm:$0xff]   ;;  %v6802_v57 = vld [vmem:[#allocation16 + $0x42c] ss:$28 sps:$4 sm:$0xff]  }
 0x722   :  { %4905 = vmatpush1.bf16.msra.mxu1 %v6746_v59  ;;  %4987 = vmatpush1.bf16.msra.mxu0 %v6749_v60  ;;  %v6805_v59 = vld [vmem:[#allocation16 + $0x434] ss:$28 sps:$4 sm:$0xff]   ;;  %v6800_v60 = vld [vmem:[#allocation16 + $0x428] ss:$28 sps:$4 sm:$0xff]  }
 0x723   :  { %4906 = vmatprep.subr.bf16.mxu1 %v6754_v61  ;;  %4988 = vmatprep.subr.bf16.mxu0 %v6757_v62  ;;  %v6803_v61 = vld [vmem:[#allocation16 + $0x430] ss:$28 sps:$4 sm:$0xff]   ;;  %v6808_v62 = vld [vmem:[#allocation16 + $0x464] ss:$28 sps:$4 sm:$0xff]  }
 0x726   :  { %4907 = vmatpush1.bf16.msra.mxu1 %v6752_v63  ;;  %4989 = vmatpush1.bf16.msra.mxu0 %v6755_v0  ;;  %v6811_v63 = vld [vmem:[#allocation16 + $0x46c] ss:$28 sps:$4 sm:$0xff]   ;;  %v6806_v0 = vld [vmem:[#allocation16 + $0x460] ss:$28 sps:$4 sm:$0xff]  }
 0x727   :  { %4908 = vmatprep.subr.bf16.mxu1 %v6760_v1  ;;  %4990 = vmatprep.subr.bf16.mxu0 %v6763_v2  ;;  %v6809_v1 = vld [vmem:[#allocation16 + $0x468] ss:$28 sps:$4 sm:$0xff]   ;;  %v6814_v2 = vld [vmem:[#allocation16 + $0x49c] ss:$28 sps:$4 sm:$0xff]  }
 0x72a   :  { %4909 = vmatpush1.bf16.msra.mxu1 %v6758_v3  ;;  %4991 = vmatpush1.bf16.msra.mxu0 %v6761_v4  ;;  %v6817_v3 = vld [vmem:[#allocation16 + $0x4a4] ss:$28 sps:$4 sm:$0xff]   ;;  %v6812_v4 = vld [vmem:[#allocation16 + $0x498] ss:$28 sps:$4 sm:$0xff]  }
 0x72b   :  { %4910 = vmatprep.subr.bf16.mxu1 %v6766_v5  ;;  %4992 = vmatprep.subr.bf16.mxu0 %v6769_v6  ;;  %v6815_v5 = vld [vmem:[#allocation16 + $0x4a0] ss:$28 sps:$4 sm:$0xff]   ;;  %v6820_v6 = vld [vmem:[#allocation16 + $0x4d4] ss:$28 sps:$4 sm:$0xff]  }
 0x72e   :  { %4911 = vmatpush1.bf16.msra.mxu1 %v6764_v7  ;;  %4993 = vmatpush1.bf16.msra.mxu0 %v6767_v8  ;;  %v6823_v7 = vld [vmem:[#allocation16 + $0x4dc] ss:$28 sps:$4 sm:$0xff]   ;;  %v6818_v8 = vld [vmem:[#allocation16 + $0x4d0] ss:$28 sps:$4 sm:$0xff]  }
 0x72f   :  { %4912 = vmatprep.subr.bf16.mxu1 %v6772_v9  ;;  %4994 = vmatprep.subr.bf16.mxu0 %v6775_v10  ;;  %v6821_v9 = vld [vmem:[#allocation16 + $0x4d8] ss:$28 sps:$4 sm:$0xff]   ;;  %v6826_v10 = vld [vmem:[#allocation16 + $0x50c] ss:$28 sps:$4 sm:$0xff]  }
 0x732   :  { %4913 = vmatpush1.bf16.msra.mxu1 %v6770_v12  ;;  %4995 = vmatpush1.bf16.msra.mxu0 %v6773_v13  ;;  %v6829_v12 = vld [vmem:[#allocation16 + $0x514] ss:$28 sps:$4 sm:$0xff]   ;;  %v6824_v13 = vld [vmem:[#allocation16 + $0x508] ss:$28 sps:$4 sm:$0xff]  }
 0x733   :  { %4914 = vmatprep.subr.bf16.mxu1 %v6778_v14  ;;  %4996 = vmatprep.subr.bf16.mxu0 %v6781_v16  ;;  %v6827_v14 = vld [vmem:[#allocation16 + $0x510] ss:$28 sps:$4 sm:$0xff]   ;;  %v6832_v16 = vld [vmem:[#allocation16 + $0x544] ss:$28 sps:$4 sm:$0xff]  }
 0x736   :  { %4915 = vmatpush1.bf16.msra.mxu1 %v6776_v17  ;;  %4997 = vmatpush1.bf16.msra.mxu0 %v6779_v18  ;;  %v6835_v17 = vld [vmem:[#allocation16 + $0x54c] ss:$28 sps:$4 sm:$0xff]   ;;  %v6830_v18 = vld [vmem:[#allocation16 + $0x540] ss:$28 sps:$4 sm:$0xff]  }
 0x737   :  { %4925 = vmatprep.subr.bf16.mxu1 %v6784_v19  ;;  %5007 = vmatprep.subr.bf16.mxu0 %v6787_v11  ;;  %v6833_v19 = vld [vmem:[#allocation16 + $0x548] ss:$28 sps:$4 sm:$0xff]   ;;  %v6838_v11 = vld [vmem:[#allocation16 + $0x57c] ss:$28 sps:$4 sm:$0xff]  }
 0x7cc   :  { %v3375_v24 = vpop.f32.mrb[20].mxu1  ;;  %v7694_v25 = vpop.f32.mrb[12].mxu0 }
 0x7cd   :  { %v3376_v26 = vadd.f32 %v3375_v24, %v3004_v21  ;;  %v3377_v27 = vpop.f32.mrb[21].mxu1  ;;  %v3418_v28 = vpop.f32.mrb[13].mxu0  ;;  %v6841_v21 = vld [vmem:[#allocation16 + $0x584] ss:$28 sps:$4 sm:$0xff]   ;;  %v6844_v24 = vld [vmem:[#allocation16 + $0x5b4] ss:$28 sps:$4 sm:$0xff]  }
 0x7ce   :  { %v3378_v29 = vadd.f32 %v3377_v27, %v3008_v22  ;;  %v3419_v33 = vadd.f32 %v3418_v28, %v3016_v23  ;;  %v3379_v34 = vpop.f32.mrb[22].mxu1  ;;  %v3420_v35 = vpop.f32.mrb[14].mxu0  ;;  %v6836_v22 = vld [vmem:[#allocation16 + $0x578] ss:$28 sps:$4 sm:$0xff]   ;;  %v6839_v23 = vld [vmem:[#allocation16 + $0x580] ss:$28 sps:$4 sm:$0xff]  }
 0x7cf   :  { %vm3423_vm13 = vcmp.ge.f32.partialorder %v3376_v26, 0.0  ;;  %v3427_v36 = vmul.f32 0.1, %v3376_v26  ;;  %v3380_v39 = vpop.f32.mrb[23].mxu1  ;;  %v3421_v40 = vpop.f32.mrb[15].mxu0 }
 0x7d0   :  { %vm3424_vm14 = vcmp.ge.f32.partialorder %v3378_v29, 0.0  ;;  %v3428_v15 = vmul.f32 0.1, %v3378_v29  ;;  %vm3426_vm15 = vcmp.ge.f32.partialorder %v3419_v33, 0.0  ;;  %v3430_v37 = vmul.f32 0.1, %v3419_v33 }
 0x7d1   :  { %v3431_v38 = vsel %vm3423_vm13, %v3376_v26, %v3427_v36  ;;  %v6847_v26 = vld [vmem:[#allocation16 + $0x5bc] ss:$28 sps:$4 sm:$0xff]   ;;  %v6842_v27 = vld [vmem:[#allocation16 + $0x5b0] ss:$28 sps:$4 sm:$0xff]   ;;  %v6848_v34 = vld [vmem:[#allocation16 + $0x5e8] ss:$28 sps:$4 sm:$0xff]  }
 0x7d2   :  { %v3432_v41 = vsel %vm3424_vm14, %v3378_v29, %v3428_v15  ;;  %v3434_v43 = vsel %vm3426_vm15, %v3419_v33, %v3430_v37  ;;  %v7698_v46 = vpack.c.bf16 %v3431_v38, %v3431_v38  ;;  %v6845_v28 = vld [vmem:[#allocation16 + $0x5b8] ss:$28 sps:$4 sm:$0xff]   ;;  %v6850_v29 = vld [vmem:[#allocation16 + $0x5ec] ss:$28 sps:$4 sm:$0xff]   ;;  %v6856_v36 = vld [vmem:[#allocation16 + $0x624] ss:$28 sps:$4 sm:$0xff]  }
 0x7d3   :  { %v7696_v42 = vpack.c.bf16 %v3432_v41, %v3432_v41  ;;  %v7702_v49 = vpack.c.bf16 %v3434_v43, %v3434_v43  ;;  %v6853_v33 = vld [vmem:[#allocation16 + $0x5f4] ss:$28 sps:$4 sm:$0xff]   ;;  %v6859_v15 = vld [vmem:[#allocation16 + $0x62c] ss:$28 sps:$4 sm:$0xff]   ;;  %v6854_v37 = vld [vmem:[#allocation16 + $0x620] ss:$28 sps:$4 sm:$0xff]   ;;  %v3012_v41 = vrot.slane %v7686_v20, %v7565_v56 }
 0x7d4   :  { %v6851_v35 = vld [vmem:[#allocation16 + $0x5f0] ss:$28 sps:$4 sm:$0xff]   ;;  %v6857_v38 = vld [vmem:[#allocation16 + $0x628] ss:$28 sps:$4 sm:$0xff]   ;;  %v6862_v39 = vld [vmem:[#allocation16 + $0x65c] ss:$28 sps:$4 sm:$0xff]  }
 0x7d5   :  { %4916 = vmatprep.mubr.bf16.mxu1 %v7696_v42  ;;  %4998 = vmatprep.mubr.bf16.mxu0 %v7696_v42  ;;  %v6865_v40 = vld [vmem:[#allocation16 + $0x664] ss:$28 sps:$4 sm:$0xff]   ;;  %v6860_v43 = vld [vmem:[#allocation16 + $0x658] ss:$28 sps:$4 sm:$0xff]  }
 0x7d6   :  { %4917 = vmatmul.mubr.bf16.vlgmr.msra.gmra.mrb[24].mxu1 %v7698_v46  ;;  %4999 = vmatmul.mubr.bf16.vlgmr.msra.gmra.mrb[16].mxu0 %v7698_v46  ;;  %v6872_v20 = vld [vmem:[#allocation16 + $0x6c8] ss:$28 sps:$4 sm:$0xff]  }
 0x7d7   :  { %4926 = vmatpush1.bf16.msra.mxu1 %v6782_v44  ;;  %5008 = vmatpush1.bf16.msra.mxu0 %v6785_v45  ;;  %v6863_v44 = vld [vmem:[#allocation16 + $0x660] ss:$28 sps:$4 sm:$0xff]   ;;  %v6868_v45 = vld [vmem:[#allocation16 + $0x694] ss:$28 sps:$4 sm:$0xff]  }
 0x7d8   :  { %4957 = vmatprep.mubr.bf16.mxu1 %v7702_v49  ;;  %5039 = vmatprep.mubr.bf16.mxu0 %v7702_v49 }
 0x7d9   :  { %4927 = vmatprep.subr.bf16.mxu1 %v6790_v47  ;;  %5009 = vmatprep.subr.bf16.mxu0 %v6793_v48  ;;  %v6871_v47 = vld [vmem:[#allocation16 + $0x69c] ss:$28 sps:$4 sm:$0xff]   ;;  %v3417_v48 = vadd.f32 %v7694_v25, %v3012_v41  ;;  %v6878_v25 = vld [vmem:[#allocation16 + $0x10] ss:$28 sps:$4 sm:$0xff]  }
 0x7da   :  { %v6928_v41 = vld [vmem:[#allocation16 + $0x240] ss:$28 sps:$4 sm:$0xff]  }
 0x7db   :  { %4928 = vmatpush1.bf16.msra.mxu1 %v6788_v50  ;;  %5010 = vmatpush1.bf16.msra.mxu0 %v6791_v51  ;;  %v6866_v50 = vld [vmem:[#allocation16 + $0x690] ss:$28 sps:$4 sm:$0xff]   ;;  %v6869_v51 = vld [vmem:[#allocation16 + $0x698] ss:$28 sps:$4 sm:$0xff]   ;;  %vm3425_vm0 = vcmp.ge.f32.partialorder %v3417_v48, 0.0 }
 0x7dc   :  { %4929 = vmatprep.subr.bf16.mxu1 %v6796_v52  ;;  %5011 = vmatprep.subr.bf16.mxu0 %v6799_v53  ;;  %v6874_v52 = vld [vmem:[#allocation16 + $0x6cc] ss:$28 sps:$4 sm:$0xff]   ;;  %v6877_v53 = vld [vmem:[#allocation16 + $0x6d4] ss:$28 sps:$4 sm:$0xff]  }
 0x7df   :  { %4930 = vmatpush1.bf16.msra.mxu1 %v6794_v54  ;;  %5012 = vmatpush1.bf16.msra.mxu0 %v6797_v55  ;;  %v3429_v54 = vmul.f32 0.1, %v3417_v48  ;;  %v6875_v55 = vld [vmem:[#allocation16 + $0x6d0] ss:$28 sps:$4 sm:$0xff]  }
 0x7e0   :  { %4931 = vmatprep.subr.bf16.mxu1 %v6802_v57  ;;  %5013 = vmatprep.subr.bf16.mxu0 %v6805_v59  ;;  %v6880_v57 = vld [vmem:[#allocation16 + $0x14] ss:$28 sps:$4 sm:$0xff]  }
 0x7e1   :  { %v6881_v59 = vld [vmem:[#allocation16 + $0x1d8] ss:$28 sps:$4 sm:$0xff]  }
 0x7e3   :  { %4932 = vmatpush1.bf16.msra.mxu1 %v6800_v60  ;;  %5014 = vmatpush1.bf16.msra.mxu0 %v6803_v61  ;;  %v3433_v60 = vsel %vm3425_vm0, %v3417_v48, %v3429_v54  ;;  %v6937_v48 = vld [vmem:[#allocation16 + $0x440] ss:$28 sps:$4 sm:$0xff]   ;;  %v6945_v54 = vld [vmem:[#allocation16 + $0x2ec] ss:$28 sps:$4 sm:$0xff]  }
 0x7e4   :  { %4933 = vmatprep.subr.bf16.mxu1 %v6808_v62  ;;  %5015 = vmatprep.subr.bf16.mxu0 %v6811_v63  ;;  %v7711_v61 = vpack.c.bf16 %v3433_v60, %v3433_v60  ;;  %v6882_v62 = vld [vmem:[#allocation16 + $0x18] ss:$28 sps:$4 sm:$0xff]   ;;  %v6885_v63 = vld [vmem:[#allocation16 + $0x4c] ss:$28 sps:$4 sm:$0xff]  }
 0x7e5   :  { %v6951_v60 = vld [vmem:[#allocation16 + $0x6a8] ss:$28 sps:$4 sm:$0xff]  }
 0x7e7   :  { %4934 = vmatpush1.bf16.msra.mxu1 %v6806_v0  ;;  %5016 = vmatpush1.bf16.msra.mxu0 %v6809_v1  ;;  %v6886_v0 = vld [vmem:[#allocation16 + $0x210] ss:$28 sps:$4 sm:$0xff]   ;;  %v6883_v1 = vld [vmem:[#allocation16 + $0x48] ss:$28 sps:$4 sm:$0xff]  }
 0x7e8   :  { %4935 = vmatprep.subr.bf16.mxu1 %v6814_v2  ;;  %5017 = vmatprep.subr.bf16.mxu0 %v6817_v3  ;;  %v6887_v2 = vld [vmem:[#allocation16 + $0x50] ss:$28 sps:$4 sm:$0xff]   ;;  %v6890_v3 = vld [vmem:[#allocation16 + $0x84] ss:$28 sps:$4 sm:$0xff]  }
 0x7eb   :  { %4936 = vmatpush1.bf16.msra.mxu1 %v6812_v4  ;;  %5018 = vmatpush1.bf16.msra.mxu0 %v6815_v5  ;;  %v6891_v4 = vld [vmem:[#allocation16 + $0x248] ss:$28 sps:$4 sm:$0xff]   ;;  %v6888_v5 = vld [vmem:[#allocation16 + $0x80] ss:$28 sps:$4 sm:$0xff]  }
 0x7ec   :  { %4937 = vmatprep.subr.bf16.mxu1 %v6820_v6  ;;  %5019 = vmatprep.subr.bf16.mxu0 %v6823_v7  ;;  %v6892_v6 = vld [vmem:[#allocation16 + $0x88] ss:$28 sps:$4 sm:$0xff]   ;;  %v6895_v7 = vld [vmem:[#allocation16 + $0xbc] ss:$28 sps:$4 sm:$0xff]  }
 0x7ef   :  { %4938 = vmatpush1.bf16.msra.mxu1 %v6818_v8  ;;  %5020 = vmatpush1.bf16.msra.mxu0 %v6821_v9  ;;  %v6896_v8 = vld [vmem:[#allocation16 + $0x280] ss:$28 sps:$4 sm:$0xff]   ;;  %v6893_v9 = vld [vmem:[#allocation16 + $0xb8] ss:$28 sps:$4 sm:$0xff]  }
 0x7f0   :  { %4939 = vmatprep.subr.bf16.mxu1 %v6826_v10  ;;  %5021 = vmatprep.subr.bf16.mxu0 %v6829_v12  ;;  %v6897_v10 = vld [vmem:[#allocation16 + $0xc0] ss:$28 sps:$4 sm:$0xff]   ;;  %v6900_v12 = vld [vmem:[#allocation16 + $0xf4] ss:$28 sps:$4 sm:$0xff]  }
 0x7f3   :  { %4940 = vmatpush1.bf16.msra.mxu1 %v6824_v13  ;;  %5022 = vmatpush1.bf16.msra.mxu0 %v6827_v14  ;;  %v6898_v13 = vld [vmem:[#allocation16 + $0xf0] ss:$28 sps:$4 sm:$0xff]   ;;  %v6902_v14 = vld [vmem:[#allocation16 + $0xf8] ss:$28 sps:$4 sm:$0xff]  }
 0x7f4   :  { %4941 = vmatprep.subr.bf16.mxu1 %v6832_v16  ;;  %5023 = vmatprep.subr.bf16.mxu0 %v6835_v17  ;;  %v6905_v16 = vld [vmem:[#allocation16 + $0x12c] ss:$28 sps:$4 sm:$0xff]  }
 0x7f5   :  { %v6906_v17 = vld [vmem:[#allocation16 + $0x2f0] ss:$28 sps:$4 sm:$0xff]  }
 0x7f7   :  { %4942 = vmatpush1.bf16.msra.mxu1 %v6830_v18  ;;  %5024 = vmatpush1.bf16.msra.mxu0 %v6833_v19  ;;  %v6903_v18 = vld [vmem:[#allocation16 + $0x128] ss:$28 sps:$4 sm:$0xff]   ;;  %v6907_v19 = vld [vmem:[#allocation16 + $0x130] ss:$28 sps:$4 sm:$0xff]  }
 0x7f8   :  { %4943 = vmatprep.subr.bf16.mxu1 %v6838_v11  ;;  %5025 = vmatprep.subr.bf16.mxu0 %v6841_v21  ;;  %v6910_v11 = vld [vmem:[#allocation16 + $0x164] ss:$28 sps:$4 sm:$0xff]  }
 0x7f9   :  { %v6911_v21 = vld [vmem:[#allocation16 + $0x328] ss:$28 sps:$4 sm:$0xff]  }
 0x7fb   :  { %4944 = vmatpush1.bf16.msra.mxu1 %v6836_v22  ;;  %5026 = vmatpush1.bf16.msra.mxu0 %v6839_v23  ;;  %v6908_v22 = vld [vmem:[#allocation16 + $0x160] ss:$28 sps:$4 sm:$0xff]   ;;  %v6912_v23 = vld [vmem:[#allocation16 + $0x168] ss:$28 sps:$4 sm:$0xff]  }
 0x7fc   :  { %4945 = vmatprep.subr.bf16.mxu1 %v6844_v24  ;;  %5027 = vmatprep.subr.bf16.mxu0 %v6847_v26  ;;  %v6915_v24 = vld [vmem:[#allocation16 + $0x19c] ss:$28 sps:$4 sm:$0xff]  }
 0x7fd   :  { %v6916_v26 = vld [vmem:[#allocation16 + $0x360] ss:$28 sps:$4 sm:$0xff]  }
 0x7ff   :  { %4946 = vmatpush1.bf16.msra.mxu1 %v6842_v27  ;;  %5028 = vmatpush1.bf16.msra.mxu0 %v6845_v28  ;;  %v6913_v27 = vld [vmem:[#allocation16 + $0x198] ss:$28 sps:$4 sm:$0xff]   ;;  %v6917_v28 = vld [vmem:[#allocation16 + $0x1a0] ss:$28 sps:$4 sm:$0xff]  }
 0x800   :  { %4947 = vmatprep.subr.bf16.mxu1 %v6850_v29  ;;  %5029 = vmatprep.subr.bf16.mxu0 %v6853_v33  ;;  %v6920_v29 = vld [vmem:[#allocation16 + $0x1d4] ss:$28 sps:$4 sm:$0xff]  }
 0x801   :  { %v6921_v33 = vld [vmem:[#allocation16 + $0x558] ss:$28 sps:$4 sm:$0xff]  }
 0x803   :  { %4948 = vmatpush1.bf16.msra.mxu1 %v6848_v34  ;;  %5030 = vmatpush1.bf16.msra.mxu0 %v6851_v35  ;;  %v6918_v34 = vld [vmem:[#allocation16 + $0x1d0] ss:$28 sps:$4 sm:$0xff]   ;;  %v6922_v35 = vld [vmem:[#allocation16 + $0x398] ss:$28 sps:$4 sm:$0xff]  }
 0x804   :  { %4949 = vmatprep.subr.bf16.mxu1 %v6856_v36  ;;  %5031 = vmatprep.subr.bf16.mxu0 %v6859_v15  ;;  %v6925_v36 = vld [vmem:[#allocation16 + $0x20c] ss:$28 sps:$4 sm:$0xff]  }
 0x805   :  { %v6926_v15 = vld [vmem:[#allocation16 + $0x590] ss:$28 sps:$4 sm:$0xff]  }
 0x807   :  { %4950 = vmatpush1.bf16.msra.mxu1 %v6854_v37  ;;  %5032 = vmatpush1.bf16.msra.mxu0 %v6857_v38  ;;  %v6923_v37 = vld [vmem:[#allocation16 + $0x208] ss:$28 sps:$4 sm:$0xff]   ;;  %v6927_v38 = vld [vmem:[#allocation16 + $0x3d0] ss:$28 sps:$4 sm:$0xff]  }
 0x808   :  { %4951 = vmatprep.subr.bf16.mxu1 %v6862_v39  ;;  %5033 = vmatprep.subr.bf16.mxu0 %v6865_v40  ;;  %v6930_v39 = vld [vmem:[#allocation16 + $0x244] ss:$28 sps:$4 sm:$0xff]  }
 0x809   :  { %v6931_v40 = vld [vmem:[#allocation16 + $0x5c8] ss:$28 sps:$4 sm:$0xff]  }
 0x80b   :  { %4952 = vmatpush1.bf16.msra.mxu1 %v6860_v43  ;;  %5034 = vmatpush1.bf16.msra.mxu0 %v6863_v44  ;;  %v6932_v43 = vld [vmem:[#allocation16 + $0x408] ss:$28 sps:$4 sm:$0xff]   ;;  %v6935_v44 = vld [vmem:[#allocation16 + $0x27c] ss:$28 sps:$4 sm:$0xff]  }
 0x80c   :  { %4953 = vmatprep.subr.bf16.mxu1 %v6868_v45  ;;  %5035 = vmatprep.subr.bf16.mxu0 %v6871_v47  ;;  %v6936_v45 = vld [vmem:[#allocation16 + $0x600] ss:$28 sps:$4 sm:$0xff]   ;;  %v6933_v47 = vld [vmem:[#allocation16 + $0x278] ss:$28 sps:$4 sm:$0xff]  }
 0x80f   :  { %4954 = vmatpush1.bf16.msra.mxu1 %v6866_v50  ;;  %5036 = vmatpush1.bf16.msra.mxu0 %v6869_v51  ;;  %v6940_v50 = vld [vmem:[#allocation16 + $0x2b4] ss:$28 sps:$4 sm:$0xff]  }
 0x810   :  { %4955 = vmatprep.subr.bf16.mxu1 %v6874_v52  ;;  %5037 = vmatprep.subr.bf16.mxu0 %v6877_v53  ;;  %v6941_v51 = vld [vmem:[#allocation16 + $0x638] ss:$28 sps:$4 sm:$0xff]   ;;  %v6938_v52 = vld [vmem:[#allocation16 + $0x2b0] ss:$28 sps:$4 sm:$0xff]  }
 0x811   :  { %v6942_v53 = vld [vmem:[#allocation16 + $0x478] ss:$28 sps:$4 sm:$0xff]  }
 0x813   :  { %4956 = vmatpush1.bf16.msra.mxu1 %v6872_v20  ;;  %5038 = vmatpush1.bf16.msra.mxu0 %v6875_v55  ;;  %v6946_v20 = vld [vmem:[#allocation16 + $0x670] ss:$28 sps:$4 sm:$0xff]   ;;  %v6943_v55 = vld [vmem:[#allocation16 + $0x2e8] ss:$28 sps:$4 sm:$0xff]  }
 0x814   :  { %5048 = vmatprep.subr.bf16.mxu1 %v6880_v57  ;;  %5952 = vmatprep.subr.bf16.mxu0 %v6881_v59  ;;  %v6947_v57 = vld [vmem:[#allocation16 + $0x4b0] ss:$28 sps:$4 sm:$0xff]   ;;  %v6950_v59 = vld [vmem:[#allocation16 + $0x324] ss:$28 sps:$4 sm:$0xff]  }
 0x816   :  { %4958 = vmatmul.mubr.bf16.vlgmr.msra.gmra.mrb[24].mxu1 %v7711_v61  ;;  %5040 = vmatmul.mubr.bf16.vlgmr.msra.gmra.mrb[16].mxu0 %v7711_v61 }
 0x817   :  { %5049 = vmatpush1.bf16.msra.mxu1 %v6878_v25  ;;  %5080 = vmatprep.mubr.bf16.mxu1 %v7696_v42  ;;  %v6948_v25 = vld [vmem:[#allocation16 + $0x320] ss:$28 sps:$4 sm:$0xff]  }
 0x818   :  { %5953 = vmatpush3.bf16.msra.mxu0 %v6882_v62  ;;  %5162 = vmatprep.mubr.bf16.mxu0 %v7696_v42  ;;  %v6901_v42 = vld [vmem:[#allocation16 + $0x2b8] ss:$28 sps:$4 sm:$0xff]   ;;  %v6952_v62 = vld [vmem:[#allocation16 + $0x4e8] ss:$28 sps:$4 sm:$0xff]  }
 0x819   :  { %5050 = vmatprep.subr.bf16.mxu1 %v6885_v63  ;;  %5954 = vmatprep.subr.bf16.mxu0 %v6886_v0  ;;  %v6955_v63 = vld [vmem:[#allocation16 + $0x35c] ss:$28 sps:$4 sm:$0xff]  }
 0x81a   :  { %v6956_v0 = vld [vmem:[#allocation16 + $0x6e0] ss:$28 sps:$4 sm:$0xff]  }
 0x81b   :  { %5051 = vmatpush1.bf16.msra.mxu1 %v6883_v1  ;;  %v6953_v1 = vld [vmem:[#allocation16 + $0x358] ss:$28 sps:$4 sm:$0xff]  }
 0x81c   :  { %5955 = vmatpush3.bf16.msra.mxu0 %v6887_v2  ;;  %5052 = vmatprep.subr.bf16.mxu1 %v6890_v3  ;;  %v6957_v2 = vld [vmem:[#allocation16 + $0x520] ss:$28 sps:$4 sm:$0xff]   ;;  %v6960_v3 = vld [vmem:[#allocation16 + $0x394] ss:$28 sps:$4 sm:$0xff]  }
 0x81d   :  { %5956 = vmatprep.subr.bf16.mxu0 %v6891_v4  ;;  %v6958_v4 = vld [vmem:[#allocation16 + $0x390] ss:$28 sps:$4 sm:$0xff]  }
 0x81f   :  { %5053 = vmatpush1.bf16.msra.mxu1 %v6888_v5  ;;  %v6963_v5 = vld [vmem:[#allocation16 + $0x3cc] ss:$28 sps:$4 sm:$0xff]  }
 0x820   :  { %5957 = vmatpush3.bf16.msra.mxu0 %v6892_v6  ;;  %5054 = vmatprep.subr.bf16.mxu1 %v6895_v7  ;;  %v6961_v6 = vld [vmem:[#allocation16 + $0x3c8] ss:$28 sps:$4 sm:$0xff]  }
 0x821   :  { %5958 = vmatprep.subr.bf16.mxu0 %v6896_v8  ;;  %v6966_v7 = vld [vmem:[#allocation16 + $0x404] ss:$28 sps:$4 sm:$0xff]  }
 0x822   :  { %v6964_v8 = vld [vmem:[#allocation16 + $0x400] ss:$28 sps:$4 sm:$0xff]  }
 0x823   :  { %5055 = vmatpush1.bf16.msra.mxu1 %v6893_v9  ;;  %v6969_v9 = vld [vmem:[#allocation16 + $0x43c] ss:$28 sps:$4 sm:$0xff]  }
 0x824   :  { %5959 = vmatpush3.bf16.msra.mxu0 %v6897_v10  ;;  %5056 = vmatprep.subr.bf16.mxu1 %v6900_v12  ;;  %v6967_v10 = vld [vmem:[#allocation16 + $0x438] ss:$28 sps:$4 sm:$0xff]  }
 0x825   :  { %5960 = vmatprep.subr.bf16.mxu0 %v6901_v42  ;;  %v6972_v12 = vld [vmem:[#allocation16 + $0x474] ss:$28 sps:$4 sm:$0xff]  }
 0x826   :  { %v6970_v42 = vld [vmem:[#allocation16 + $0x470] ss:$28 sps:$4 sm:$0xff]  }
 0x827   :  { %5057 = vmatpush1.bf16.msra.mxu1 %v6898_v13  ;;  %v6973_v13 = vld [vmem:[#allocation16 + $0x4a8] ss:$28 sps:$4 sm:$0xff]  }
 0x828   :  { %5961 = vmatpush3.bf16.msra.mxu0 %v6902_v14  ;;  %5058 = vmatprep.subr.bf16.mxu1 %v6905_v16  ;;  %v6978_v14 = vld [vmem:[#allocation16 + $0x4e4] ss:$28 sps:$4 sm:$0xff]   ;;  %v6981_v16 = vld [vmem:[#allocation16 + $0x51c] ss:$28 sps:$4 sm:$0xff]  }
 0x829   :  { %5962 = vmatprep.subr.bf16.mxu0 %v6906_v17  ;;  %v6979_v17 = vld [vmem:[#allocation16 + $0x518] ss:$28 sps:$4 sm:$0xff]  }
 0x82b   :  { %5059 = vmatpush1.bf16.msra.mxu1 %v6903_v18  ;;  %v6984_v18 = vld [vmem:[#allocation16 + $0x554] ss:$28 sps:$4 sm:$0xff]  }
 0x82c   :  { %5963 = vmatpush3.bf16.msra.mxu0 %v6907_v19  ;;  %5060 = vmatprep.subr.bf16.mxu1 %v6910_v11  ;;  %v6982_v19 = vld [vmem:[#allocation16 + $0x550] ss:$28 sps:$4 sm:$0xff]  }
 0x82d   :  { %5964 = vmatprep.subr.bf16.mxu0 %v6911_v21  ;;  %v6987_v11 = vld [vmem:[#allocation16 + $0x58c] ss:$28 sps:$4 sm:$0xff]  }
 0x82e   :  { %v6985_v21 = vld [vmem:[#allocation16 + $0x588] ss:$28 sps:$4 sm:$0xff]  }
 0x82f   :  { %5061 = vmatpush1.bf16.msra.mxu1 %v6908_v22  ;;  %v6990_v22 = vld [vmem:[#allocation16 + $0x5c4] ss:$28 sps:$4 sm:$0xff]  }
 0x830   :  { %5965 = vmatpush3.bf16.msra.mxu0 %v6912_v23  ;;  %5062 = vmatprep.subr.bf16.mxu1 %v6915_v24  ;;  %v6988_v23 = vld [vmem:[#allocation16 + $0x5c0] ss:$28 sps:$4 sm:$0xff]  }
 0x831   :  { %5966 = vmatprep.subr.bf16.mxu0 %v6916_v26  ;;  %v6993_v24 = vld [vmem:[#allocation16 + $0x5fc] ss:$28 sps:$4 sm:$0xff]  }
 0x832   :  { %v6991_v26 = vld [vmem:[#allocation16 + $0x5f8] ss:$28 sps:$4 sm:$0xff]  }
 0x833   :  { %5063 = vmatpush1.bf16.msra.mxu1 %v6913_v27  ;;  %v6996_v27 = vld [vmem:[#allocation16 + $0x634] ss:$28 sps:$4 sm:$0xff]  }
 0x834   :  { %5967 = vmatpush3.bf16.msra.mxu0 %v6917_v28  ;;  %5064 = vmatprep.subr.bf16.mxu1 %v6920_v29  ;;  %v6994_v28 = vld [vmem:[#allocation16 + $0x630] ss:$28 sps:$4 sm:$0xff]  }
 0x835   :  { %5974 = vmatprep.subr.bf16.mxu0 %v6921_v33  ;;  %v6999_v29 = vld [vmem:[#allocation16 + $0x66c] ss:$28 sps:$4 sm:$0xff]  }
 0x836   :  { %v6997_v33 = vld [vmem:[#allocation16 + $0x668] ss:$28 sps:$4 sm:$0xff]  }
 0x837   :  { %5163 = vmatmul.mubr.bf16.vlgmr.msra.gmra.mrb[20].mxu0 %v7698_v46  ;;  %5065 = vmatpush1.bf16.msra.mxu1 %v6918_v34  ;;  %v7002_v34 = vld [vmem:[#allocation16 + $0x6a4] ss:$28 sps:$4 sm:$0xff]  }
 0x838   :  { %5975 = vmatpush3.bf16.msra.mxu0 %v6922_v35  ;;  %5202 = vmatprep.mubr.bf16.mxu0 %v7702_v49  ;;  %v7000_v35 = vld [vmem:[#allocation16 + $0x6a0] ss:$28 sps:$4 sm:$0xff]  }
 0x839   :  { %5066 = vmatprep.subr.bf16.mxu1 %v6925_v36  ;;  %5976 = vmatprep.subr.bf16.mxu0 %v6926_v15  ;;  %v7005_v36 = vld [vmem:[#allocation16 + $0x6dc] ss:$28 sps:$4 sm:$0xff]  }
 0x83a   :  { %v7003_v15 = vld [vmem:[#allocation16 + $0x6d8] ss:$28 sps:$4 sm:$0xff]  }
 0x83b   :  { %5067 = vmatpush1.bf16.msra.mxu1 %v6923_v37  ;;  %v7726_v37 = vld [vmem:[%s7770_s16] sm:$0xff]  ;;  %s7286_s16 = smov [#allocation17]  }
 0x83c   :  { %5977 = vmatpush3.bf16.msra.mxu0 %v6927_v38  ;;  %5068 = vmatprep.subr.bf16.mxu1 %v6930_v39  ;;  %v3700_v38 = vrot.slane %v7726_v37, %v7557_v31  ;;  %v3708_v39 = vrot.slane %v7726_v37, %v7565_v56  ;;  %s5265_s9 = sshll.u32 %s7286_s16, 4  ;;  %s5266_s9 = int_to_ptr.vmem [resolvable:$true] %s5265_s9 }
 0x83d   :  { %5978 = vmatprep.subr.bf16.mxu0 %v6931_v40  ;;  %v3704_v40 = vrot.slane %v7726_v37, %v7560_v32  ;;  %s7232_s13 = scalar_lea.vmem %s5266_s9, 896  ;;  %p7237_p3 = scmp.lt.s32.totalorder %s5266_s9, %s5266_s9 }
 0x83e   :  { %p7233_p2 = scmp.ne.s32.totalorder %s5266_s9, %s7232_s13  ;;  %p7238_p4 = scmp.lt.s32.totalorder %s7232_s13, %s7232_s13 }
 0x83f   :  { %5069 = vmatpush1.bf16.msra.mxu1 %v6928_v41  ;;  %v3712_v41 = vrot.slane %v7726_v37, %v7568_v58 }
 0x840   :  { %5979 = vmatpush3.bf16.msra.mxu0 %v6932_v43  ;;  %5070 = vmatprep.subr.bf16.mxu1 %v6935_v44  ;;  %p7239_p5 = por %p7238_p4, %p7237_p3 }
 0x841   :  { %5980 = vmatprep.subr.bf16.mxu0 %v6936_v45 }
 0x842   :  { %p7240_p6 = pnand %p7239_p5, %p7233_p2 }
 0x843   :  { %5071 = vmatpush1.bf16.msra.mxu1 %v6933_v47 }
 0x844   :  { %5981 = vmatpush3.bf16.msra.mxu0 %v6937_v48  ;;  %5072 = vmatprep.subr.bf16.mxu1 %v6940_v50 }
 0x845   :  { %5982 = vmatprep.subr.bf16.mxu0 %v6941_v51 }
 0x847   :  { %5073 = vmatpush1.bf16.msra.mxu1 %v6938_v52 }
 0x848   :  { %5983 = vmatpush3.bf16.msra.mxu0 %v6942_v53  ;;  %5074 = vmatprep.subr.bf16.mxu1 %v6945_v54 }
 0x849   :  { %5984 = vmatprep.subr.bf16.mxu0 %v6946_v20 }
 0x84b   :  { %5075 = vmatpush1.bf16.msra.mxu1 %v6943_v55 }
 0x84c   :  { %5985 = vmatpush3.bf16.msra.mxu0 %v6947_v57  ;;  %5076 = vmatprep.subr.bf16.mxu1 %v6950_v59 }
 0x84d   :  { %5986 = vmatprep.subr.bf16.mxu0 %v6951_v60 }
 0x84f   :  { %5077 = vmatpush1.bf16.msra.mxu1 %v6948_v25 }
 0x850   :  { %5987 = vmatpush3.bf16.msra.mxu0 %v6952_v62  ;;  %5078 = vmatprep.subr.bf16.mxu1 %v6955_v63 }
 0x851   :  { %5988 = vmatprep.subr.bf16.mxu0 %v6956_v0 }
 0x853   :  { %5079 = vmatpush1.bf16.msra.mxu1 %v6953_v1 }
 0x854   :  { %5989 = vmatpush3.bf16.msra.mxu0 %v6957_v2  ;;  %5089 = vmatprep.subr.bf16.mxu1 %v6960_v3 }
 0x856   :  { %5081 = vmatmul.mubr.bf16.vlgmr.msra.gmra.mrb[28].mxu1 %v7698_v46  ;;  %v6975_v46 = vld [vmem:[#allocation16 + $0x4ac] ss:$28 sps:$4 sm:$0xff]  }
 0x857   :  { %5203 = vmatmul.mubr.bf16.vlgmr.msra.gmra.mrb[24].mxu0 %v7711_v61  ;;  %5090 = vmatpush1.bf16.msra.mxu1 %v6958_v4 }
 0x858   :  { %5121 = vmatprep.mubr.bf16.mxu1 %v7702_v49  ;;  %5091 = vmatprep.subr.bf16.mxu1 %v6963_v5  ;;  %v6976_v49 = vld [vmem:[#allocation16 + $0x4e0] ss:$28 sps:$4 sm:$0xff]  }
 0x85b   :  { %5092 = vmatpush1.bf16.msra.mxu1 %v6961_v6 }
 0x85c   :  { %5093 = vmatprep.subr.bf16.mxu1 %v6966_v7 }
 0x85f   :  { %5094 = vmatpush1.bf16.msra.mxu1 %v6964_v8 }
 0x860   :  { %5095 = vmatprep.subr.bf16.mxu1 %v6969_v9 }
 0x863   :  { %5096 = vmatpush1.bf16.msra.mxu1 %v6967_v10  ;;  %v3723_v10 = vsub.s32 6, %v7554_v30 }
 0x864   :  { %5097 = vmatprep.subr.bf16.mxu1 %v6972_v12 }
 0x865   :  { %v3724_v12 = vrot.slane %v7726_v37, %v3723_v10 }
 0x867   :  { %5098 = vmatpush1.bf16.msra.mxu1 %v6970_v42 }
 0x868   :  { %5099 = vmatprep.subr.bf16.mxu1 %v6975_v46 }
 0x86b   :  { %5100 = vmatpush1.bf16.msra.mxu1 %v6973_v13 }
 0x86c   :  { %5101 = vmatprep.subr.bf16.mxu1 %v6978_v14 }
 0x86f   :  { %5102 = vmatpush1.bf16.msra.mxu1 %v6976_v49 }
 0x870   :  { %5103 = vmatprep.subr.bf16.mxu1 %v6981_v16 }
 0x873   :  { %5104 = vmatpush1.bf16.msra.mxu1 %v6979_v17 }
 0x874   :  { %5105 = vmatprep.subr.bf16.mxu1 %v6984_v18 }
 0x877   :  { %5106 = vmatpush1.bf16.msra.mxu1 %v6982_v19 }
 0x878   :  { %5107 = vmatprep.subr.bf16.mxu1 %v6987_v11 }
 0x87b   :  { %5108 = vmatpush1.bf16.msra.mxu1 %v6985_v21 }
 0x87c   :  { %5109 = vmatprep.subr.bf16.mxu1 %v6990_v22  ;;  %v3715_v22 = vsub.s32 4, %v7554_v30 }
 0x87f   :  { %5110 = vmatpush1.bf16.msra.mxu1 %v6988_v23  ;;  %v3719_v23 = vsub.s32 5, %v7554_v30 }
 0x880   :  { %5111 = vmatprep.subr.bf16.mxu1 %v6993_v24  ;;  %v3716_v24 = vrot.slane %v7726_v37, %v3715_v22 }
 0x883   :  { %5112 = vmatpush1.bf16.msra.mxu1 %v6991_v26  ;;  %v3720_v26 = vrot.slane %v7726_v37, %v3719_v23 }
 0x884   :  { %5113 = vmatprep.subr.bf16.mxu1 %v6996_v27 }
 0x887   :  { %5114 = vmatpush1.bf16.msra.mxu1 %v6994_v28 }
 0x888   :  { %5115 = vmatprep.subr.bf16.mxu1 %v6999_v29 }
 0x88b   :  { %5116 = vmatpush1.bf16.msra.mxu1 %v6997_v33 }
 0x88c   :  { %5117 = vmatprep.subr.bf16.mxu1 %v7002_v34 }
 0x88f   :  { %5118 = vmatpush1.bf16.msra.mxu1 %v7000_v35 }
 0x890   :  { %5119 = vmatprep.subr.bf16.mxu1 %v7005_v36 }
 0x893   :  { %5120 = vmatpush1.bf16.msra.mxu1 %v7003_v15 }
 0x896   :  { %5122 = vmatmul.mubr.bf16.vlgmr.msra.gmra.mrb[28].mxu1 %v7711_v61 }
 0x8e9   :  { %v4959_v43 = vpop.f32.mrb[24].mxu1  ;;  %v5041_v44 = vpop.f32.mrb[16].mxu0 }
 0x8ea   :  { %v6036_v61 = vadd.f32 %v4959_v43, %v3700_v38  ;;  %v6038_v45 = vadd.f32 %v5041_v44, %v3708_v39  ;;  %v4961_v47 = vpop.f32.mrb[25].mxu1  ;;  %v5043_v48 = vpop.f32.mrb[17].mxu0 }
 0x8eb   :  { %v6037_v50 = vadd.f32 %v4961_v47, %v3704_v40  ;;  %v6039_v51 = vadd.f32 %v5043_v48, %v3712_v41  ;;  %v4963_v52 = vpop.f32.mrb[26].mxu1  ;;  %v5045_v53 = vpop.f32.mrb[18].mxu0 }
 0x8ec   :  { %v5909_v31 = vmul.f32 -1.442695, %v6036_v61  ;;  %v5911_v54 = vmul.f32 -1.442695, %v6038_v45  ;;  %v4964_v20 = vpop.f32.mrb[27].mxu1  ;;  %v5046_v56 = vpop.f32.mrb[19].mxu0 }
 0x8ed   :  { %v5910_v55 = vmul.f32 -1.442695, %v6037_v50  ;;  %v5912_v57 = vmul.f32 -1.442695, %v6039_v51 }
 0x8ee   :  { %7006 = vpow2.f32 %v5909_v31 }
 0x8ef   :  { %7008 = vpow2.f32 %v5911_v54 }
 0x8f0   :  { %7010 = vpow2.f32 %v5910_v55 }
 0x8f1   :  { %7012 = vpow2.f32 %v5912_v57 }
 0x8f8   :  { %v7007_v32 = vpop.eup %7006 }
 0x8f9   :  { %v7009_v58 = vpop.eup %7008  ;;  %v5231_v59 = vadd.f32 1.0, %v7007_v32 }
 0x8fa   :  { %v7011_v60 = vpop.eup %7010  ;;  %v5233_v25 = vadd.f32 1.0, %v7009_v58 }
 0x8fb   :  { %v7013_v62 = vpop.eup %7012  ;;  %7014 = vrcp.f32 %v5231_v59  ;;  %v5232_v63 = vadd.f32 1.0, %v7011_v60 }
 0x8fc   :  { %7016 = vrcp.f32 %v5233_v25  ;;  %v5234_v0 = vadd.f32 1.0, %v7013_v62 }
 0x8fd   :  { %7018 = vrcp.f32 %v5232_v63 }
 0x8fe   :  { %7020 = vrcp.f32 %v5234_v0 }
 0x905   :  { %v7015_v1 = vpop.eup %7014 }
 0x906   :  { %v7017_v2 = vpop.eup %7016  ;;  %5252 = vst [vmem:[#allocation17] sm:$0xff] %v7015_v1 }
 0x907   :  { %v7019_v3 = vpop.eup %7018  ;;  %5254 = vst [vmem:[#allocation17 + $0x10] sm:$0xff] %v7017_v2 }
 0x908   :  { %v7021_v4 = vpop.eup %7020  ;;  %5253 = vst [vmem:[#allocation17 + $0x8] sm:$0xff] %v7019_v3 }
 0x909   :  { %5255 = vst [vmem:[#allocation17 + $0x18] sm:$0xff] %v7021_v4 }
 0x90a   :  { %v5968_v5 = vpop.f32.mrb[20].mxu0 }
 0x90b   :  { %v5969_v6 = vpop.f32.mrb[21].mxu0 }
 0x90c   :  { %v5970_v7 = vadd.f32 %v5969_v6, %v5968_v5  ;;  %v5971_v8 = vpop.f32.mrb[22].mxu0 }
 0x90d   :  { %v5972_v9 = vpop.f32.mrb[23].mxu0 }
 0x90e   :  { %v5165_v13 = vadd.f32 %v5970_v7, %v3724_v12 }
 0x92a   :  { %v5990_v42 = vpop.f32.mrb[24].mxu0 }
 0x92b   :  { %v5991_v46 = vpop.f32.mrb[25].mxu0 }
 0x92c   :  { %v5992_v14 = vadd.f32 %v5991_v46, %v5990_v42  ;;  %v5993_v49 = vpop.f32.mrb[26].mxu0 }
 0x92d   :  { %v5994_v16 = vpop.f32.mrb[27].mxu0 }
 0x92e   :  { %v5205_v17 = vadd.f32 %v5992_v14, %v5165_v13 }
 0x930   :  { %v5915_v18 = vmul.f32 -1.442695, %v5205_v17 }
 0x932   :  { %7022 = vpow2.f32 %v5915_v18 }
 0x93c   :  { %v7023_v19 = vpop.eup %7022 }
 0x93d   :  { %v5237_v11 = vadd.f32 1.0, %v7023_v19 }
 0x93f   :  { %7024 = vrcp.f32 %v5237_v11 }
 0x949   :  { %v7025_v21 = vpop.eup %7024 }
 0x94a   :  { %5258 = vst [vmem:[#allocation17 + $0x30] sm:$0xff] %v7025_v21 }
 0x969   :  { %v5123_v27 = vpop.f32.mrb[28].mxu1 }
 0x96a   :  { %v6040_v28 = vadd.f32 %v5123_v27, %v3716_v24  ;;  %v5125_v29 = vpop.f32.mrb[29].mxu1 }
 0x96b   :  { %v6041_v33 = vadd.f32 %v5125_v29, %v3720_v26  ;;  %v5127_v34 = vpop.f32.mrb[30].mxu1 }
 0x96c   :  { %v5913_v35 = vmul.f32 -1.442695, %v6040_v28  ;;  %v5128_v36 = vpop.f32.mrb[31].mxu1 }
 0x96d   :  { %v5914_v15 = vmul.f32 -1.442695, %v6041_v33 }
 0x96e   :  { %7026 = vpow2.f32 %v5913_v35 }
 0x96f   :  { %7028 = vpow2.f32 %v5914_v15 }
 0x978   :  { %v7027_v38 = vpop.eup %7026 }
 0x979   :  { %v7029_v39 = vpop.eup %7028  ;;  %v5235_v40 = vadd.f32 1.0, %v7027_v38 }
 0x97a   :  { %v5236_v41 = vadd.f32 1.0, %v7029_v39 }
 0x97b   :  { %7030 = vrcp.f32 %v5235_v40 }
 0x97c   :  { %7032 = vrcp.f32 %v5236_v41 }
 0x985   :  { %v7031_v30 = vpop.eup %7030 }
 0x986   :  { %v7033_v37 = vpop.eup %7032  ;;  %5256 = vst [vmem:[#allocation17 + $0x20] sm:$0xff] %v7031_v30 }
 0x987   :  { %5257 = vst [vmem:[#allocation17 + $0x28] sm:$0xff] %v7033_v37 }
 0x988   :  { %7243 = shalt.err (!%p7240_p6)
}
 0x989   :  { %s7244_s15 = scalar_lea.hbm %s7771_s17, 896 }
 0x98a   :  { %p7245_p7 = scmp.ne.s32.totalorder %s7771_s17, %s7244_s15  ;;  %p7248_p8 = scmp.lt.u32.totalorder %s7244_s15, %s7771_s17 }
 0x98c   :  { %p7250_p9 = pnand %p7248_p8, %p7245_p7 }
 0x98e   :  { %7253 = shalt.err (!%p7250_p9)
}
 0x98f   :  { %5268 = dma.vmem_to_hbm [thread:$0]  %s5266_s9, 896, %s7771_s17, [#allocation4]  }
 0x990   :  { %7264 = dma.done.wait [#allocation4], 896  }
 0x991   :  { %7265 = vsyncadd [#allocation4], 4294966400 }
 0x992   :  { %5272 = vsyncpa [#allocation3], 1 }
 0x993   :  { %5273 = vsyncpa [#allocation6], 1 }
 0x994   :  { %5274 = vsyncpa [#allocation9], 1 }
 0x995   :  { %5275 = vsyncpa [#allocation12], 1 }
 0x996   :  { %5276 = vsyncpa [#allocation15], 1 }
 0x997   :  { %5277 = vsyncpa [#allocation4], 1 }

</bundles_post_ra>
